<compile_context>
chip_gen: v6e
topology: v6e:2x2x1
jax: 0.10.0
libtpu: 0.0.40
codegen_flags: <defaults>
</compile_context>

<pallas_src>
import math

import jax
import jax.numpy as jnp
from jax import lax
from jax.experimental import pallas as pl
from jax.experimental.pallas import tpu as pltpu

_BN_EPS = 1e-5
_SQRT_HALF = math.sqrt(0.5)
# x[M,K] . w[N,K] -> [M,N]  (== x @ w.T, no host-side transpose needed)
_CONTRACT_LAST = (((1,), (1,)), ((), ()))


def _make_decoder_kernel(*, n_shared, n_independent, chunks_per_block, vbs):
  n_layers = n_shared + n_independent

  def gbn(h, g, b):
    # Ghost BatchNorm over `chunks_per_block` independent virtual batches.
    # Single-pass stats + folded scale/shift: out = h*scale + shift.
    c, v, d = chunks_per_block, vbs, h.shape[-1]
    hc = h.reshape(c, v, d)
    mean = jnp.mean(hc, axis=1, keepdims=True)          # (c,1,d)
    msq = jnp.mean(hc * hc, axis=1, keepdims=True)      # (c,1,d)
    var = msq - mean * mean                             # biased (train mode)
    scale = g * lax.rsqrt(var + _BN_EPS)                # (c,1,d)
    shift = b - mean * scale
    return (hc * scale + shift).reshape(h.shape)

  def glu(x, w_lin, w_gate, g_lin, g_gate, b_lin, b_gate):
    # Lane-aligned lin/gate split: two n_d-wide dots instead of one 2*n_d dot
    # followed by an intra-vreg slice.
    h_lin = lax.dot_general(x, w_lin, _CONTRACT_LAST,
                            preferred_element_type=jnp.float32)
    h_gate = lax.dot_general(x, w_gate, _CONTRACT_LAST,
                             preferred_element_type=jnp.float32)
    h_lin = gbn(h_lin, g_lin, b_lin)
    h_gate = gbn(h_gate, g_gate, b_gate)
    return h_lin * jax.nn.sigmoid(h_gate)

  def kernel(steps_ref, w_sh_lin_ref, w_sh_gate_ref, w_sp_lin_ref,
             w_sp_gate_ref, g_lin_ref, g_gate_ref, b_lin_ref, b_gate_ref,
             w_rec_ref, out_ref, acc_ref):
    step = pl.program_id(1)

    @pl.when(step == 0)
    def _init():
      acc_ref[...] = jnp.zeros_like(acc_ref)

    x = steps_ref[0].astype(jnp.float32)            # (MB, n_d)
    g_lin, g_gate = g_lin_ref[0], g_gate_ref[0]     # (n_layers, n_d)
    b_lin, b_gate = b_lin_ref[0], b_gate_ref[0]
    w_sp_lin, w_sp_gate = w_sp_lin_ref[0], w_sp_gate_ref[0]

    def layer(xin, li):
      if li < n_shared:
        wl, wg = w_sh_lin_ref[li], w_sh_gate_ref[li]
      else:
        wl, wg = w_sp_lin[li - n_shared], w_sp_gate[li - n_shared]
      return glu(xin, wl, wg,
                 g_lin[li:li + 1, :], g_gate[li:li + 1, :],
                 b_lin[li:li + 1, :], b_gate[li:li + 1, :])

    # Shared GLU block (first=True): no residual on layer 0.
    x = layer(x, 0)
    for li in range(1, n_shared):
      x = (x + layer(x, li)) * _SQRT_HALF
    # Step-specific GLU block (first=False): residual on every layer.
    for li in range(n_shared, n_layers):
      x = (x + layer(x, li)) * _SQRT_HALF

    acc_ref[...] += x

    @pl.when(step == pl.num_programs(1) - 1)
    def _finalize():
      res = acc_ref[...]
      out_ref[...] = lax.dot_general(
          res, w_rec_ref[...], _CONTRACT_LAST,
          preferred_element_type=jnp.float32).astype(out_ref.dtype)

  return kernel


def _pick_chunks_per_block(n_chunks, vbs, batch, target_rows):
  """Largest whole-chunk row block (<= target_rows) with sublane-aligned rows."""
  candidates = []
  for c in range(1, n_chunks + 1):
    if n_chunks % c:
      continue
    rows = c * vbs
    if rows % 8 != 0 and rows != batch:   # (8,128) BlockSpec rule on 2nd-minor
      continue
    candidates.append(c)
  within = [c for c in candidates if c * vbs <= target_rows]
  return max(within) if within else min(candidates)


def tabnet_decoder(steps_output, w_shared, w_spec, gamma, beta, w_rec, *,
                   virtual_batch_size=128, target_block_rows=512):
  """Fused TabNetDecoder forward (training-mode ghost BN).

  steps_output: [n_steps, B, n_d]
  w_shared:     [n_shared, 2*n_d, n_d]                 (shared fc, bias=False)
  w_spec:       [n_steps, n_independent, 2*n_d, n_d]   (per-step fc, bias=False)
  gamma, beta:  [n_steps, n_shared + n_independent, 2*n_d]
  w_rec:        [input_dim, n_d]                       (reconstruction fc)
  """
  n_steps, batch, n_d = steps_output.shape
  n_shared = w_shared.shape[0]
  n_independent = w_spec.shape[1]
  n_layers = n_shared + n_independent
  input_dim = w_rec.shape[0]
  two_nd = 2 * n_d
  # TODO(synk): n_shared == 0 / n_independent == 0 (Identity blocks) unsupported.
  assert n_shared >= 1 and n_independent >= 1
  assert w_shared.shape == (n_shared, two_nd, n_d)
  assert w_spec.shape == (n_steps, n_independent, two_nd, n_d)
  assert gamma.shape == (n_steps, n_layers, two_nd)
  assert beta.shape == (n_steps, n_layers, two_nd)
  assert w_rec.shape == (input_dim, n_d)

  # Ghost-batch split (torch.chunk semantics, evenly divisible case only).
  n_chunks = int(math.ceil(batch / virtual_batch_size))
  # TODO(synk): torch.chunk allows an uneven last chunk; unsupported here.
  assert batch % n_chunks == 0, "batch must split evenly into ghost batches"
  vbs = batch // n_chunks

  chunks_per_block = _pick_chunks_per_block(n_chunks, vbs, batch,
                                            target_block_rows)
  mb = chunks_per_block * vbs              # rows per grid step
  grid = (batch // mb, n_steps)

  # Lane-aligned lin/gate split of weights and BN affine parameters.
  w_sh_lin, w_sh_gate = w_shared[:, :n_d, :], w_shared[:, n_d:, :]
  w_sp_lin, w_sp_gate = w_spec[:, :, :n_d, :], w_spec[:, :, n_d:, :]
  g_lin, g_gate = gamma[:, :, :n_d], gamma[:, :, n_d:]
  b_lin, b_gate = beta[:, :, :n_d], beta[:, :, n_d:]

  kernel = _make_decoder_kernel(
      n_shared=n_shared, n_independent=n_independent,
      chunks_per_block=chunks_per_block, vbs=vbs)

  const3 = lambda r, s: (0, 0, 0)
  per_step3 = lambda r, s: (s, 0, 0)
  per_step4 = lambda r, s: (s, 0, 0, 0)

  grid_spec = pltpu.PrefetchScalarGridSpec(
      num_scalar_prefetch=0,
      grid=grid,
      in_specs=[
          pl.BlockSpec((1, mb, n_d), lambda r, s: (s, r, 0)),       # step outputs
          pl.BlockSpec((n_shared, n_d, n_d), const3),               # shared W lin
          pl.BlockSpec((n_shared, n_d, n_d), const3),               # shared W gate
          pl.BlockSpec((1, n_independent, n_d, n_d), per_step4),    # step W lin
          pl.BlockSpec((1, n_independent, n_d, n_d), per_step4),    # step W gate
          pl.BlockSpec((1, n_layers, n_d), per_step3),              # gamma lin
          pl.BlockSpec((1, n_layers, n_d), per_step3),              # gamma gate
          pl.BlockSpec((1, n_layers, n_d), per_step3),              # beta lin
          pl.BlockSpec((1, n_layers, n_d), per_step3),              # beta gate
          pl.BlockSpec((input_dim, n_d), lambda r, s: (0, 0)),      # W_rec
      ],
      out_specs=pl.BlockSpec((mb, input_dim), lambda r, s: (r, 0)),
      scratch_shapes=[pltpu.VMEM((mb, n_d), jnp.float32)],
  )

  # Rough cost hint for the XLA scheduler around the custom call.
  flops = (2 * batch * n_d * two_nd * n_layers * n_steps
           + 2 * batch * n_d * input_dim)
  bytes_accessed = (steps_output.size + batch * input_dim) * 4
  transcendentals = batch * n_d * n_layers * n_steps  # sigmoid

  return pl.pallas_call(
      kernel,
      out_shape=jax.ShapeDtypeStruct((batch, input_dim), steps_output.dtype),
      grid_spec=grid_spec,
      compiler_params=pltpu.CompilerParams(
          dimension_semantics=("parallel", "arbitrary")),
      cost_estimate=pl.CostEstimate(flops=flops,
                                    transcendentals=transcendentals,
                                    bytes_accessed=bytes_accessed),
  )(steps_output, w_sh_lin, w_sh_gate, w_sp_lin, w_sp_gate,
    g_lin, g_gate, b_lin, b_gate, w_rec)


# ----------------------------------------------------------------------------
# Pure-JAX reference mirroring the PyTorch forward (training-mode BN).
# TODO(synk): running-mean/var (momentum) updates are not modelled anywhere —
# only training-mode forward semantics are reproduced.
# ----------------------------------------------------------------------------
def _reference_decoder(steps_output, w_shared, w_spec, gamma, beta, w_rec, vbs):
  n_steps, batch, n_d = steps_output.shape
  n_shared = w_shared.shape[0]
  n_independent = w_spec.shape[1]

  def gbn(h):
    n_chunks = int(math.ceil(h.shape[0] / vbs))
    size = h.shape[0] // n_chunks
    outs = []
    for c in range(n_chunks):
      hc = h[c * size:(c + 1) * size]
      mean = jnp.mean(hc, axis=0, keepdims=True)
      var = jnp.mean((hc - mean) ** 2, axis=0, keepdims=True)
      outs.append((hc - mean) / jnp.sqrt(var + _BN_EPS))
    return jnp.concatenate(outs, axis=0)

  def glu(x, w, g, b):
    h = x @ w.T
    h = gbn(h) * g + b
    return h[:, :n_d] * jax.nn.sigmoid(h[:, n_d:])

  res = jnp.zeros((batch, n_d), jnp.float32)
  for s in range(n_steps):
    x = steps_output[s]
    x = glu(x, w_shared[0], gamma[s, 0], beta[s, 0])
    for l in range(1, n_shared):
      x = (x + glu(x, w_shared[l], gamma[s, l], beta[s, l])) * _SQRT_HALF
    for l in range(n_independent):
      li = n_shared + l
      x = (x + glu(x, w_spec[s, l], gamma[s, li], beta[s, li])) * _SQRT_HALF
    res = res + x
  return res @ w_rec.T


if __name__ == "__main__":
  # Small, TabNet-shaped demo: n_d (hidden) = 32, reconstructed input_dim = 24,
  # 3 decoder steps, 2 shared + 2 independent GLU layers, batch 128 with
  # virtual_batch_size 32 -> 4 ghost chunks (all batched into one grid block).
  input_dim, n_d = 24, 32
  n_steps, n_shared, n_independent = 3, 2, 2
  batch, vbs = 128, 32
  n_layers = n_shared + n_independent
  two_nd = 2 * n_d

  key = jax.random.PRNGKey(0)
  ks = jax.random.split(key, 6)

  steps_output = jax.random.normal(ks[0], (n_steps, batch, n_d), jnp.float32)

  # initialize_glu: xavier_normal_ with gain = sqrt((in + 2*out)/sqrt(in))
  gain_glu = math.sqrt((n_d + two_nd) / math.sqrt(n_d))
  std_glu = gain_glu * math.sqrt(2.0 / (n_d + two_nd))
  w_shared = std_glu * jax.random.normal(ks[1], (n_shared, two_nd, n_d),
                                         jnp.float32)
  w_spec = std_glu * jax.random.normal(
      ks[2], (n_steps, n_independent, two_nd, n_d), jnp.float32)

  # BatchNorm affine params (randomized a bit so the check is non-trivial).
  gamma = 1.0 + 0.1 * jax.random.normal(ks[3], (n_steps, n_layers, two_nd),
                                        jnp.float32)
  beta = 0.1 * jax.random.normal(ks[4], (n_steps, n_layers, two_nd),
                                 jnp.float32)

  # initialize_non_glu for the reconstruction layer.
  gain_rec = math.sqrt((n_d + input_dim) / math.sqrt(4 * n_d))
  std_rec = gain_rec * math.sqrt(2.0 / (n_d + input_dim))
  w_rec = std_rec * jax.random.normal(ks[5], (input_dim, n_d), jnp.float32)

  out = tabnet_decoder(steps_output, w_shared, w_spec, gamma, beta, w_rec,
                       virtual_batch_size=vbs)
  out = jax.block_until_ready(out)

  ref = _reference_decoder(steps_output, w_shared, w_spec, gamma, beta, w_rec,
                           vbs)
  assert out.shape == (batch, input_dim), out.shape
  assert jnp.allclose(out, ref, atol=5e-3, rtol=5e-3), float(
      jnp.max(jnp.abs(out - ref)))

  print("KERNEL_OK")
</pallas_src>

<mosaic_0001>
module attributes {stable_mosaic.version = 11 : i64} {
  func.func @kernel(%arg0: i32, %arg1: i32, %arg2: memref<1x128x32xf32, #tpu.memory_space<vmem>>, %arg3: memref<2x32x32xf32, #tpu.memory_space<vmem>>, %arg4: memref<2x32x32xf32, #tpu.memory_space<vmem>>, %arg5: memref<1x2x32x32xf32, #tpu.memory_space<vmem>>, %arg6: memref<1x2x32x32xf32, #tpu.memory_space<vmem>>, %arg7: memref<1x4x32xf32, #tpu.memory_space<vmem>>, %arg8: memref<1x4x32xf32, #tpu.memory_space<vmem>>, %arg9: memref<1x4x32xf32, #tpu.memory_space<vmem>>, %arg10: memref<1x4x32xf32, #tpu.memory_space<vmem>>, %arg11: memref<24x32xf32, #tpu.memory_space<vmem>>, %arg12: memref<128x24xf32, #tpu.memory_space<vmem>>, %arg13: memref<128x32xf32, #tpu.memory_space<vmem>>) attributes {dimension_semantics = [#tpu.dimension_semantics<parallel>, #tpu.dimension_semantics<arbitrary>], iteration_bounds = array<i64: 1, 3>, scalar_prefetch = 0 : i64, scratch_operands = 1 : i64, tpu.core_type = #tpu.core_type<tc>, window_params = [{transform_indices = @transform_0, window_bounds = array<i64: 1, 128, 32>}, {pipeline_mode = #tpu.pipeline_mode<synchronous>, transform_indices = @transform_1, window_bounds = array<i64: 2, 32, 32>}, {pipeline_mode = #tpu.pipeline_mode<synchronous>, transform_indices = @transform_2, window_bounds = array<i64: 2, 32, 32>}, {transform_indices = @transform_3, window_bounds = array<i64: 1, 2, 32, 32>}, {transform_indices = @transform_4, window_bounds = array<i64: 1, 2, 32, 32>}, {transform_indices = @transform_5, window_bounds = array<i64: 1, 4, 32>}, {transform_indices = @transform_6, window_bounds = array<i64: 1, 4, 32>}, {transform_indices = @transform_7, window_bounds = array<i64: 1, 4, 32>}, {transform_indices = @transform_8, window_bounds = array<i64: 1, 4, 32>}, {pipeline_mode = #tpu.pipeline_mode<synchronous>, transform_indices = @transform_9, window_bounds = array<i64: 24, 32>}, {transform_indices = @transform_10, window_bounds = array<i64: 128, 24>}]} {
    %c0_i32 = arith.constant 0 : i32
    %0 = arith.cmpi eq, %arg1, %c0_i32 : i32
    %1 = arith.extui %0 : i1 to i32
    %c0_i32_0 = arith.constant 0 : i32
    %2 = arith.cmpi ne, %1, %c0_i32_0 : i32
    scf.if %2 {
      %cst_93 = arith.constant 0.000000e+00 : f32
      %312 = vector.broadcast %cst_93 : f32 to vector<128x32xf32>
      %c0_94 = arith.constant 0 : index
      %c0_95 = arith.constant 0 : index
      %313 = vector.load %arg13[%c0_94, %c0_95] : memref<128x32xf32, #tpu.memory_space<vmem>>, vector<128x32xf32>
      tpu.vector_store %arg13[%c0_94, %c0_95], %312 {strides = array<i32>} : memref<128x32xf32, #tpu.memory_space<vmem>>, vector<128x32xf32>,
    } else {
    }
    %c0 = arith.constant 0 : index
    %c0_1 = arith.constant 0 : index
    %c0_2 = arith.constant 0 : index
    %3 = vector.load %arg2[%c0, %c0_1, %c0_2] : memref<1x128x32xf32, #tpu.memory_space<vmem>>, vector<1x128x32xf32>
    %4 = vector.shape_cast %3 : vector<1x128x32xf32> to vector<128x32xf32>
    %c0_3 = arith.constant 0 : index
    %c0_4 = arith.constant 0 : index
    %c0_5 = arith.constant 0 : index
    %5 = vector.load %arg7[%c0_3, %c0_4, %c0_5] : memref<1x4x32xf32, #tpu.memory_space<vmem>>, vector<1x4x32xf32>
    %6 = vector.shape_cast %5 : vector<1x4x32xf32> to vector<4x32xf32>
    %c0_6 = arith.constant 0 : index
    %c0_7 = arith.constant 0 : index
    %c0_8 = arith.constant 0 : index
    %7 = vector.load %arg8[%c0_6, %c0_7, %c0_8] : memref<1x4x32xf32, #tpu.memory_space<vmem>>, vector<1x4x32xf32>
    %8 = vector.shape_cast %7 : vector<1x4x32xf32> to vector<4x32xf32>
    %c0_9 = arith.constant 0 : index
    %c0_10 = arith.constant 0 : index
    %c0_11 = arith.constant 0 : index
    %9 = vector.load %arg9[%c0_9, %c0_10, %c0_11] : memref<1x4x32xf32, #tpu.memory_space<vmem>>, vector<1x4x32xf32>
    %10 = vector.shape_cast %9 : vector<1x4x32xf32> to vector<4x32xf32>
    %c0_12 = arith.constant 0 : index
    %c0_13 = arith.constant 0 : index
    %c0_14 = arith.constant 0 : index
    %11 = vector.load %arg10[%c0_12, %c0_13, %c0_14] : memref<1x4x32xf32, #tpu.memory_space<vmem>>, vector<1x4x32xf32>
    %12 = vector.shape_cast %11 : vector<1x4x32xf32> to vector<4x32xf32>
    %c0_15 = arith.constant 0 : index
    %c0_16 = arith.constant 0 : index
    %c0_17 = arith.constant 0 : index
    %c0_18 = arith.constant 0 : index
    %13 = vector.load %arg5[%c0_15, %c0_16, %c0_17, %c0_18] : memref<1x2x32x32xf32, #tpu.memory_space<vmem>>, vector<1x2x32x32xf32>
    %14 = vector.shape_cast %13 : vector<1x2x32x32xf32> to vector<2x32x32xf32>
    %c0_19 = arith.constant 0 : index
    %c0_20 = arith.constant 0 : index
    %c0_21 = arith.constant 0 : index
    %c0_22 = arith.constant 0 : index
    %15 = vector.load %arg6[%c0_19, %c0_20, %c0_21, %c0_22] : memref<1x2x32x32xf32, #tpu.memory_space<vmem>>, vector<1x2x32x32xf32>
    %16 = vector.shape_cast %15 : vector<1x2x32x32xf32> to vector<2x32x32xf32>
    %c0_23 = arith.constant 0 : index
    %c0_24 = arith.constant 0 : index
    %c0_25 = arith.constant 0 : index
    %17 = vector.load %arg3[%c0_23, %c0_24, %c0_25] : memref<2x32x32xf32, #tpu.memory_space<vmem>>, vector<1x32x32xf32>
    %18 = vector.shape_cast %17 : vector<1x32x32xf32> to vector<32x32xf32>
    %c0_26 = arith.constant 0 : index
    %c0_27 = arith.constant 0 : index
    %c0_28 = arith.constant 0 : index
    %19 = vector.load %arg4[%c0_26, %c0_27, %c0_28] : memref<2x32x32xf32, #tpu.memory_space<vmem>>, vector<1x32x32xf32>
    %20 = vector.shape_cast %19 : vector<1x32x32xf32> to vector<32x32xf32>
    %21 = vector.extract_strided_slice %6 {offsets = [0, 0], sizes = [1, 32], strides = [1, 1]} : vector<4x32xf32> to vector<1x32xf32>
    %22 = vector.extract_strided_slice %8 {offsets = [0, 0], sizes = [1, 32], strides = [1, 1]} : vector<4x32xf32> to vector<1x32xf32>
    %23 = vector.extract_strided_slice %10 {offsets = [0, 0], sizes = [1, 32], strides = [1, 1]} : vector<4x32xf32> to vector<1x32xf32>
    %24 = vector.extract_strided_slice %12 {offsets = [0, 0], sizes = [1, 32], strides = [1, 1]} : vector<4x32xf32> to vector<1x32xf32>
    %cst = arith.constant dense<0.000000e+00> : vector<128x32xf32>
    %25 = tpu.matmul %4, %18, %cst {dimension_numbers = #tpu.dot_dimension_numbers<[1], [1], [0], [0], [0, 0, 1, 0], [], []>} : vector<128x32xf32>, vector<32x32xf32>, vector<128x32xf32> -> vector<128x32xf32>
    %cst_29 = arith.constant dense<0.000000e+00> : vector<128x32xf32>
    %26 = tpu.matmul %4, %20, %cst_29 {dimension_numbers = #tpu.dot_dimension_numbers<[1], [1], [0], [0], [0, 0, 1, 0], [], []>} : vector<128x32xf32>, vector<32x32xf32>, vector<128x32xf32> -> vector<128x32xf32>
    %27 = vector.shape_cast %25 : vector<128x32xf32> to vector<4x32x32xf32>
    %cst_30 = arith.constant dense<0.000000e+00> : vector<4x32xf32>
    %28 = vector.multi_reduction <add>, %27, %cst_30 [1] : vector<4x32x32xf32> to vector<4x32xf32>
    %29 = vector.shape_cast %28 : vector<4x32xf32> to vector<4x1x32xf32>
    %cst_31 = arith.constant 3.200000e+01 : f32
    %30 = vector.broadcast %cst_31 : f32 to vector<4x1x32xf32>
    %31 = arith.divf %29, %30 : vector<4x1x32xf32>
    %32 = arith.mulf %27, %27 : vector<4x32x32xf32>
    %cst_32 = arith.constant dense<0.000000e+00> : vector<4x32xf32>
    %33 = vector.multi_reduction <add>, %32, %cst_32 [1] : vector<4x32x32xf32> to vector<4x32xf32>
    %34 = vector.shape_cast %33 : vector<4x32xf32> to vector<4x1x32xf32>
    %cst_33 = arith.constant 3.200000e+01 : f32
    %35 = vector.broadcast %cst_33 : f32 to vector<4x1x32xf32>
    %36 = arith.divf %34, %35 : vector<4x1x32xf32>
    %37 = arith.mulf %31, %31 : vector<4x1x32xf32>
    %38 = arith.subf %36, %37 : vector<4x1x32xf32>
    %cst_34 = arith.constant 9.99999974E-6 : f32
    %39 = vector.broadcast %cst_34 : f32 to vector<4x1x32xf32>
    %40 = arith.addf %38, %39 : vector<4x1x32xf32>
    %41 = math.rsqrt %40 : vector<4x1x32xf32>
    %42 = vector.shape_cast %21 : vector<1x32xf32> to vector<1x1x32xf32>
    %43 = vector.broadcast %42 : vector<1x1x32xf32> to vector<4x1x32xf32>
    %44 = arith.mulf %43, %41 : vector<4x1x32xf32>
    %45 = arith.mulf %31, %44 : vector<4x1x32xf32>
    %46 = vector.shape_cast %23 : vector<1x32xf32> to vector<1x1x32xf32>
    %47 = vector.broadcast %46 : vector<1x1x32xf32> to vector<4x1x32xf32>
    %48 = arith.subf %47, %45 : vector<4x1x32xf32>
    %49 = vector.broadcast %44 : vector<4x1x32xf32> to vector<4x32x32xf32>
    %50 = arith.mulf %27, %49 : vector<4x32x32xf32>
    %51 = vector.broadcast %48 : vector<4x1x32xf32> to vector<4x32x32xf32>
    %52 = arith.addf %50, %51 : vector<4x32x32xf32>
    %53 = vector.shape_cast %52 : vector<4x32x32xf32> to vector<128x32xf32>
    %54 = vector.shape_cast %26 : vector<128x32xf32> to vector<4x32x32xf32>
    %cst_35 = arith.constant dense<0.000000e+00> : vector<4x32xf32>
    %55 = vector.multi_reduction <add>, %54, %cst_35 [1] : vector<4x32x32xf32> to vector<4x32xf32>
    %56 = vector.shape_cast %55 : vector<4x32xf32> to vector<4x1x32xf32>
    %cst_36 = arith.constant 3.200000e+01 : f32
    %57 = vector.broadcast %cst_36 : f32 to vector<4x1x32xf32>
    %58 = arith.divf %56, %57 : vector<4x1x32xf32>
    %59 = arith.mulf %54, %54 : vector<4x32x32xf32>
    %cst_37 = arith.constant dense<0.000000e+00> : vector<4x32xf32>
    %60 = vector.multi_reduction <add>, %59, %cst_37 [1] : vector<4x32x32xf32> to vector<4x32xf32>
    %61 = vector.shape_cast %60 : vector<4x32xf32> to vector<4x1x32xf32>
    %cst_38 = arith.constant 3.200000e+01 : f32
    %62 = vector.broadcast %cst_38 : f32 to vector<4x1x32xf32>
    %63 = arith.divf %61, %62 : vector<4x1x32xf32>
    %64 = arith.mulf %58, %58 : vector<4x1x32xf32>
    %65 = arith.subf %63, %64 : vector<4x1x32xf32>
    %cst_39 = arith.constant 9.99999974E-6 : f32
    %66 = vector.broadcast %cst_39 : f32 to vector<4x1x32xf32>
    %67 = arith.addf %65, %66 : vector<4x1x32xf32>
    %68 = math.rsqrt %67 : vector<4x1x32xf32>
    %69 = vector.shape_cast %22 : vector<1x32xf32> to vector<1x1x32xf32>
    %70 = vector.broadcast %69 : vector<1x1x32xf32> to vector<4x1x32xf32>
    %71 = arith.mulf %70, %68 : vector<4x1x32xf32>
    %72 = arith.mulf %58, %71 : vector<4x1x32xf32>
    %73 = vector.shape_cast %24 : vector<1x32xf32> to vector<1x1x32xf32>
    %74 = vector.broadcast %73 : vector<1x1x32xf32> to vector<4x1x32xf32>
    %75 = arith.subf %74, %72 : vector<4x1x32xf32>
    %76 = vector.broadcast %71 : vector<4x1x32xf32> to vector<4x32x32xf32>
    %77 = arith.mulf %54, %76 : vector<4x32x32xf32>
    %78 = vector.broadcast %75 : vector<4x1x32xf32> to vector<4x32x32xf32>
    %79 = arith.addf %77, %78 : vector<4x32x32xf32>
    %80 = vector.shape_cast %79 : vector<4x32x32xf32> to vector<128x32xf32>
    %81 = arith.negf %80 : vector<128x32xf32>
    %82 = math.exp %81 : vector<128x32xf32>
    %cst_40 = arith.constant 1.000000e+00 : f32
    %83 = vector.broadcast %cst_40 : f32 to vector<128x32xf32>
    %84 = arith.addf %83, %82 : vector<128x32xf32>
    %85 = arith.divf %83, %84 : vector<128x32xf32>
    %86 = arith.mulf %53, %85 : vector<128x32xf32>
    %c1 = arith.constant 1 : index
    %c0_41 = arith.constant 0 : index
    %c0_42 = arith.constant 0 : index
    %87 = vector.load %arg3[%c1, %c0_41, %c0_42] : memref<2x32x32xf32, #tpu.memory_space<vmem>>, vector<1x32x32xf32>
    %88 = vector.shape_cast %87 : vector<1x32x32xf32> to vector<32x32xf32>
    %c1_43 = arith.constant 1 : index
    %c0_44 = arith.constant 0 : index
    %c0_45 = arith.constant 0 : index
    %89 = vector.load %arg4[%c1_43, %c0_44, %c0_45] : memref<2x32x32xf32, #tpu.memory_space<vmem>>, vector<1x32x32xf32>
    %90 = vector.shape_cast %89 : vector<1x32x32xf32> to vector<32x32xf32>
    %91 = vector.extract_strided_slice %6 {offsets = [1, 0], sizes = [1, 32], strides = [1, 1]} : vector<4x32xf32> to vector<1x32xf32>
    %92 = vector.extract_strided_slice %8 {offsets = [1, 0], sizes = [1, 32], strides = [1, 1]} : vector<4x32xf32> to vector<1x32xf32>
    %93 = vector.extract_strided_slice %10 {offsets = [1, 0], sizes = [1, 32], strides = [1, 1]} : vector<4x32xf32> to vector<1x32xf32>
    %94 = vector.extract_strided_slice %12 {offsets = [1, 0], sizes = [1, 32], strides = [1, 1]} : vector<4x32xf32> to vector<1x32xf32>
    %cst_46 = arith.constant dense<0.000000e+00> : vector<128x32xf32>
    %95 = tpu.matmul %86, %88, %cst_46 {dimension_numbers = #tpu.dot_dimension_numbers<[1], [1], [0], [0], [0, 0, 1, 0], [], []>} : vector<128x32xf32>, vector<32x32xf32>, vector<128x32xf32> -> vector<128x32xf32>
    %cst_47 = arith.constant dense<0.000000e+00> : vector<128x32xf32>
    %96 = tpu.matmul %86, %90, %cst_47 {dimension_numbers = #tpu.dot_dimension_numbers<[1], [1], [0], [0], [0, 0, 1, 0], [], []>} : vector<128x32xf32>, vector<32x32xf32>, vector<128x32xf32> -> vector<128x32xf32>
    %97 = vector.shape_cast %95 : vector<128x32xf32> to vector<4x32x32xf32>
    %cst_48 = arith.constant dense<0.000000e+00> : vector<4x32xf32>
    %98 = vector.multi_reduction <add>, %97, %cst_48 [1] : vector<4x32x32xf32> to vector<4x32xf32>
    %99 = vector.shape_cast %98 : vector<4x32xf32> to vector<4x1x32xf32>
    %cst_49 = arith.constant 3.200000e+01 : f32
    %100 = vector.broadcast %cst_49 : f32 to vector<4x1x32xf32>
    %101 = arith.divf %99, %100 : vector<4x1x32xf32>
    %102 = arith.mulf %97, %97 : vector<4x32x32xf32>
    %cst_50 = arith.constant dense<0.000000e+00> : vector<4x32xf32>
    %103 = vector.multi_reduction <add>, %102, %cst_50 [1] : vector<4x32x32xf32> to vector<4x32xf32>
    %104 = vector.shape_cast %103 : vector<4x32xf32> to vector<4x1x32xf32>
    %cst_51 = arith.constant 3.200000e+01 : f32
    %105 = vector.broadcast %cst_51 : f32 to vector<4x1x32xf32>
    %106 = arith.divf %104, %105 : vector<4x1x32xf32>
    %107 = arith.mulf %101, %101 : vector<4x1x32xf32>
    %108 = arith.subf %106, %107 : vector<4x1x32xf32>
    %cst_52 = arith.constant 9.99999974E-6 : f32
    %109 = vector.broadcast %cst_52 : f32 to vector<4x1x32xf32>
    %110 = arith.addf %108, %109 : vector<4x1x32xf32>
    %111 = math.rsqrt %110 : vector<4x1x32xf32>
    %112 = vector.shape_cast %91 : vector<1x32xf32> to vector<1x1x32xf32>
    %113 = vector.broadcast %112 : vector<1x1x32xf32> to vector<4x1x32xf32>
    %114 = arith.mulf %113, %111 : vector<4x1x32xf32>
    %115 = arith.mulf %101, %114 : vector<4x1x32xf32>
    %116 = vector.shape_cast %93 : vector<1x32xf32> to vector<1x1x32xf32>
    %117 = vector.broadcast %116 : vector<1x1x32xf32> to vector<4x1x32xf32>
    %118 = arith.subf %117, %115 : vector<4x1x32xf32>
    %119 = vector.broadcast %114 : vector<4x1x32xf32> to vector<4x32x32xf32>
    %120 = arith.mulf %97, %119 : vector<4x32x32xf32>
    %121 = vector.broadcast %118 : vector<4x1x32xf32> to vector<4x32x32xf32>
    %122 = arith.addf %120, %121 : vector<4x32x32xf32>
    %123 = vector.shape_cast %122 : vector<4x32x32xf32> to vector<128x32xf32>
    %124 = vector.shape_cast %96 : vector<128x32xf32> to vector<4x32x32xf32>
    %cst_53 = arith.constant dense<0.000000e+00> : vector<4x32xf32>
    %125 = vector.multi_reduction <add>, %124, %cst_53 [1] : vector<4x32x32xf32> to vector<4x32xf32>
    %126 = vector.shape_cast %125 : vector<4x32xf32> to vector<4x1x32xf32>
    %cst_54 = arith.constant 3.200000e+01 : f32
    %127 = vector.broadcast %cst_54 : f32 to vector<4x1x32xf32>
    %128 = arith.divf %126, %127 : vector<4x1x32xf32>
    %129 = arith.mulf %124, %124 : vector<4x32x32xf32>
    %cst_55 = arith.constant dense<0.000000e+00> : vector<4x32xf32>
    %130 = vector.multi_reduction <add>, %129, %cst_55 [1] : vector<4x32x32xf32> to vector<4x32xf32>
    %131 = vector.shape_cast %130 : vector<4x32xf32> to vector<4x1x32xf32>
    %cst_56 = arith.constant 3.200000e+01 : f32
    %132 = vector.broadcast %cst_56 : f32 to vector<4x1x32xf32>
    %133 = arith.divf %131, %132 : vector<4x1x32xf32>
    %134 = arith.mulf %128, %128 : vector<4x1x32xf32>
    %135 = arith.subf %133, %134 : vector<4x1x32xf32>
    %cst_57 = arith.constant 9.99999974E-6 : f32
    %136 = vector.broadcast %cst_57 : f32 to vector<4x1x32xf32>
    %137 = arith.addf %135, %136 : vector<4x1x32xf32>
    %138 = math.rsqrt %137 : vector<4x1x32xf32>
    %139 = vector.shape_cast %92 : vector<1x32xf32> to vector<1x1x32xf32>
    %140 = vector.broadcast %139 : vector<1x1x32xf32> to vector<4x1x32xf32>
    %141 = arith.mulf %140, %138 : vector<4x1x32xf32>
    %142 = arith.mulf %128, %141 : vector<4x1x32xf32>
    %143 = vector.shape_cast %94 : vector<1x32xf32> to vector<1x1x32xf32>
    %144 = vector.broadcast %143 : vector<1x1x32xf32> to vector<4x1x32xf32>
    %145 = arith.subf %144, %142 : vector<4x1x32xf32>
    %146 = vector.broadcast %141 : vector<4x1x32xf32> to vector<4x32x32xf32>
    %147 = arith.mulf %124, %146 : vector<4x32x32xf32>
    %148 = vector.broadcast %145 : vector<4x1x32xf32> to vector<4x32x32xf32>
    %149 = arith.addf %147, %148 : vector<4x32x32xf32>
    %150 = vector.shape_cast %149 : vector<4x32x32xf32> to vector<128x32xf32>
    %151 = arith.negf %150 : vector<128x32xf32>
    %152 = math.exp %151 : vector<128x32xf32>
    %cst_58 = arith.constant 1.000000e+00 : f32
    %153 = vector.broadcast %cst_58 : f32 to vector<128x32xf32>
    %154 = arith.addf %153, %152 : vector<128x32xf32>
    %155 = arith.divf %153, %154 : vector<128x32xf32>
    %156 = arith.mulf %123, %155 : vector<128x32xf32>
    %157 = arith.addf %86, %156 : vector<128x32xf32>
    %cst_59 = arith.constant 0.707106769 : f32
    %158 = vector.broadcast %cst_59 : f32 to vector<128x32xf32>
    %159 = arith.mulf %157, %158 : vector<128x32xf32>
    %160 = vector.extract_strided_slice %14 {offsets = [0, 0, 0], sizes = [1, 32, 32], strides = [1, 1, 1]} : vector<2x32x32xf32> to vector<1x32x32xf32>
    %161 = vector.shape_cast %160 : vector<1x32x32xf32> to vector<32x32xf32>
    %162 = vector.extract_strided_slice %16 {offsets = [0, 0, 0], sizes = [1, 32, 32], strides = [1, 1, 1]} : vector<2x32x32xf32> to vector<1x32x32xf32>
    %163 = vector.shape_cast %162 : vector<1x32x32xf32> to vector<32x32xf32>
    %164 = vector.extract_strided_slice %6 {offsets = [2, 0], sizes = [1, 32], strides = [1, 1]} : vector<4x32xf32> to vector<1x32xf32>
    %165 = vector.extract_strided_slice %8 {offsets = [2, 0], sizes = [1, 32], strides = [1, 1]} : vector<4x32xf32> to vector<1x32xf32>
    %166 = vector.extract_strided_slice %10 {offsets = [2, 0], sizes = [1, 32], strides = [1, 1]} : vector<4x32xf32> to vector<1x32xf32>
    %167 = vector.extract_strided_slice %12 {offsets = [2, 0], sizes = [1, 32], strides = [1, 1]} : vector<4x32xf32> to vector<1x32xf32>
    %cst_60 = arith.constant dense<0.000000e+00> : vector<128x32xf32>
    %168 = tpu.matmul %159, %161, %cst_60 {dimension_numbers = #tpu.dot_dimension_numbers<[1], [1], [0], [0], [0, 0, 1, 0], [], []>} : vector<128x32xf32>, vector<32x32xf32>, vector<128x32xf32> -> vector<128x32xf32>
    %cst_61 = arith.constant dense<0.000000e+00> : vector<128x32xf32>
    %169 = tpu.matmul %159, %163, %cst_61 {dimension_numbers = #tpu.dot_dimension_numbers<[1], [1], [0], [0], [0, 0, 1, 0], [], []>} : vector<128x32xf32>, vector<32x32xf32>, vector<128x32xf32> -> vector<128x32xf32>
    %170 = vector.shape_cast %168 : vector<128x32xf32> to vector<4x32x32xf32>
    %cst_62 = arith.constant dense<0.000000e+00> : vector<4x32xf32>
    %171 = vector.multi_reduction <add>, %170, %cst_62 [1] : vector<4x32x32xf32> to vector<4x32xf32>
    %172 = vector.shape_cast %171 : vector<4x32xf32> to vector<4x1x32xf32>
    %cst_63 = arith.constant 3.200000e+01 : f32
    %173 = vector.broadcast %cst_63 : f32 to vector<4x1x32xf32>
    %174 = arith.divf %172, %173 : vector<4x1x32xf32>
    %175 = arith.mulf %170, %170 : vector<4x32x32xf32>
    %cst_64 = arith.constant dense<0.000000e+00> : vector<4x32xf32>
    %176 = vector.multi_reduction <add>, %175, %cst_64 [1] : vector<4x32x32xf32> to vector<4x32xf32>
    %177 = vector.shape_cast %176 : vector<4x32xf32> to vector<4x1x32xf32>
    %cst_65 = arith.constant 3.200000e+01 : f32
    %178 = vector.broadcast %cst_65 : f32 to vector<4x1x32xf32>
    %179 = arith.divf %177, %178 : vector<4x1x32xf32>
    %180 = arith.mulf %174, %174 : vector<4x1x32xf32>
    %181 = arith.subf %179, %180 : vector<4x1x32xf32>
    %cst_66 = arith.constant 9.99999974E-6 : f32
    %182 = vector.broadcast %cst_66 : f32 to vector<4x1x32xf32>
    %183 = arith.addf %181, %182 : vector<4x1x32xf32>
    %184 = math.rsqrt %183 : vector<4x1x32xf32>
    %185 = vector.shape_cast %164 : vector<1x32xf32> to vector<1x1x32xf32>
    %186 = vector.broadcast %185 : vector<1x1x32xf32> to vector<4x1x32xf32>
    %187 = arith.mulf %186, %184 : vector<4x1x32xf32>
    %188 = arith.mulf %174, %187 : vector<4x1x32xf32>
    %189 = vector.shape_cast %166 : vector<1x32xf32> to vector<1x1x32xf32>
    %190 = vector.broadcast %189 : vector<1x1x32xf32> to vector<4x1x32xf32>
    %191 = arith.subf %190, %188 : vector<4x1x32xf32>
    %192 = vector.broadcast %187 : vector<4x1x32xf32> to vector<4x32x32xf32>
    %193 = arith.mulf %170, %192 : vector<4x32x32xf32>
    %194 = vector.broadcast %191 : vector<4x1x32xf32> to vector<4x32x32xf32>
    %195 = arith.addf %193, %194 : vector<4x32x32xf32>
    %196 = vector.shape_cast %195 : vector<4x32x32xf32> to vector<128x32xf32>
    %197 = vector.shape_cast %169 : vector<128x32xf32> to vector<4x32x32xf32>
    %cst_67 = arith.constant dense<0.000000e+00> : vector<4x32xf32>
    %198 = vector.multi_reduction <add>, %197, %cst_67 [1] : vector<4x32x32xf32> to vector<4x32xf32>
    %199 = vector.shape_cast %198 : vector<4x32xf32> to vector<4x1x32xf32>
    %cst_68 = arith.constant 3.200000e+01 : f32
    %200 = vector.broadcast %cst_68 : f32 to vector<4x1x32xf32>
    %201 = arith.divf %199, %200 : vector<4x1x32xf32>
    %202 = arith.mulf %197, %197 : vector<4x32x32xf32>
    %cst_69 = arith.constant dense<0.000000e+00> : vector<4x32xf32>
    %203 = vector.multi_reduction <add>, %202, %cst_69 [1] : vector<4x32x32xf32> to vector<4x32xf32>
    %204 = vector.shape_cast %203 : vector<4x32xf32> to vector<4x1x32xf32>
    %cst_70 = arith.constant 3.200000e+01 : f32
    %205 = vector.broadcast %cst_70 : f32 to vector<4x1x32xf32>
    %206 = arith.divf %204, %205 : vector<4x1x32xf32>
    %207 = arith.mulf %201, %201 : vector<4x1x32xf32>
    %208 = arith.subf %206, %207 : vector<4x1x32xf32>
    %cst_71 = arith.constant 9.99999974E-6 : f32
    %209 = vector.broadcast %cst_71 : f32 to vector<4x1x32xf32>
    %210 = arith.addf %208, %209 : vector<4x1x32xf32>
    %211 = math.rsqrt %210 : vector<4x1x32xf32>
    %212 = vector.shape_cast %165 : vector<1x32xf32> to vector<1x1x32xf32>
    %213 = vector.broadcast %212 : vector<1x1x32xf32> to vector<4x1x32xf32>
    %214 = arith.mulf %213, %211 : vector<4x1x32xf32>
    %215 = arith.mulf %201, %214 : vector<4x1x32xf32>
    %216 = vector.shape_cast %167 : vector<1x32xf32> to vector<1x1x32xf32>
    %217 = vector.broadcast %216 : vector<1x1x32xf32> to vector<4x1x32xf32>
    %218 = arith.subf %217, %215 : vector<4x1x32xf32>
    %219 = vector.broadcast %214 : vector<4x1x32xf32> to vector<4x32x32xf32>
    %220 = arith.mulf %197, %219 : vector<4x32x32xf32>
    %221 = vector.broadcast %218 : vector<4x1x32xf32> to vector<4x32x32xf32>
    %222 = arith.addf %220, %221 : vector<4x32x32xf32>
    %223 = vector.shape_cast %222 : vector<4x32x32xf32> to vector<128x32xf32>
    %224 = arith.negf %223 : vector<128x32xf32>
    %225 = math.exp %224 : vector<128x32xf32>
    %cst_72 = arith.constant 1.000000e+00 : f32
    %226 = vector.broadcast %cst_72 : f32 to vector<128x32xf32>
    %227 = arith.addf %226, %225 : vector<128x32xf32>
    %228 = arith.divf %226, %227 : vector<128x32xf32>
    %229 = arith.mulf %196, %228 : vector<128x32xf32>
    %230 = arith.addf %159, %229 : vector<128x32xf32>
    %cst_73 = arith.constant 0.707106769 : f32
    %231 = vector.broadcast %cst_73 : f32 to vector<128x32xf32>
    %232 = arith.mulf %230, %231 : vector<128x32xf32>
    %233 = vector.extract_strided_slice %14 {offsets = [1, 0, 0], sizes = [1, 32, 32], strides = [1, 1, 1]} : vector<2x32x32xf32> to vector<1x32x32xf32>
    %234 = vector.shape_cast %233 : vector<1x32x32xf32> to vector<32x32xf32>
    %235 = vector.extract_strided_slice %16 {offsets = [1, 0, 0], sizes = [1, 32, 32], strides = [1, 1, 1]} : vector<2x32x32xf32> to vector<1x32x32xf32>
    %236 = vector.shape_cast %235 : vector<1x32x32xf32> to vector<32x32xf32>
    %237 = vector.extract_strided_slice %6 {offsets = [3, 0], sizes = [1, 32], strides = [1, 1]} : vector<4x32xf32> to vector<1x32xf32>
    %238 = vector.extract_strided_slice %8 {offsets = [3, 0], sizes = [1, 32], strides = [1, 1]} : vector<4x32xf32> to vector<1x32xf32>
    %239 = vector.extract_strided_slice %10 {offsets = [3, 0], sizes = [1, 32], strides = [1, 1]} : vector<4x32xf32> to vector<1x32xf32>
    %240 = vector.extract_strided_slice %12 {offsets = [3, 0], sizes = [1, 32], strides = [1, 1]} : vector<4x32xf32> to vector<1x32xf32>
    %cst_74 = arith.constant dense<0.000000e+00> : vector<128x32xf32>
    %241 = tpu.matmul %232, %234, %cst_74 {dimension_numbers = #tpu.dot_dimension_numbers<[1], [1], [0], [0], [0, 0, 1, 0], [], []>} : vector<128x32xf32>, vector<32x32xf32>, vector<128x32xf32> -> vector<128x32xf32>
    %cst_75 = arith.constant dense<0.000000e+00> : vector<128x32xf32>
    %242 = tpu.matmul %232, %236, %cst_75 {dimension_numbers = #tpu.dot_dimension_numbers<[1], [1], [0], [0], [0, 0, 1, 0], [], []>} : vector<128x32xf32>, vector<32x32xf32>, vector<128x32xf32> -> vector<128x32xf32>
    %243 = vector.shape_cast %241 : vector<128x32xf32> to vector<4x32x32xf32>
    %cst_76 = arith.constant dense<0.000000e+00> : vector<4x32xf32>
    %244 = vector.multi_reduction <add>, %243, %cst_76 [1] : vector<4x32x32xf32> to vector<4x32xf32>
    %245 = vector.shape_cast %244 : vector<4x32xf32> to vector<4x1x32xf32>
    %cst_77 = arith.constant 3.200000e+01 : f32
    %246 = vector.broadcast %cst_77 : f32 to vector<4x1x32xf32>
    %247 = arith.divf %245, %246 : vector<4x1x32xf32>
    %248 = arith.mulf %243, %243 : vector<4x32x32xf32>
    %cst_78 = arith.constant dense<0.000000e+00> : vector<4x32xf32>
    %249 = vector.multi_reduction <add>, %248, %cst_78 [1] : vector<4x32x32xf32> to vector<4x32xf32>
    %250 = vector.shape_cast %249 : vector<4x32xf32> to vector<4x1x32xf32>
    %cst_79 = arith.constant 3.200000e+01 : f32
    %251 = vector.broadcast %cst_79 : f32 to vector<4x1x32xf32>
    %252 = arith.divf %250, %251 : vector<4x1x32xf32>
    %253 = arith.mulf %247, %247 : vector<4x1x32xf32>
    %254 = arith.subf %252, %253 : vector<4x1x32xf32>
    %cst_80 = arith.constant 9.99999974E-6 : f32
    %255 = vector.broadcast %cst_80 : f32 to vector<4x1x32xf32>
    %256 = arith.addf %254, %255 : vector<4x1x32xf32>
    %257 = math.rsqrt %256 : vector<4x1x32xf32>
    %258 = vector.shape_cast %237 : vector<1x32xf32> to vector<1x1x32xf32>
    %259 = vector.broadcast %258 : vector<1x1x32xf32> to vector<4x1x32xf32>
    %260 = arith.mulf %259, %257 : vector<4x1x32xf32>
    %261 = arith.mulf %247, %260 : vector<4x1x32xf32>
    %262 = vector.shape_cast %239 : vector<1x32xf32> to vector<1x1x32xf32>
    %263 = vector.broadcast %262 : vector<1x1x32xf32> to vector<4x1x32xf32>
    %264 = arith.subf %263, %261 : vector<4x1x32xf32>
    %265 = vector.broadcast %260 : vector<4x1x32xf32> to vector<4x32x32xf32>
    %266 = arith.mulf %243, %265 : vector<4x32x32xf32>
    %267 = vector.broadcast %264 : vector<4x1x32xf32> to vector<4x32x32xf32>
    %268 = arith.addf %266, %267 : vector<4x32x32xf32>
    %269 = vector.shape_cast %268 : vector<4x32x32xf32> to vector<128x32xf32>
    %270 = vector.shape_cast %242 : vector<128x32xf32> to vector<4x32x32xf32>
    %cst_81 = arith.constant dense<0.000000e+00> : vector<4x32xf32>
    %271 = vector.multi_reduction <add>, %270, %cst_81 [1] : vector<4x32x32xf32> to vector<4x32xf32>
    %272 = vector.shape_cast %271 : vector<4x32xf32> to vector<4x1x32xf32>
    %cst_82 = arith.constant 3.200000e+01 : f32
    %273 = vector.broadcast %cst_82 : f32 to vector<4x1x32xf32>
    %274 = arith.divf %272, %273 : vector<4x1x32xf32>
    %275 = arith.mulf %270, %270 : vector<4x32x32xf32>
    %cst_83 = arith.constant dense<0.000000e+00> : vector<4x32xf32>
    %276 = vector.multi_reduction <add>, %275, %cst_83 [1] : vector<4x32x32xf32> to vector<4x32xf32>
    %277 = vector.shape_cast %276 : vector<4x32xf32> to vector<4x1x32xf32>
    %cst_84 = arith.constant 3.200000e+01 : f32
    %278 = vector.broadcast %cst_84 : f32 to vector<4x1x32xf32>
    %279 = arith.divf %277, %278 : vector<4x1x32xf32>
    %280 = arith.mulf %274, %274 : vector<4x1x32xf32>
    %281 = arith.subf %279, %280 : vector<4x1x32xf32>
    %cst_85 = arith.constant 9.99999974E-6 : f32
    %282 = vector.broadcast %cst_85 : f32 to vector<4x1x32xf32>
    %283 = arith.addf %281, %282 : vector<4x1x32xf32>
    %284 = math.rsqrt %283 : vector<4x1x32xf32>
    %285 = vector.shape_cast %238 : vector<1x32xf32> to vector<1x1x32xf32>
    %286 = vector.broadcast %285 : vector<1x1x32xf32> to vector<4x1x32xf32>
    %287 = arith.mulf %286, %284 : vector<4x1x32xf32>
    %288 = arith.mulf %274, %287 : vector<4x1x32xf32>
    %289 = vector.shape_cast %240 : vector<1x32xf32> to vector<1x1x32xf32>
    %290 = vector.broadcast %289 : vector<1x1x32xf32> to vector<4x1x32xf32>
    %291 = arith.subf %290, %288 : vector<4x1x32xf32>
    %292 = vector.broadcast %287 : vector<4x1x32xf32> to vector<4x32x32xf32>
    %293 = arith.mulf %270, %292 : vector<4x32x32xf32>
    %294 = vector.broadcast %291 : vector<4x1x32xf32> to vector<4x32x32xf32>
    %295 = arith.addf %293, %294 : vector<4x32x32xf32>
    %296 = vector.shape_cast %295 : vector<4x32x32xf32> to vector<128x32xf32>
    %297 = arith.negf %296 : vector<128x32xf32>
    %298 = math.exp %297 : vector<128x32xf32>
    %cst_86 = arith.constant 1.000000e+00 : f32
    %299 = vector.broadcast %cst_86 : f32 to vector<128x32xf32>
    %300 = arith.addf %299, %298 : vector<128x32xf32>
    %301 = arith.divf %299, %300 : vector<128x32xf32>
    %302 = arith.mulf %269, %301 : vector<128x32xf32>
    %303 = arith.addf %232, %302 : vector<128x32xf32>
    %cst_87 = arith.constant 0.707106769 : f32
    %304 = vector.broadcast %cst_87 : f32 to vector<128x32xf32>
    %305 = arith.mulf %303, %304 : vector<128x32xf32>
    %c0_88 = arith.constant 0 : index
    %c0_89 = arith.constant 0 : index
    %306 = vector.load %arg13[%c0_88, %c0_89] : memref<128x32xf32, #tpu.memory_space<vmem>>, vector<128x32xf32>
    %307 = arith.addf %306, %305 : vector<128x32xf32>
    %c0_90 = arith.constant 0 : index
    %c0_91 = arith.constant 0 : index
    %308 = vector.load %arg13[%c0_90, %c0_91] : memref<128x32xf32, #tpu.memory_space<vmem>>, vector<128x32xf32>
    tpu.vector_store %arg13[%c0_90, %c0_91], %307 {strides = array<i32>} : memref<128x32xf32, #tpu.memory_space<vmem>>, vector<128x32xf32>,
    %c2_i32 = arith.constant 2 : i32
    %309 = arith.cmpi eq, %arg1, %c2_i32 : i32
    %310 = arith.extui %309 : i1 to i32
    %c0_i32_92 = arith.constant 0 : i32
    %311 = arith.cmpi ne, %310, %c0_i32_92 : i32
    scf.if %311 {
      %c0_93 = arith.constant 0 : index
      %c0_94 = arith.constant 0 : index
      %312 = vector.load %arg13[%c0_93, %c0_94] : memref<128x32xf32, #tpu.memory_space<vmem>>, vector<128x32xf32>
      %c0_95 = arith.constant 0 : index
      %c0_96 = arith.constant 0 : index
      %313 = vector.load %arg11[%c0_95, %c0_96] : memref<24x32xf32, #tpu.memory_space<vmem>>, vector<24x32xf32>
      %cst_97 = arith.constant dense<0.000000e+00> : vector<128x24xf32>
      %314 = tpu.matmul %312, %313, %cst_97 {dimension_numbers = #tpu.dot_dimension_numbers<[1], [1], [0], [0], [0, 0, 1, 0], [], []>} : vector<128x32xf32>, vector<24x32xf32>, vector<128x24xf32> -> vector<128x24xf32>
      %c0_98 = arith.constant 0 : index
      %c0_99 = arith.constant 0 : index
      %315 = vector.load %arg12[%c0_98, %c0_99] : memref<128x24xf32, #tpu.memory_space<vmem>>, vector<128x24xf32>
      tpu.vector_store %arg12[%c0_98, %c0_99], %314 {strides = array<i32>} : memref<128x24xf32, #tpu.memory_space<vmem>>, vector<128x24xf32>,
    } else {
    }
    return
  }
  func.func @transform_0(%arg0: i32, %arg1: i32) -> (i32, i32, i32) {
    %c0_i32 = arith.constant 0 : i32
    %c0_i32_0 = arith.constant 0 : i32
    return %arg1, %arg0, %c0_i32 : i32, i32, i32
  }
  func.func @transform_1(%arg0: i32, %arg1: i32) -> (i32, i32, i32) {
    %c0_i32 = arith.constant 0 : i32
    %c0_i32_0 = arith.constant 0 : i32
    %c0_i32_1 = arith.constant 0 : i32
    %c0_i32_2 = arith.constant 0 : i32
    return %c0_i32, %c0_i32_0, %c0_i32_1 : i32, i32, i32
  }
  func.func @transform_2(%arg0: i32, %arg1: i32) -> (i32, i32, i32) {
    %c0_i32 = arith.constant 0 : i32
    %c0_i32_0 = arith.constant 0 : i32
    %c0_i32_1 = arith.constant 0 : i32
    %c0_i32_2 = arith.constant 0 : i32
    return %c0_i32, %c0_i32_0, %c0_i32_1 : i32, i32, i32
  }
  func.func @transform_3(%arg0: i32, %arg1: i32) -> (i32, i32, i32, i32) {
    %c0_i32 = arith.constant 0 : i32
    %c0_i32_0 = arith.constant 0 : i32
    %c0_i32_1 = arith.constant 0 : i32
    %c0_i32_2 = arith.constant 0 : i32
    return %arg1, %c0_i32, %c0_i32_0, %c0_i32_1 : i32, i32, i32, i32
  }
  func.func @transform_4(%arg0: i32, %arg1: i32) -> (i32, i32, i32, i32) {
    %c0_i32 = arith.constant 0 : i32
    %c0_i32_0 = arith.constant 0 : i32
    %c0_i32_1 = arith.constant 0 : i32
    %c0_i32_2 = arith.constant 0 : i32
    return %arg1, %c0_i32, %c0_i32_0, %c0_i32_1 : i32, i32, i32, i32
  }
  func.func @transform_5(%arg0: i32, %arg1: i32) -> (i32, i32, i32) {
    %c0_i32 = arith.constant 0 : i32
    %c0_i32_0 = arith.constant 0 : i32
    %c0_i32_1 = arith.constant 0 : i32
    return %arg1, %c0_i32, %c0_i32_0 : i32, i32, i32
  }
  func.func @transform_6(%arg0: i32, %arg1: i32) -> (i32, i32, i32) {
    %c0_i32 = arith.constant 0 : i32
    %c0_i32_0 = arith.constant 0 : i32
    %c0_i32_1 = arith.constant 0 : i32
    return %arg1, %c0_i32, %c0_i32_0 : i32, i32, i32
  }
  func.func @transform_7(%arg0: i32, %arg1: i32) -> (i32, i32, i32) {
    %c0_i32 = arith.constant 0 : i32
    %c0_i32_0 = arith.constant 0 : i32
    %c0_i32_1 = arith.constant 0 : i32
    return %arg1, %c0_i32, %c0_i32_0 : i32, i32, i32
  }
  func.func @transform_8(%arg0: i32, %arg1: i32) -> (i32, i32, i32) {
    %c0_i32 = arith.constant 0 : i32
    %c0_i32_0 = arith.constant 0 : i32
    %c0_i32_1 = arith.constant 0 : i32
    return %arg1, %c0_i32, %c0_i32_0 : i32, i32, i32
  }
  func.func @transform_9(%arg0: i32, %arg1: i32) -> (i32, i32) {
    %c0_i32 = arith.constant 0 : i32
    %c0_i32_0 = arith.constant 0 : i32
    %c0_i32_1 = arith.constant 0 : i32
    return %c0_i32, %c0_i32_0 : i32, i32
  }
  func.func @transform_10(%arg0: i32, %arg1: i32) -> (i32, i32) {
    %c0_i32 = arith.constant 0 : i32
    %c0_i32_0 = arith.constant 0 : i32
    return %arg0, %c0_i32 : i32, i32
  }
}

</mosaic_0001>

<bundles_post_ra>
// kernel: tpu_custom_call.1
= control target key start
LH: loop header
LB: loop body
LE: loop exit
PB: predicated region body
PF: predicated region fallthrough
CT: control target
= control target key end

     0   :  { %s8550_s0 = inlined_call_operand.vmem [shape: f32[3,128,32], index: 0, kind: input, shape index: {}]   ;;  %s8551_s1 = inlined_call_operand.vmem [shape: f32[2,32,32], index: 1, kind: input, shape index: {}]   ;;  %s8552_s2 = inlined_call_operand.hbm [shape: f32[2,32,32], index: 2, kind: input, shape index: {}]   ;;  %s8553_s3 = inlined_call_operand.vmem [shape: f32[3,2,32,32], index: 3, kind: input, shape index: {}]   ;;  %s8554_s4 = inlined_call_operand.vmem [shape: f32[3,2,32,32], index: 4, kind: input, shape index: {}]   ;;  %s8555_s5 = inlined_call_operand.vmem [shape: f32[3,4,32], index: 5, kind: input, shape index: {}]   ;;  %s8556_s6 = inlined_call_operand.hbm [shape: f32[3,4,32], index: 6, kind: input, shape index: {}]   ;;  %s8557_s7 = inlined_call_operand.hbm [shape: f32[3,4,32], index: 7, kind: input, shape index: {}]   ;;  %s8558_s8 = inlined_call_operand.hbm [shape: f32[3,4,32], index: 8, kind: input, shape index: {}]   ;;  %s8559_s9 = inlined_call_operand.vmem [shape: f32[24,32], index: 9, kind: input, shape index: {}]   ;;  %s8560_s10 = inlined_call_operand.vmem [shape: f32[128,24], index: 10, kind: output, shape index: {}]  }
   0x1   :  { %8619 = sst [smem:[#allocation35_spill]] %s8552_s2 }
   0x2   :  { %8620 = sst [smem:[#allocation36_spill]] %s8556_s6 }
   0x3   :  { %8621 = sst [smem:[#allocation37_spill]] %s8557_s7 }
   0x4   :  { %8622 = sst [smem:[#allocation38_spill]] %s8560_s10 }
   0x5   :  { %15 = vsyncpa [#allocation4], 0 }
   0x6   :  { %16 = vsyncpa [#allocation6], 0 }
   0x7   :  { %18 = vsyncpa [#allocation6 + $0x1], 0 }
   0x8   :  { %19 = vsyncpa [#allocation9], 0 }
   0x9   :  { %21 = vsyncpa [#allocation9 + $0x1], 0  ;;  %s6262_s13 = smov 0   ;;  %s6264_s14 = smov 0  }
   0xa   :  { %s6266_s15 = smov 0   ;;  %s6268_s16 = smov 0  }
   0xb   :  { %s6270_s17 = smov 0   ;;  %s6272_s18 = smov 0  }
   0xc LB: > { %8623 = sst [smem:[#allocation13_spill]] %s6194_s17  ;;  %s36_s19 = sadd.s32 1, %s6194_s17  ;;  %s6198_s18 = sphi %s6272_s18, %s27_s18   ;;  %s6194_s17 = sphi %s6270_s17, %s8746_s17   ;;  %s6190_s16 = sphi %s6268_s16, %s8745_s16   ;;  %s6186_s15 = sphi %s6266_s15, %s8749_s15   ;;  %s6182_s14 = sphi %s6264_s14, %s8748_s14   ;;  %s6178_s13 = sphi %s6262_s13, %s8747_s13  }
   0xd   : > { %s194_s20 = sadd.s32 1, %s6186_s15  ;;  %p37_p0 = scmp.ge.s32.totalorder %s36_s19, 3 }
   0xe   : > { %p201_p1 = scmp.ne.s32.totalorder %s6186_s15, %s6182_s14  ;;  %p202_p2 = scmp.eq.s32.totalorder %s6198_s18, 0 }
   0xf   : > { %s8751_s19 = smov (%p37_p0, %s36_s19), 0  ;;  %p5644_p4 = scmp.lt.s32.totalorder %s6198_s18, 3 }
  0x10   : > { %8624 = sst [smem:[#allocation14_spill]] %s8751_s19  ;;  %p203_p3 = por %p202_p2, %p201_p1 }
  0x11   : > { %s191_s21 = ssub.s32 %s6194_s17, %s8751_s19  ;;  %s385_s22 = sand.u32 1, %s6198_s18  }
  0x12   : > { %p192_p5 = scmp.eq.s32.totalorder %s191_s21, 0  ;;  %s8561_s23 = sand.u32 1, %s6186_s15  }
  0x13   : > { %s6305_s24 = sshll.u32 %s6194_s17, 6  ;;  %s6312_s26 = sshll.u32 %s8561_s23, 2 }
  0x14   : > { %s6308_s25 = scalar_select %p192_p5, %s6186_s15, %s194_s20  }
  0x15   : > { %s8626_s6 = sld [smem:[#allocation36_spill]]  ;;  %p6318_p6 = pnand %p5644_p4, %p203_p3 }
  0x16   : > { %8625 = sst [smem:[#allocation15_spill]] %s6308_s25  ;;  %s389_s11 = scalar_lea.vmem [#allocation5], %s6312_s26 }
  0x17   : > { %s396_s12 = sshll.u32 %s389_s11, 4  ;;  %s6323_s21 = scalar_lea.sflag [#allocation6], %s385_s22  ;;  %s397_s12 = int_to_ptr.vmem [resolvable:$true] %s396_s12 }
  0x18   : > { %p8565_p7 = pneg %p6318_p6  ;;  %s6043_s20 = scalar_lea.vmem %s397_s12, 64 }
  0x19   : > { %p6044_p8 = scmp.ne.s32.totalorder %s397_s12, %s6043_s20  ;;  %s6200_s27 = smov [#allocation5]  }
  0x1a   : > { %s6048_s28 = sshll.u32 %s6200_s27, 4  ;;  %s6049_s28 = int_to_ptr.vmem [resolvable:$false] %s6048_s28 }
  0x1b   : > { %s394_s29 = scalar_lea.hbm %s8626_s6, %s6305_s24  ;;  %p6046_p9 = pnand %p6044_p8, %p8565_p7 }
  0x1c   : > { %s6050_s23 = scalar_lea.vmem %s6049_s28, 128  ;;  %p6051_p11 = scmp.lt.s32.totalorder %s397_s12, %s6049_s28 }
  0x1d   : > { %p6047_p10 = pneg %p6046_p9  ;;  %p6052_p12 = scmp.lt.s32.totalorder %s6050_s23, %s6043_s20 }
  0x1f   : > { %p6053_p13 = por %p6052_p12, %p6051_p11 }
  0x21   : > { %p6054_p0 = pnand %p6053_p13, %p6047_p10 }
  0x23   : > { %6057 = shalt.err (!%p6054_p0)
}
  0x24   : > { %5636 = dma.hbm_to_vmem [thread:$0]  (!%p6318_p6), %s394_s29, 64, %s397_s12, %s6323_s21  }
  0x25   : > { %s8562_s22 = sadd.s32 4294967295, %s6198_s18   ;;  %p207_p1 = scmp.ne.s32.totalorder %s6182_s14, %s6178_s13 }
  0x26   : > { %p6338_p2 = scmp.eq.s32.totalorder %s8562_s22, 0  ;;  %p4871_p3 = scmp.ge.s32.totalorder %s6198_s18, 1 }
  0x27   : > { %p317_p4 = scmp.lt.s32.totalorder %s6198_s18, 4  ;;  %s6201_s13 = smov [#allocation3]  }
  0x28   : > { %p6346_p5 = por %p6338_p2, %p207_p1  ;;  %s332_s29 = sshll.u32 %s6201_s13, 4  ;;  %s333_s29 = int_to_ptr.vmem [resolvable:$true] %s332_s29 }
  0x29   : > { %p6350_p8 = pnand %p4871_p3, %p317_p4  ;;  %s8632_s7 = sld [smem:[#allocation37_spill]] }
  0x2a   : > { %s8629_s11 = scalar_select %p6346_p5, 1, 0 }
  0x2b   : > { %p5629_p9 = pneg %p6350_p8  ;;  %s407_s6 = scalar_lea.vmem [#allocation7], %s6312_s26 }
  0x2c   : > { %s414_s19 = sshll.u32 %s407_s6, 4  ;;  %s6069_s17 = scalar_lea.vmem %s333_s29, 1024  ;;  %s415_s19 = int_to_ptr.vmem [resolvable:$true] %s414_s19 }
  0x2d   : > { %p6358_p10 = pnand %p5629_p9, %p6338_p2  ;;  %p6070_p12 = scmp.ne.s32.totalorder %s333_s29, %s6069_s17 }
  0x2e   : > { %p6077_p1 = scmp.lt.s32.totalorder %s333_s29, %s333_s29  ;;  %p6078_p3 = scmp.lt.s32.totalorder %s6069_s17, %s6069_s17 }
  0x2f   : > { %p6060_p11 = pneg %p6358_p10 }
  0x30   : > { %p6079_p4 = por %p6078_p3, %p6077_p1 }
  0x31   : > { %p6072_p13 = pnand %p6070_p12, %p6060_p11 }
  0x33   : > { %p6073_p0 = pneg %p6072_p13 }
  0x35   : > { %p6080_p9 = pnand %p6079_p4, %p6073_p0 }
  0x37   : > { %6083 = shalt.err (!%p6080_p9)
}
  0x38   : > { %s6202_s13 = smov 128   ;;  %s6203_s27 = smov 8  }
  0x39   : > { %s8633_s2 = sld [smem:[#allocation35_spill]]  ;;  %s6097_s6 = scalar_lea.vmem %s415_s19, 64 }
  0x3a   : > { %p6098_p7 = scmp.ne.s32.totalorder %s415_s19, %s6097_s6  ;;  %p8634_p5 = pneg %p6318_p6 }
  0x3b   : > { %s6204_s25 = smov [#allocation7]  }
  0x3c   : > { %p6100_p11 = pnand %p6098_p7, %p8634_p5  ;;  %s6102_s17 = sshll.u32 %s6204_s25, 4  ;;  %s6103_s17 = int_to_ptr.vmem [resolvable:$false] %s6102_s17 }
  0x3d   : > { %s6104_s10 = scalar_lea.vmem %s6103_s17, 128  ;;  %p6105_p13 = scmp.lt.s32.totalorder %s415_s19, %s6103_s17 }
  0x3e   : > { %p6101_p12 = pneg %p6100_p11  ;;  %p6106_p0 = scmp.lt.s32.totalorder %s6104_s10, %s6097_s6 }
  0x3f   : > { %5632 = dma.hbm_to_vmem [thread:$0]  (!%p6358_p10), %s8633_s2, 1024, %s333_s29, [#allocation4], %s6202_s13, %s6202_s13, %s6203_s27  }
  0x40   : > { %p6107_p1 = por %p6106_p0, %p6105_p13 }
  0x42   : > { %p6108_p3 = pnand %p6107_p1, %p6101_p12 }
  0x44   : > { %6111 = shalt.err (!%p6108_p3)
}
  0x45   : > { %s8635_s12 = scalar_lea.hbm %s8632_s7, %s6305_s24  ;;  %s430_s10 = scalar_lea.hbm %s8558_s8, %s6305_s24 }
  0x46   : > { %5639 = dma.hbm_to_vmem [thread:$0]  (!%p6318_p6), %s8635_s12, 64, %s415_s19, %s6323_s21  }
  0x47   : > { %s425_s27 = scalar_lea.vmem [#allocation8], %s6312_s26  ;;  %s8636_s6 = sand.u32 1, %s6186_s15  }
  0x48   : > { %s432_s28 = sshll.u32 %s425_s27, 4  ;;  %s422_s17 = scalar_lea.sflag [#allocation9], %s8636_s6  ;;  %s433_s28 = int_to_ptr.vmem [resolvable:$true] %s432_s28 }
  0x49   : > { %s6125_s2 = scalar_lea.vmem %s433_s28, 64  ;;  %s6205_s22 = smov [#allocation8]  }
  0x4a   : > { %p6126_p7 = scmp.ne.s32.totalorder %s433_s28, %s6125_s2  ;;  %s6130_s29 = sshll.u32 %s6205_s22, 4  ;;  %s6131_s29 = int_to_ptr.vmem [resolvable:$false] %s6130_s29 }
  0x4b   : > { %s6132_s7 = scalar_lea.vmem %s6131_s29, 128  ;;  %p6133_p9 = scmp.lt.s32.totalorder %s433_s28, %s6131_s29 }
  0x4c   : > { %p6128_p10 = pnand %p6126_p7, %p8634_p5  ;;  %p6134_p11 = scmp.lt.s32.totalorder %s6132_s7, %s6125_s2 }
  0x4e   : > { %p6129_p4 = pneg %p6128_p10  ;;  %p6135_p12 = por %p6134_p11, %p6133_p9 }
  0x50   : > { %p6136_p13 = pnand %p6135_p12, %p6129_p4 }
  0x52   : > { %6139 = shalt.err (!%p6136_p13)
}
  0x53   : > { %5642 = dma.hbm_to_vmem [thread:$0]  (!%p6318_p6), %s430_s10, 64, %s433_s28, %s422_s17  }
  0x54   : > { %441 = sbr.rel (%p6350_p8) target bundleno = 1631 (0x65f), region = 60 }
  0x59   : > { %6165 = dma.done.wait (%p6338_p2), [#allocation4], 1024  }
  0x5a   : > { %6167 = vsyncadd (%p6338_p2), [#allocation4], 4294966272  ;;  %s8637_s19 = sadd.s32 4294967295, %s6198_s18   ;;  %s449_s7 = sand.u32 1, %s6182_s14  }
  0x5b   : > { %s447_s2 = sand.u32 1, %s8637_s19   ;;  %s4882_s24 = sshll.u32 %s449_s7, 2 }
  0x5c   : > { %s448_s26 = scalar_lea.sflag [#allocation6], %s447_s2  ;;  %s6406_s21 = scalar_lea.vmem [#allocation5], %s4882_s24 }
  0x5d   : > { %p8638_p6 = scmp.ne.s32.totalorder %s8629_s11, 0 }
  0x5f   : > { %6169 = dma.done.wait (%p8638_p6), %s448_s26, 128  }
  0x60   : > { %6171 = vsyncadd (%p8638_p6), %s448_s26, 4294967168  ;;  %s6412_s30 = scalar_lea.vmem [#allocation7], %s4882_s24  ;;  %s466_s23 = scalar_lea.sflag [#allocation9], %s449_s7 }
  0x61   : > { %s6414_s20 = scalar_lea.vmem [#allocation8], %s4882_s24 }
  0x62   : > { %6173 = dma.done.wait (%p8638_p6), %s466_s23, 64  }
  0x63   : > { %6175 = vsyncadd (%p8638_p6), %s466_s23, 4294967232  ;;  %p540_p2 = scmp.lt.s32.totalorder %s6190_s16, 2  ;;  %p4892_p8 = scmp.ne.s32.totalorder %s6190_s16, 0 }
  0x65   : > { %s541_s12 = scalar_select %p540_p2, %s6190_s16, 2 }
  0x66   : > { %572 = sbr.rel (%p4892_p8) target bundleno = 116 (0x74), region = 80 }
  0x67   : > { %s5145_s25 = sshll.u32 %s541_s12, 7  ;;  %s5146_s13 = sshll.u32 %s541_s12, 6 }
  0x68   : > { %s6425_s28 = scalar_lea.vmem %s8550_s0, %s5145_s25  ;;  %s6430_s22 = scalar_lea.vmem %s8553_s3, %s5146_s13 }
  0x69   : > { %s6435_s11 = scalar_lea.vmem %s8554_s4, %s5146_s13  ;;  %s4891_s2 = sshll.u32 %s541_s12, 2 }
  0x6a   : > { %s6440_s26 = scalar_lea.vmem %s8555_s5, %s4891_s2 }
  0x6b   : > { %vm573_vm0 = vcmask 261120   ;;  %v6206_v0 = vmov 0.0  }
  0x6c   : > { %574 = vst.msk [vmem:[#allocation2] sm:$0xff] %vm573_vm0, %v6206_v0  ;;  %575 = vst.msk [vmem:[#allocation2 + $0x8] sm:$0xff] %vm573_vm0, %v6206_v0 }
  0x6d   : > { %576 = vst.msk [vmem:[#allocation2 + $0x10] sm:$0xff] %vm573_vm0, %v6206_v0  ;;  %577 = vst.msk [vmem:[#allocation2 + $0x18] sm:$0xff] %vm573_vm0, %v6206_v0 }
  0x6e   : > { %578 = vst.msk [vmem:[#allocation2 + $0x20] sm:$0xff] %vm573_vm0, %v6206_v0  ;;  %579 = vst.msk [vmem:[#allocation2 + $0x28] sm:$0xff] %vm573_vm0, %v6206_v0 }
  0x6f   : > { %580 = vst.msk [vmem:[#allocation2 + $0x30] sm:$0xff] %vm573_vm0, %v6206_v0  ;;  %581 = vst.msk [vmem:[#allocation2 + $0x38] sm:$0xff] %vm573_vm0, %v6206_v0 }
  0x70   : > { %582 = vst.msk [vmem:[#allocation2 + $0x40] sm:$0xff] %vm573_vm0, %v6206_v0  ;;  %583 = vst.msk [vmem:[#allocation2 + $0x48] sm:$0xff] %vm573_vm0, %v6206_v0 }
  0x71   : > { %584 = vst.msk [vmem:[#allocation2 + $0x50] sm:$0xff] %vm573_vm0, %v6206_v0  ;;  %585 = vst.msk [vmem:[#allocation2 + $0x58] sm:$0xff] %vm573_vm0, %v6206_v0 }
  0x72   : > { %586 = vst.msk [vmem:[#allocation2 + $0x60] sm:$0xff] %vm573_vm0, %v6206_v0  ;;  %587 = vst.msk [vmem:[#allocation2 + $0x68] sm:$0xff] %vm573_vm0, %v6206_v0 }
  0x73   : > { %588 = vst.msk [vmem:[#allocation2 + $0x70] sm:$0xff] %vm573_vm0, %v6206_v0  ;;  %589 = vst.msk [vmem:[#allocation2 + $0x78] sm:$0xff] %vm573_vm0, %v6206_v0 }
  0x74 PF: > { %v629_v1 = vld [vmem:[%s8551_s1 + $0x18] sm:$0xff]  ;;  %vm634_vm1 = vcmask 261120   ;;  %v628_v3 = vld [vmem:[%s8551_s1 + $0x10] sm:$0xff]  ;;  %v590_v5 = vld [vmem:[%s6425_s28] sm:$0xff]  ;;  %p5121_p0 = scmp.ne.s32.totalorder %s6190_s16, 2 }
  0x75   : > { %v633_v2 = vld [vmem:[#allocation3 + $0x18] sm:$0xff]  ;;  %5327 = vmatprep.subr.msk.mxu0 %vm634_vm1, %v629_v1  ;;  %v632_v4 = vld [vmem:[#allocation3 + $0x10] sm:$0xff]  ;;  %v627_v6 = vld [vmem:[%s8551_s1 + $0x8] sm:$0xff]  ;;  %5335 = vmatprep.mubr.msk.f32.mxu0 %vm634_vm1, %v590_v5  ;;  %s8742_s13 = sld [smem:[#allocation38_spill]] (!%p5121_p0) }
  0x76   : > { %5359 = vmatprep.subr.msk.mxu1 %vm634_vm1, %v633_v2  ;;  %5328 = vmatpush3.xpose.msk.msra.mxu0 %vm634_vm1, %v629_v1  ;;  %v631_v7 = vld [vmem:[#allocation3 + $0x8] sm:$0xff]  ;;  %v626_v8 = vld [vmem:[%s8551_s1] sm:$0xff]  ;;  %v592_v11 = vld [vmem:[%s6425_s28 + $0x10] sm:$0xff] }
  0x77   : > { %5360 = vmatpush3.xpose.msk.msra.mxu1 %vm634_vm1, %v633_v2  ;;  %5329 = vmatprep.subr.msk.mxu0 %vm634_vm1, %v628_v3  ;;  %v630_v9 = vld [vmem:[#allocation3] sm:$0xff]  ;;  %v591_v10 = vld [vmem:[%s6425_s28 + $0x8] sm:$0xff]  ;;  %v593_v12 = vld [vmem:[%s6425_s28 + $0x18] sm:$0xff] }
  0x78   : > { %5361 = vmatprep.subr.msk.mxu1 %vm634_vm1, %v632_v4  ;;  %5367 = vmatprep.mubr.msk.f32.mxu1 %vm634_vm1, %v590_v5  ;;  %v594_v13 = vld [vmem:[%s6425_s28 + $0x20] sm:$0xff]  ;;  %v595_v14 = vld [vmem:[%s6425_s28 + $0x28] sm:$0xff]  ;;  %v596_v15 = vld [vmem:[%s6425_s28 + $0x30] sm:$0xff] }
  0x79   : > { %v597_v16 = vld [vmem:[%s6425_s28 + $0x38] sm:$0xff]  ;;  %v598_v17 = vld [vmem:[%s6425_s28 + $0x40] sm:$0xff]  ;;  %v599_v18 = vld [vmem:[%s6425_s28 + $0x48] sm:$0xff] }
  0x7a   : > { %5330 = vmatpush3.xpose.msk.msra.mxu0 %vm634_vm1, %v628_v3  ;;  %v600_v19 = vld [vmem:[%s6425_s28 + $0x50] sm:$0xff]  ;;  %v601_v20 = vld [vmem:[%s6425_s28 + $0x58] sm:$0xff]  ;;  %v602_v21 = vld [vmem:[%s6425_s28 + $0x60] sm:$0xff] }
  0x7b   : > { %5362 = vmatpush3.xpose.msk.msra.mxu1 %vm634_vm1, %v632_v4  ;;  %5331 = vmatprep.subr.msk.mxu0 %vm634_vm1, %v627_v6  ;;  %v603_v22 = vld [vmem:[%s6425_s28 + $0x68] sm:$0xff]  ;;  %v604_v23 = vld [vmem:[%s6425_s28 + $0x70] sm:$0xff]  ;;  %v605_v24 = vld [vmem:[%s6425_s28 + $0x78] sm:$0xff]  ;;  %s8743_s10 = smov (!%p5121_p0), %s8742_s13 }
  0x7c   : > { %5363 = vmatprep.subr.msk.mxu1 %vm634_vm1, %v631_v7  ;;  %v1559_v25 = vld [vmem:[#allocation3 + $0x38] sm:$0xff]  ;;  %v1558_v27 = vld [vmem:[#allocation3 + $0x30] sm:$0xff]  ;;  %v1557_v39 = vld [vmem:[#allocation3 + $0x28] sm:$0xff] }
  0x7d   : > { %v4952_v26 = vld [vmem:[%s8551_s1 + $0x38] sm:$0xff]  ;;  %v4951_v28 = vld [vmem:[%s8551_s1 + $0x30] sm:$0xff]  ;;  %v4950_v40 = vld [vmem:[%s8551_s1 + $0x28] sm:$0xff] }
  0x7e   : > { %5332 = vmatpush3.xpose.msk.msra.mxu0 %vm634_vm1, %v627_v6  ;;  %v1556_v61 = vld [vmem:[#allocation3 + $0x20] sm:$0xff] }
  0x7f   : > { %5364 = vmatpush3.xpose.msk.msra.mxu1 %vm634_vm1, %v631_v7  ;;  %5333 = vmatprep.subr.msk.mxu0 %vm634_vm1, %v626_v8  ;;  %v4949_v62 = vld [vmem:[%s8551_s1 + $0x20] sm:$0xff] }
  0x80   : > { %5365 = vmatprep.subr.msk.mxu1 %vm634_vm1, %v630_v9 }
  0x82   : > { %5334 = vmatpush3.xpose.msk.msra.mxu0 %vm634_vm1, %v626_v8 }
  0x83   : > { %5366 = vmatpush3.xpose.msk.msra.mxu1 %vm634_vm1, %v630_v9  ;;  %5391 = vmatprep.subr.msk.mxu0 %vm634_vm1, %v4952_v26 }
  0x84   : > { %5423 = vmatprep.subr.msk.mxu1 %vm634_vm1, %v1559_v25 }
  0x85   : > { %5336 = vmatmul.mubr.msk.f32.vlgmr.msra.gmra.mxu0 %vm634_vm1, %v591_v10 }
  0x86   : > { %5368 = vmatmul.mubr.msk.f32.vlgmr.msra.gmra.mxu1 %vm634_vm1, %v591_v10  ;;  %5338 = vmatprep.mubr.msk.f32.mxu0 %vm634_vm1, %v592_v11 }
  0x87   : > { %5370 = vmatprep.mubr.msk.f32.mxu1 %vm634_vm1, %v592_v11  ;;  %5424 = vmatpush3.xpose.msk.msra.mxu1 %vm634_vm1, %v1559_v25 }
  0x88   : > { %5392 = vmatpush3.xpose.msk.msra.mxu0 %vm634_vm1, %v4952_v26  ;;  %5425 = vmatprep.subr.msk.mxu1 %vm634_vm1, %v1558_v27 }
  0x89   : > { %5339 = vmatmul.mubr.msk.f32.gmra.mxu0 %vm634_vm1, %v593_v12  ;;  %5393 = vmatprep.subr.msk.mxu0 %vm634_vm1, %v4951_v28 }
  0x8a   : > { %5371 = vmatmul.mubr.msk.f32.gmra.mxu1 %vm634_vm1, %v593_v12  ;;  %5341 = vmatprep.mubr.msk.f32.mxu0 %vm634_vm1, %v594_v13 }
  0x8b   : > { %5373 = vmatprep.mubr.msk.f32.mxu1 %vm634_vm1, %v594_v13  ;;  %5426 = vmatpush3.xpose.msk.msra.mxu1 %vm634_vm1, %v1558_v27 }
  0x8c   : > { %5394 = vmatpush3.xpose.msk.msra.mxu0 %vm634_vm1, %v4951_v28  ;;  %5427 = vmatprep.subr.msk.mxu1 %vm634_vm1, %v1557_v39 }
  0x8d   : > { %5342 = vmatmul.mubr.msk.f32.gmra.mxu0 %vm634_vm1, %v595_v14  ;;  %5395 = vmatprep.subr.msk.mxu0 %vm634_vm1, %v4950_v40 }
  0x8e   : > { %5374 = vmatmul.mubr.msk.f32.gmra.mxu1 %vm634_vm1, %v595_v14  ;;  %5344 = vmatprep.mubr.msk.f32.mxu0 %vm634_vm1, %v596_v15 }
  0x8f   : > { %5376 = vmatprep.mubr.msk.f32.mxu1 %vm634_vm1, %v596_v15  ;;  %5428 = vmatpush3.xpose.msk.msra.mxu1 %vm634_vm1, %v1557_v39 }
  0x90   : > { %5396 = vmatpush3.xpose.msk.msra.mxu0 %vm634_vm1, %v4950_v40  ;;  %5429 = vmatprep.subr.msk.mxu1 %vm634_vm1, %v1556_v61 }
  0x91   : > { %5345 = vmatmul.mubr.msk.f32.gmra.mxu0 %vm634_vm1, %v597_v16  ;;  %5397 = vmatprep.subr.msk.mxu0 %vm634_vm1, %v4949_v62 }
  0x92   : > { %5377 = vmatmul.mubr.msk.f32.gmra.mxu1 %vm634_vm1, %v597_v16  ;;  %5347 = vmatprep.mubr.msk.f32.mxu0 %vm634_vm1, %v598_v17 }
  0x93   : > { %5379 = vmatprep.mubr.msk.f32.mxu1 %vm634_vm1, %v598_v17  ;;  %5430 = vmatpush3.xpose.msk.msra.mxu1 %vm634_vm1, %v1556_v61 }
  0x94   : > { %5398 = vmatpush3.xpose.msk.msra.mxu0 %vm634_vm1, %v4949_v62 }
  0x95   : > { %5348 = vmatmul.mubr.msk.f32.gmra.mxu0 %vm634_vm1, %v599_v18 }
  0x96   : > { %5380 = vmatmul.mubr.msk.f32.gmra.mxu1 %vm634_vm1, %v599_v18  ;;  %5350 = vmatprep.mubr.msk.f32.mxu0 %vm634_vm1, %v600_v19 }
  0x97   : > { %5382 = vmatprep.mubr.msk.f32.mxu1 %vm634_vm1, %v600_v19 }
  0x99   : > { %5351 = vmatmul.mubr.msk.f32.gmra.mxu0 %vm634_vm1, %v601_v20 }
  0x9a   : > { %5383 = vmatmul.mubr.msk.f32.gmra.mxu1 %vm634_vm1, %v601_v20  ;;  %5353 = vmatprep.mubr.msk.f32.mxu0 %vm634_vm1, %v602_v21 }
  0x9b   : > { %5385 = vmatprep.mubr.msk.f32.mxu1 %vm634_vm1, %v602_v21 }
  0x9d   : > { %5354 = vmatmul.mubr.msk.f32.gmra.mxu0 %vm634_vm1, %v603_v22 }
  0x9e   : > { %5386 = vmatmul.mubr.msk.f32.gmra.mxu1 %vm634_vm1, %v603_v22  ;;  %5356 = vmatprep.mubr.msk.f32.mxu0 %vm634_vm1, %v604_v23 }
  0x9f   : > { %5388 = vmatprep.mubr.msk.f32.mxu1 %vm634_vm1, %v604_v23 }
  0xa1   : > { %5357 = vmatmul.mubr.msk.f32.gmra.mxu0 %vm634_vm1, %v605_v24 }
  0xa2   : > { %5389 = vmatmul.mubr.msk.f32.gmra.mxu1 %vm634_vm1, %v605_v24 }
 0x145   : > { %v6545_v29 = vpop.f32.mrf.mxu0 }
 0x146   : > { %v6547_v30 = vpop.f32.mrf.mxu1  ;;  %v998_v31 = vsel %vm634_vm1, %v6545_v29, 0.0  ;;  %v1055_v32 = vmul.f32 %v6545_v29, %v6545_v29 }
 0x147   : > { %v1275_v33 = vmul.f32 %v6547_v30, %v6547_v30  ;;  %v6559_v34 = vpop.f32.mrf.mxu0  ;;  %v1219_v41 = vsel %vm634_vm1, %v6547_v30, 0.0 }
 0x148   : > { %v6561_v35 = vpop.f32.mrf.mxu1  ;;  %v1071_v36 = vsel %vm634_vm1, %v1055_v32, 0.0  ;;  %v997_v37 = vsel %vm634_vm1, %v6559_v34, 0.0  ;;  %v1054_v38 = vmul.f32 %v6559_v34, %v6559_v34 }
 0x149   : > { %v999_v42 = vadd.f32 %v998_v31, %v997_v37  ;;  %v1218_v43 = vsel %vm634_vm1, %v6561_v35, 0.0  ;;  %v1274_v44 = vmul.f32 %v6561_v35, %v6561_v35  ;;  %v6577_v45 = vpop.f32.mrf.mxu0  ;;  %v1291_v47 = vsel %vm634_vm1, %v1275_v33, 0.0 }
 0x14a   : > { %v6579_v46 = vpop.f32.mrf.mxu1  ;;  %v1070_v48 = vsel %vm634_vm1, %v1054_v38, 0.0  ;;  %v1220_v49 = vadd.f32 %v1219_v41, %v1218_v43  ;;  %v1057_v50 = vmul.f32 %v6577_v45, %v6577_v45  ;;  %v1002_v53 = vsel %vm634_vm1, %v6577_v45, 0.0 }
 0x14b   : > { %v1072_v51 = vadd.f32 %v1071_v36, %v1070_v48  ;;  %v1290_v52 = vsel %vm634_vm1, %v1274_v44, 0.0  ;;  %v1277_v54 = vmul.f32 %v6579_v46, %v6579_v46  ;;  %v6594_v55 = vpop.f32.mrf.mxu0  ;;  %v1223_v58 = vsel %vm634_vm1, %v6579_v46, 0.0 }
 0x14c   : > { %v6596_v56 = vpop.f32.mrf.mxu1  ;;  %v1292_v57 = vadd.f32 %v1291_v47, %v1290_v52  ;;  %v1000_v59 = vsel %vm634_vm1, %v6594_v55, 0.0  ;;  %v1056_v60 = vmul.f32 %v6594_v55, %v6594_v55  ;;  %v1075_v63 = vsel %vm634_vm1, %v1057_v50, 0.0 }
 0x14d   : > { %v1001_v0 = vadd.f32 %v1000_v59, %v999_v42  ;;  %v1221_v1 = vsel %vm634_vm1, %v6596_v56, 0.0  ;;  %v1276_v2 = vmul.f32 %v6596_v56, %v6596_v56  ;;  %v6612_v3 = vpop.f32.mrf.mxu0  ;;  %v1295_v5 = vsel %vm634_vm1, %v1277_v54, 0.0 }
 0x14e   : > { %v6614_v4 = vpop.f32.mrf.mxu1  ;;  %v1073_v6 = vsel %vm634_vm1, %v1056_v60, 0.0  ;;  %v1222_v7 = vadd.f32 %v1221_v1, %v1220_v49  ;;  %v1059_v8 = vmul.f32 %v6612_v3, %v6612_v3  ;;  %v1011_v12 = vsel %vm634_vm1, %v6612_v3, 0.0 }
 0x14f   : > { %v1003_v9 = vadd.f32 %v1002_v53, %v1001_v0  ;;  %v1074_v10 = vadd.f32 %v1073_v6, %v1072_v51  ;;  %v1293_v11 = vsel %vm634_vm1, %v1276_v2, 0.0  ;;  %v6627_v13 = vpop.f32.mrf.mxu0  ;;  %v1279_v17 = vmul.f32 %v6614_v4, %v6614_v4 }
 0x150   : > { %v1224_v14 = vadd.f32 %v1223_v58, %v1222_v7  ;;  %v1294_v15 = vadd.f32 %v1293_v11, %v1292_v57  ;;  %v1084_v16 = vsel %vm634_vm1, %v1059_v8, 0.0  ;;  %v6632_v18 = vpop.f32.mrf.mxu1  ;;  %v1010_v21 = vsel %vm634_vm1, %v6627_v13, 0.0 }
 0x151   : > { %v1004_v19 = vrot.slane %v1003_v9, 4  ;;  %v1076_v20 = vadd.f32 %v1075_v63, %v1074_v10  ;;  %v1058_v22 = vmul.f32 %v6627_v13, %v6627_v13  ;;  %v1232_v25 = vsel %vm634_vm1, %v6614_v4, 0.0  ;;  %v6641_v27 = vpop.f32.mrf.mxu0 }
 0x152   : > { %v1225_v23 = vrot.slane %v1224_v14, 4  ;;  %v1296_v24 = vadd.f32 %v1295_v5, %v1294_v15  ;;  %v1304_v26 = vsel %vm634_vm1, %v1279_v17, 0.0  ;;  %v1231_v33 = vsel %vm634_vm1, %v6632_v18, 0.0  ;;  %v6646_v40 = vpop.f32.mrf.mxu1 }
 0x153   : > { %v1005_v28 = vadd.f32 %v1004_v19, %v1003_v9  ;;  %v1077_v31 = vrot.slane %v1076_v20, 4  ;;  %v1083_v32 = vsel %vm634_vm1, %v1058_v22, 0.0  ;;  %v1012_v38 = vadd.f32 %v1011_v12, %v1010_v21  ;;  %v6654_v51 = vpop.f32.mrf.mxu0 }
 0x154   : > { %v1226_v36 = vadd.f32 %v1225_v23, %v1224_v14  ;;  %v1297_v37 = vrot.slane %v1296_v24, 4  ;;  %v1085_v39 = vadd.f32 %v1084_v16, %v1083_v32  ;;  %v1233_v43 = vadd.f32 %v1232_v25, %v1231_v33  ;;  %v6661_v62 = vpop.f32.mrf.mxu1 }
 0x155   : > { %v1006_v41 = vrot.slane %v1005_v28, 2  ;;  %v1078_v42 = vadd.f32 %v1077_v31, %v1076_v20  ;;  %v1278_v44 = vmul.f32 %v6632_v18, %v6632_v18  ;;  %v1015_v49 = vsel %vm634_vm1, %v6641_v27, 0.0 }
 0x156   : > { %v1227_v47 = vrot.slane %v1226_v36, 2  ;;  %v1298_v48 = vadd.f32 %v1297_v37, %v1296_v24  ;;  %v1061_v50 = vmul.f32 %v6641_v27, %v6641_v27  ;;  %v1236_v57 = vsel %vm634_vm1, %v6646_v40, 0.0 }
 0x157   : > { %v1007_v52 = vadd.f32 %v1006_v41, %v1005_v28  ;;  %v1079_v53 = vrot.slane %v1078_v42, 2  ;;  %v1303_v54 = vsel %vm634_vm1, %v1278_v44, 0.0  ;;  %v1281_v61 = vmul.f32 %v6646_v40, %v6646_v40 }
 0x158   : > { %v1228_v58 = vadd.f32 %v1227_v47, %v1226_v36  ;;  %v1299_v59 = vrot.slane %v1298_v48, 2  ;;  %v1305_v60 = vadd.f32 %v1304_v26, %v1303_v54  ;;  %v1088_v1 = vsel %vm634_vm1, %v1061_v50, 0.0  ;;  %v6679_v36 = vpop.f32.mrf.mxu0 }
 0x159   : > { %v1008_v63 = vrot.slane %v1007_v52, 1  ;;  %v1080_v0 = vadd.f32 %v1079_v53, %v1078_v42  ;;  %v1013_v2 = vsel %vm634_vm1, %v6654_v51, 0.0  ;;  %v1060_v8 = vmul.f32 %v6654_v51, %v6654_v51 }
 0x15a   : > { %v1229_v5 = vrot.slane %v1228_v58, 1  ;;  %v1300_v6 = vadd.f32 %v1299_v59, %v1298_v48  ;;  %v1014_v7 = vadd.f32 %v1013_v2, %v1012_v38  ;;  %v1234_v11 = vsel %vm634_vm1, %v6661_v62, 0.0  ;;  %v6685_v48 = vpop.f32.mrf.mxu1 }
 0x15b   : > { %v1009_v9 = vadd.f32 %v1008_v63, %v1007_v52  ;;  %v1081_v10 = vrot.slane %v1080_v0, 1  ;;  %v1280_v12 = vmul.f32 %v6661_v62, %v6661_v62  ;;  %v1086_v17 = vsel %vm634_vm1, %v1060_v8, 0.0 }
 0x15c   : > { %v1230_v14 = vadd.f32 %v1229_v5, %v1228_v58  ;;  %v1301_v15 = vrot.slane %v1300_v6, 1  ;;  %v1016_v16 = vadd.f32 %v1015_v49, %v1014_v7  ;;  %v1087_v21 = vadd.f32 %v1086_v17, %v1085_v39  ;;  %v6689_v58 = vpop.f32.mrf.mxu0  ;;  %v6691_v2 = vpop.f32.mrf.mxu1 }
 0x15d   : > { %v6673_v19 = vmul.f32 0.03125, %v1009_v9  ;;  %v1082_v20 = vadd.f32 %v1081_v10, %v1080_v0  ;;  %v1235_v22 = vadd.f32 %v1234_v11, %v1233_v43  ;;  %v1306_v26 = vsel %vm634_vm1, %v1280_v12, 0.0 }
 0x15e   : > { %v6675_v23 = vmul.f32 0.03125, %v1230_v14  ;;  %v1302_v24 = vadd.f32 %v1301_v15, %v1300_v6  ;;  %v1017_v25 = vrot.slane %v1016_v16, 4  ;;  %v1154_v28 = vlaneseq  ;;  %v6698_v11 = vpop.f32.mrf.mxu0 }
 0x15f   : > { %v1308_v31 = vsel %vm634_vm1, %v1281_v61, 0.0  ;;  %v1089_v32 = vadd.f32 %v1088_v1, %v1087_v21  ;;  %v1237_v33 = vadd.f32 %v1236_v57, %v1235_v22  ;;  %v1307_v39 = vadd.f32 %v1306_v26, %v1305_v60 }
 0x160   : > { %v1342_v37 = vmul.f32 0.03125, %v1302_v24  ;;  %v1346_v38 = vmul.f32 %v6675_v23, %v6675_v23  ;;  %v1018_v41 = vadd.f32 %v1017_v25, %v1016_v16  ;;  %v1122_v42 = vmul.f32 0.03125, %v1082_v20  ;;  %v6708_v24 = vpop.f32.mrf.mxu1 }
 0x161   : > { %v1126_v43 = vmul.f32 %v6673_v19, %v6673_v19  ;;  %v1090_v44 = vrot.slane %v1089_v32, 4  ;;  %v1238_v47 = vrot.slane %v1237_v33, 4  ;;  %v1309_v52 = vadd.f32 %v1308_v31, %v1307_v39 }
 0x162   : > { %v1350_v49 = vsub.f32 %v1342_v37, %v1346_v38  ;;  %v1019_v50 = vrot.slane %v1018_v41, 2  ;;  %v6687_v53 = vshrl.u32 %v1154_v28, 7  ;;  %v1063_v7 = vmul.f32 %v6679_v36, %v6679_v36 }
 0x163   : > { %v1091_v54 = vadd.f32 %v1090_v44, %v1089_v32  ;;  %v1239_v57 = vadd.f32 %v1238_v47, %v1237_v33  ;;  %v1310_v60 = vrot.slane %v1309_v52, 4  ;;  %v1130_v63 = vsub.f32 %v1122_v42, %v1126_v43 }
 0x164   : > { %8639 = vst [vmem:[#allocation16_spill] sm:$0xff] %v6687_v53  ;;  %v1354_v59 = vadd.f32 1e-05, %v1350_v49  ;;  %v1020_v61 = vadd.f32 %v1019_v50, %v1018_v41  ;;  %v6696_v8 = vsub.s32 0, %v6687_v53  ;;  %v1024_v14 = vsel %vm634_vm1, %v6679_v36, 0.0  ;;  %v6716_v41 = vpop.f32.mrf.mxu0 }
 0x165   : > { %v1092_v0 = vrot.slane %v1091_v54, 2  ;;  %v1240_v1 = vrot.slane %v1239_v57, 2  ;;  %v1311_v6 = vadd.f32 %v1310_v60, %v1309_v52  ;;  %v1023_v15 = vsel %vm634_vm1, %v6689_v58, 0.0 }
 0x166   : > { %5698 = vrsqrt.f32 %v1354_v59  ;;  %v1021_v5 = vrot.slane %v1020_v61, 1  ;;  %v1062_v16 = vmul.f32 %v6689_v58, %v6689_v58  ;;  %v1134_v17 = vadd.f32 1e-05, %v1130_v63 }
 0x167   : > { %v1093_v9 = vadd.f32 %v1092_v0, %v1091_v54  ;;  %v1241_v10 = vadd.f32 %v1240_v1, %v1239_v57  ;;  %v1312_v12 = vrot.slane %v1311_v6, 2  ;;  %v1244_v22 = vsel %vm634_vm1, %v6691_v2, 0.0  ;;  %v6728_v54 = vpop.f32.mrf.mxu1 }
 0x168   : > { %v1022_v20 = vadd.f32 %v1021_v5, %v1020_v61  ;;  %v1097_v28 = vsel %vm634_vm1, %v1063_v7, 0.0  ;;  %v1096_v31 = vsel %vm634_vm1, %v1062_v16, 0.0  ;;  %v1245_v33 = vsel %vm634_vm1, %v6685_v48, 0.0 }
 0x169   : > { %v1242_v21 = vrot.slane %v1241_v10, 1  ;;  %v1094_v25 = vrot.slane %v1093_v9, 1  ;;  %v1313_v26 = vadd.f32 %v1312_v12, %v1311_v6  ;;  %v1025_v37 = vadd.f32 %v1024_v14, %v1023_v15  ;;  %v6744_v12 = vld [vmem:[%s6406_s21] sm:$0xf] }
 0x16a   : > { %v1282_v38 = vmul.f32 %v6691_v2, %v6691_v2  ;;  %v1283_v42 = vmul.f32 %v6685_v48, %v6685_v48  ;;  %v1246_v43 = vadd.f32 %v1245_v33, %v1244_v22  ;;  %v1065_v44 = vmul.f32 %v6698_v11, %v6698_v11 }
 0x16b   : > { %v1243_v32 = vadd.f32 %v1242_v21, %v1241_v10  ;;  %v1314_v39 = vrot.slane %v1313_v26, 1  ;;  %v6722_v47 = vmul.f32 0.03125, %v1022_v20  ;;  %v1098_v50 = vadd.f32 %v1097_v28, %v1096_v31 }
 0x16c   : > { %v1028_v52 = vsel %vm634_vm1, %v6698_v11, 0.0  ;;  %v1095_v57 = vadd.f32 %v1094_v25, %v1093_v9  ;;  %v1026_v61 = vsel %vm634_vm1, %v6716_v41, 0.0  ;;  %v1064_v60 = vmul.f32 %v6716_v41, %v6716_v41 }
 0x16d   : > { %v6724_v49 = vmul.f32 0.03125, %v1243_v32  ;;  %v1315_v59 = vadd.f32 %v1314_v39, %v1313_v26  ;;  %v1316_v0 = vsel %vm634_vm1, %v1282_v38, 0.0  ;;  %v1101_v1 = vsel %vm634_vm1, %v1065_v44, 0.0 }
 0x16e   : > { %v1027_v5 = vadd.f32 %v1026_v61, %v1025_v37  ;;  %v1099_v7 = vsel %vm634_vm1, %v1064_v60, 0.0  ;;  %v1247_v9 = vsel %vm634_vm1, %v6728_v54, 0.0  ;;  %v1284_v10 = vmul.f32 %v6728_v54, %v6728_v54 }
 0x16f   : > { %v1347_v63 = vmul.f32 %v6724_v49, %v6724_v49  ;;  %v1343_v6 = vmul.f32 0.03125, %v1315_v59  ;;  %5700 = vrsqrt.f32 %v1134_v17  ;;  %v1100_v15 = vadd.f32 %v1099_v7, %v1098_v50 }
 0x170   : > { %v1029_v14 = vadd.f32 %v1028_v52, %v1027_v5  ;;  %v1248_v16 = vadd.f32 %v1247_v9, %v1246_v43  ;;  %v1127_v20 = vmul.f32 %v6722_v47, %v6722_v47  ;;  %v1317_v22 = vsel %vm634_vm1, %v1283_v42, 0.0  ;;  %v6754_v43 = vld [vmem:[%s6414_s20] sm:$0xf] }
 0x171   : > { %v1351_v21 = vsub.f32 %v1343_v6, %v1347_v63  ;;  %v1319_v25 = vsel %vm634_vm1, %v1284_v10, 0.0  ;;  %v1318_v28 = vadd.f32 %v1317_v22, %v1316_v0  ;;  %v1249_v31 = vsel %vm634_vm1, %v6708_v24, 0.0 }
 0x172   : > { %v1030_v17 = vrot.slane %v1029_v14, 4  ;;  %v1102_v32 = vadd.f32 %v1101_v1, %v1100_v15  ;;  %v1123_v37 = vmul.f32 0.03125, %v1095_v57  ;;  %v1250_v39 = vadd.f32 %v1249_v31, %v1248_v16 }
 0x173   : > { %v5699_v26 = vpop.eup %5698  ;;  %v1355_v38 = vadd.f32 1e-05, %v1351_v21  ;;  %v1285_v44 = vmul.f32 %v6708_v24, %v6708_v24  ;;  %v1320_v52 = vadd.f32 %v1319_v25, %v1318_v28 }
 0x174   : > { %v1362_v33 = vmul.f32 %v5699_v26, %v6744_v12  ;;  %v1031_v42 = vadd.f32 %v1030_v17, %v1029_v14  ;;  %v1103_v50 = vrot.slane %v1102_v32, 4  ;;  %v1251_v60 = vrot.slane %v1250_v39, 4  ;;  %v6767_v26 = vld [vmem:[%s6440_s26] sm:$0xf] }
 0x175   : > { %5702 = vrsqrt.f32 %v1355_v38  ;;  %v1131_v0 = vsub.f32 %v1123_v37, %v1127_v20  ;;  %v1321_v6 = vsel %vm634_vm1, %v1285_v44, 0.0  ;;  %v6770_v37 = vpop.f32.mrf.mxu0 }
 0x176   : > { %v1366_v59 = vmul.f32 %v1362_v33, %v6675_v23  ;;  %v1377_v61 = vrot.slane %v1362_v33, %v6696_v8  ;;  %v1032_v63 = vrot.slane %v1031_v42, 2  ;;  %v1104_v7 = vadd.f32 %v1103_v50, %v1102_v32  ;;  %v6774_v50 = vpop.f32.mrf.mxu1 }
 0x177   : > { %v1252_v23 = vadd.f32 %v1251_v60, %v1250_v39  ;;  %v1322_v14 = vadd.f32 %v1321_v6, %v1320_v52  ;;  %v1135_v25 = vadd.f32 1e-05, %v1131_v0  ;;  %v1287_v6 = vmul.f32 %v6774_v50, %v6774_v50 }
 0x178   : > { %v1370_v57 = vsub.f32 %v6754_v43, %v1366_v59  ;;  %v1391_v1 = vmul.f32 %v6547_v30, %v1377_v61  ;;  %v1392_v5 = vmul.f32 %v1377_v61, %v6596_v56  ;;  %v1033_v10 = vadd.f32 %v1032_v63, %v1031_v42 }
 0x179   : > { %v1390_v15 = vmul.f32 %v1377_v61, %v6561_v35  ;;  %v1105_v16 = vrot.slane %v1104_v7, 2  ;;  %v1393_v30 = vmul.f32 %v6579_v46, %v1377_v61  ;;  %v1253_v56 = vrot.slane %v1252_v23, 2 }
 0x17a   : > { %v1409_v9 = vrot.slane %v1370_v57, %v6696_v8  ;;  %v1323_v28 = vrot.slane %v1322_v14, 4  ;;  %v1034_v33 = vrot.slane %v1033_v10, 1  ;;  %5704 = vrsqrt.f32 %v1135_v25  ;;  %v6781_v57 = vpop.f32.mrf.mxu0 }
 0x17b   : > { %v1106_v39 = vadd.f32 %v1105_v16, %v1104_v7  ;;  %v1254_v35 = vadd.f32 %v1253_v56, %v1252_v23  ;;  %v1037_v42 = vsel %vm634_vm1, %v6770_v37, 0.0  ;;  %v1067_v59 = vmul.f32 %v6770_v37, %v6770_v37 }
 0x17c   : > { %v1423_v21 = vadd.f32 %v1409_v9, %v1391_v1  ;;  %v1424_v22 = vadd.f32 %v1409_v9, %v1392_v5  ;;  %v1422_v20 = vadd.f32 %v1409_v9, %v1390_v15  ;;  %v5701_v31 = vpop.eup %5700  ;;  %v1425_v38 = vadd.f32 %v1409_v9, %v1393_v30 }
 0x17d   : > { %v1324_v44 = vadd.f32 %v1323_v28, %v1322_v14  ;;  %v6777_v46 = vmul.f32 %v5701_v31, %v6767_v26  ;;  %v1035_v61 = vadd.f32 %v1034_v33, %v1033_v10  ;;  %v1255_v60 = vrot.slane %v1254_v35, 1 }
 0x17e   : > { %v4934_v17 = vmul.f32 -1.442695, %v1423_v21  ;;  %v4935_v32 = vmul.f32 -1.442695, %v1424_v22  ;;  %v4933_v52 = vmul.f32 -1.442695, %v1422_v20  ;;  %v1066_v10 = vmul.f32 %v6781_v57, %v6781_v57  ;;  %v6797_v22 = vpop.f32.mrf.mxu1 }
 0x17f   : > { %v1325_v63 = vrot.slane %v1324_v44, 2  ;;  %v4936_v1 = vmul.f32 -1.442695, %v1425_v38  ;;  %v1107_v5 = vrot.slane %v1106_v39, 1  ;;  %v1036_v7 = vsel %vm634_vm1, %v6781_v57, 0.0 }
 0x180   : > { %5706 = vpow2.f32 %v4934_v17  ;;  %v1256_v23 = vadd.f32 %v1255_v60, %v1254_v35  ;;  %v6792_v15 = vmul.f32 %v6777_v46, %v6673_v19  ;;  %v1110_v16 = vsel %vm634_vm1, %v1067_v59, 0.0 }
 0x181   : > { %5708 = vpow2.f32 %v4935_v32  ;;  %v1326_v14 = vadd.f32 %v1325_v63, %v1324_v44  ;;  %v1258_v21 = vsel %vm634_vm1, %v6774_v50, 0.0  ;;  %v6803_v28 = vmul.f32 0.03125, %v1035_v61  ;;  %v6823_v63 = vpop.f32.mrf.mxu1 }
 0x182   : > { %v5703_v0 = vpop.eup %5702  ;;  %5710 = vpow2.f32 %v4933_v52  ;;  %v6801_v20 = vmul.f32 0.03125, %v1256_v23  ;;  %v6805_v31 = vadd.f32 %v1107_v5, %v1106_v39  ;;  %v1330_v19 = vsel %vm634_vm1, %v1287_v6, 0.0  ;;  %v6815_v39 = vpop.f32.mrf.mxu0 }
 0x183   : > { %v1363_v9 = vmul.f32 %v5703_v0, %v6744_v12  ;;  %v1327_v56 = vrot.slane %v1326_v14, 1  ;;  %v1038_v17 = vadd.f32 %v1037_v42, %v1036_v7  ;;  %5712 = vpow2.f32 %v4936_v1 }
 0x184   : > { %v1109_v33 = vsel %vm634_vm1, %v1066_v10, 0.0  ;;  %v1348_v61 = vmul.f32 %v6801_v20, %v6801_v20  ;;  %v1286_v60 = vmul.f32 %v6797_v22, %v6797_v22  ;;  %v1262_v10 = vsel %vm634_vm1, %v6823_v63, 0.0 }
 0x185   : > { %v1367_v25 = vmul.f32 %v1363_v9, %v6724_v49  ;;  %v1381_v30 = vrot.slane %v1363_v9, %v6696_v8  ;;  %v1257_v49 = vsel %vm634_vm1, %v6797_v22, 0.0  ;;  %v1328_v52 = vadd.f32 %v1327_v56, %v1326_v14 }
 0x186   : > { %v1111_v0 = vadd.f32 %v1110_v16, %v1109_v33  ;;  %v1329_v23 = vsel %vm634_vm1, %v1286_v60, 0.0  ;;  %v1041_v14 = vsel %vm634_vm1, %v6815_v39, 0.0  ;;  %v6837_v33 = vpop.f32.mrf.mxu1 }
 0x187   : > { %v1371_v32 = vsub.f32 %v6754_v43, %v1367_v25  ;;  %v1394_v38 = vmul.f32 %v1381_v30, %v6632_v18  ;;  %v1395_v35 = vmul.f32 %v6614_v4, %v1381_v30  ;;  %v1396_v44 = vmul.f32 %v1381_v30, %v6661_v62  ;;  %v5705_v7 = vpop.eup %5704  ;;  %v6832_v25 = vpop.f32.mrf.mxu0 }
 0x188   : > { %v1397_v59 = vmul.f32 %v6646_v40, %v1381_v30  ;;  %v1344_v18 = vmul.f32 0.03125, %v1328_v52  ;;  %v1259_v4 = vadd.f32 %v1258_v21, %v1257_v49  ;;  %v1069_v62 = vmul.f32 %v6815_v39, %v6815_v39 }
 0x189   : > { %v1413_v42 = vrot.slane %v1371_v32, %v6696_v8  ;;  %v1289_v32 = vmul.f32 %v6823_v63, %v6823_v63  ;;  %v1331_v52 = vadd.f32 %v1330_v19, %v1329_v23 }
 0x18a   : > { %v1352_v9 = vsub.f32 %v1344_v18, %v1348_v61  ;;  %v1114_v56 = vsel %vm634_vm1, %v1069_v62, 0.0  ;;  %v1068_v61 = vmul.f32 %v6832_v25, %v6832_v25  ;;  %v1260_v18 = vsel %vm634_vm1, %v6837_v33, 0.0 }
 0x18b   : > { %v1426_v1 = vadd.f32 %v1413_v42, %v1394_v38  ;;  %v1427_v5 = vadd.f32 %v1413_v42, %v1395_v35  ;;  %v1428_v6 = vadd.f32 %v1413_v42, %v1396_v44  ;;  %v1429_v40 = vadd.f32 %v1413_v42, %v1397_v59 }
 0x18c   : > { %v1039_v42 = vsel %vm634_vm1, %v6832_v25, 0.0  ;;  %v1288_v62 = vmul.f32 %v6837_v33, %v6837_v33  ;;  %v1112_v19 = vsel %vm634_vm1, %v1068_v61, 0.0 }
 0x18d   : > { %v5707_v16 = vpop.eup %5706  ;;  %v4937_v21 = vmul.f32 -1.442695, %v1426_v1  ;;  %v4938_v30 = vmul.f32 -1.442695, %v1427_v5  ;;  %v4939_v35 = vmul.f32 -1.442695, %v1428_v6  ;;  %v1040_v60 = vadd.f32 %v1039_v42, %v1038_v17 }
 0x18e   : > { %v5709_v49 = vpop.eup %5708  ;;  %v1487_v38 = vadd.f32 1.0, %v5707_v16  ;;  %v4940_v44 = vmul.f32 -1.442695, %v1429_v40  ;;  %v1356_v5 = vadd.f32 1e-05, %v1352_v9  ;;  %v1261_v6 = vadd.f32 %v1260_v18, %v1259_v4 }
 0x18f   : > { %v1488_v59 = vadd.f32 1.0, %v5709_v49  ;;  %5714 = vpow2.f32 %v4937_v21  ;;  %v5711_v1 = vpop.eup %5710  ;;  %v1042_v40 = vadd.f32 %v1041_v14, %v1040_v60  ;;  %v1113_v23 = vadd.f32 %v1112_v19, %v1111_v0  ;;  %v6851_v9 = vld [vmem:[%s6412_s30] sm:$0xf] }
 0x190   : > { %5716 = vrcp.f32 %v1487_v38  ;;  %v1332_v16 = vsel %vm634_vm1, %v1288_v62, 0.0  ;;  %v1334_v17 = vsel %vm634_vm1, %v1289_v32, 0.0  ;;  %v1263_v21 = vadd.f32 %v1262_v10, %v1261_v6  ;;  %v5713_v38 = vpop.eup %5712 }
 0x191   : > { %5718 = vrcp.f32 %v1488_v59  ;;  %v1333_v49 = vadd.f32 %v1332_v16, %v1331_v52  ;;  %v1043_v42 = vrot.slane %v1042_v40, 4  ;;  %v1115_v53 = vadd.f32 %v1114_v56, %v1113_v23 }
 0x192   : > { %5720 = vpow2.f32 %v4938_v30  ;;  %v1486_v59 = vadd.f32 1.0, %v5711_v1  ;;  %v1264_v61 = vrot.slane %v1263_v21, 4  ;;  %v1143_v14 = vmul.f32 %v5705_v7, %v6767_v26 }
 0x193   : > { %5722 = vpow2.f32 %v4939_v35  ;;  %v1335_v4 = vadd.f32 %v1334_v17, %v1333_v49  ;;  %v1044_v0 = vadd.f32 %v1043_v42, %v1042_v40  ;;  %v1489_v60 = vadd.f32 1.0, %v5713_v38 }
 0x194   : > { %5724 = vpow2.f32 %v4940_v44  ;;  %v1265_v30 = vadd.f32 %v1264_v61, %v1263_v21  ;;  %v1150_v10 = vsub.f32 %v6851_v9, %v6792_v15  ;;  %v1124_v32 = vmul.f32 0.03125, %v6805_v31 }
 0x195   : > { %5726 = vrsqrt.f32 %v1356_v5  ;;  %v1336_v35 = vrot.slane %v1335_v4, 4  ;;  %v1128_v56 = vmul.f32 %v6803_v28, %v6803_v28  ;;  %v1116_v44 = vrot.slane %v1115_v53, 4 }
 0x196   : > { %5728 = vrcp.f32 %v1486_v59  ;;  %v1157_v52 = vrot.slane %v6777_v46, %v6696_v8  ;;  %v1266_v18 = vrot.slane %v1265_v30, 2  ;;  %v1147_v7 = vmul.f32 %v1143_v14, %v6722_v47 }
 0x197   : > { %v1337_v62 = vadd.f32 %v1336_v35, %v1335_v4  ;;  %5730 = vrcp.f32 %v1489_v60  ;;  %v1045_v1 = vrot.slane %v1044_v0, 2  ;;  %v1189_v15 = vrot.slane %v1150_v10, %v6696_v8 }
 0x198   : > { %v1267_v5 = vadd.f32 %v1266_v18, %v1265_v30  ;;  %v1132_v40 = vsub.f32 %v1124_v32, %v1128_v56  ;;  %v1117_v31 = vadd.f32 %v1116_v44, %v1115_v53  ;;  %v1171_v16 = vmul.f32 %v6545_v29, %v1157_v52 }
 0x199   : > { %v1338_v19 = vrot.slane %v1337_v62, 2  ;;  %v1172_v38 = vmul.f32 %v1157_v52, %v6594_v55  ;;  %v1151_v42 = vsub.f32 %v6851_v9, %v1147_v7  ;;  %v6867_v47 = vrot.slane %v1143_v14, %v6696_v8 }
 0x19a   : > { %v1268_v17 = vrot.slane %v1267_v5, 1  ;;  %v1046_v59 = vadd.f32 %v1045_v1, %v1044_v0  ;;  %v1170_v53 = vmul.f32 %v1157_v52, %v6559_v34  ;;  %v1136_v29 = vadd.f32 1e-05, %v1132_v40 }
 0x19b   : > { %v1339_v21 = vadd.f32 %v1338_v19, %v1337_v62  ;;  %v1118_v60 = vrot.slane %v1117_v31, 2  ;;  %v1203_v10 = vadd.f32 %v1189_v15, %v1171_v16  ;;  %v1204_v40 = vadd.f32 %v1189_v15, %v1172_v38 }
 0x19c   : > { %v5715_v6 = vpop.eup %5714  ;;  %v1269_v4 = vadd.f32 %v1268_v17, %v1267_v5  ;;  %v1202_v62 = vadd.f32 %v1189_v15, %v1170_v53  ;;  %v1047_v7 = vrot.slane %v1046_v59, 1 }
 0x19d   : > { %v5717_v23 = vpop.eup %5716  ;;  %v1490_v49 = vadd.f32 1.0, %v5715_v6  ;;  %v1340_v30 = vrot.slane %v1339_v21, 1  ;;  %v1119_v16 = vadd.f32 %v1118_v60, %v1117_v31 }
 0x19e   : > { %v5719_v46 = vpop.eup %5718  ;;  %v6870_v55 = vmul.f32 0.03125, %v1269_v4  ;;  %v6872_v0 = vmul.f32 %v5717_v23, %v1203_v10 }
 0x19f   : > { %v5721_v61 = vpop.eup %5720  ;;  %5732 = vrcp.f32 %v1490_v49  ;;  %v1341_v18 = vadd.f32 %v1340_v30, %v1339_v21  ;;  %v1193_v30 = vrot.slane %v1151_v42, %v6696_v8  ;;  %v6887_v31 = vmul.f32 %v5719_v46, %v1204_v40 }
 0x1a0   : > { %v5723_v35 = vpop.eup %5722  ;;  %v1491_v32 = vadd.f32 1.0, %v5721_v61  ;;  %v1349_v6 = vmul.f32 %v6870_v55, %v6870_v55  ;;  %v1173_v61 = vmul.f32 %v6577_v45, %v1157_v52  ;;  %v1174_v45 = vmul.f32 %v6867_v47, %v6627_v13 }
 0x1a1   : > { %v5725_v56 = vpop.eup %5724  ;;  %v1492_v44 = vadd.f32 1.0, %v5723_v35  ;;  %v1345_v19 = vmul.f32 0.03125, %v1341_v18  ;;  %v1120_v35 = vrot.slane %v1119_v16, 1  ;;  %v1175_v18 = vmul.f32 %v6612_v3, %v6867_v47 }
 0x1a2   : > { %v5727_v14 = vpop.eup %5726  ;;  %5734 = vrcp.f32 %v1491_v32  ;;  %v1493_v1 = vadd.f32 1.0, %v5725_v56  ;;  %v1205_v53 = vadd.f32 %v1189_v15, %v1173_v61  ;;  %v1177_v3 = vmul.f32 %v6641_v27, %v6867_v47 }
 0x1a3   : > { %v5729_v5 = vpop.eup %5728  ;;  %5736 = vrcp.f32 %v1492_v44  ;;  %v1364_v34 = vmul.f32 %v5727_v14, %v6744_v12  ;;  %v1353_v49 = vsub.f32 %v1345_v19, %v1349_v6  ;;  %v1121_v44 = vadd.f32 %v1120_v35, %v1119_v16 }
 0x1a4   : > { %v6877_v17 = vmul.f32 %v5729_v5, %v1202_v62  ;;  %5738 = vrcp.f32 %v1493_v1  ;;  %v5731_v4 = vpop.eup %5730  ;;  %v1209_v61 = vadd.f32 %v1193_v30, %v1177_v3 }
 0x1a5   : > { %v1368_v21 = vmul.f32 %v1364_v34, %v6801_v20  ;;  %v1385_v23 = vrot.slane %v1364_v34, %v6696_v8  ;;  %5740 = vrsqrt.f32 %v1136_v29  ;;  %v1048_v20 = vadd.f32 %v1047_v7, %v1046_v59 }
 0x1a6   : > { %5399 = vmatprep.mubr.msk.f32.mxu0 %vm634_vm1, %v6877_v17  ;;  %5431 = vmatprep.mubr.msk.f32.mxu1 %vm634_vm1, %v6877_v17  ;;  %v1357_v29 = vadd.f32 1e-05, %v1353_v49  ;;  %v6905_v13 = vmul.f32 %v5731_v4, %v1205_v53  ;;  %v1207_v34 = vadd.f32 %v1193_v30, %v1175_v18 }
 0x1a7   : > { %v1372_v38 = vsub.f32 %v6754_v43, %v1368_v21  ;;  %5400 = vmatmul.mubr.msk.f32.vlgmr.msra.gmra.mxu0 %vm634_vm1, %v6872_v0  ;;  %v1398_v52 = vmul.f32 %v1385_v23, %v6691_v2  ;;  %v1399_v42 = vmul.f32 %v6685_v48, %v1385_v23  ;;  %5432 = vmatmul.mubr.msk.f32.vlgmr.msra.gmra.mxu1 %vm634_vm1, %v6872_v0  ;;  %v1125_v21 = vmul.f32 0.03125, %v1121_v44 }
 0x1a8   : > { %5402 = vmatprep.mubr.msk.f32.mxu0 %vm634_vm1, %v6887_v31  ;;  %v1400_v46 = vmul.f32 %v1385_v23, %v6728_v54  ;;  %v1401_v59 = vmul.f32 %v6708_v24, %v1385_v23  ;;  %5434 = vmatprep.mubr.msk.f32.mxu1 %vm634_vm1, %v6887_v31  ;;  %5742 = vrsqrt.f32 %v1357_v29  ;;  %v1206_v48 = vadd.f32 %v1193_v30, %v1174_v45 }
 0x1a9   : > { %v1417_v15 = vrot.slane %v1372_v38, %v6696_v8  ;;  %v1176_v24 = vmul.f32 %v6867_v47, %v6654_v51  ;;  %v6911_v54 = vmul.f32 0.03125, %v1048_v20 }
 0x1ab   : > { %v1430_v2 = vadd.f32 %v1417_v15, %v1398_v52  ;;  %v1431_v60 = vadd.f32 %v1417_v15, %v1399_v42  ;;  %v1432_v10 = vadd.f32 %v1417_v15, %v1400_v46  ;;  %v1433_v32 = vadd.f32 %v1417_v15, %v1401_v59  ;;  %5403 = vmatmul.mubr.msk.f32.gmra.mxu0 %vm634_vm1, %v6905_v13 }
 0x1ac   : > { %v5733_v56 = vpop.eup %5732  ;;  %5435 = vmatmul.mubr.msk.f32.gmra.mxu1 %vm634_vm1, %v6905_v13  ;;  %v1208_v6 = vadd.f32 %v1193_v30, %v1176_v24  ;;  %v1129_v23 = vmul.f32 %v6911_v54, %v6911_v54 }
 0x1ad   : > { %v4941_v62 = vmul.f32 -1.442695, %v1430_v2  ;;  %v4942_v14 = vmul.f32 -1.442695, %v1431_v60  ;;  %v4943_v7 = vmul.f32 -1.442695, %v1432_v10  ;;  %v6917_v1 = vmul.f32 %v5733_v56, %v1206_v48 }
 0x1ae   : > { %v4944_v5 = vmul.f32 -1.442695, %v1433_v32  ;;  %v1133_v47 = vsub.f32 %v1125_v21, %v1129_v23 }
 0x1af   : > { %v5735_v19 = vpop.eup %5734  ;;  %5744 = vpow2.f32 %v4941_v62  ;;  %5405 = vmatprep.mubr.msk.f32.mxu0 %vm634_vm1, %v6917_v1  ;;  %5437 = vmatprep.mubr.msk.f32.mxu1 %vm634_vm1, %v6917_v1 }
 0x1b0   : > { %v5737_v51 = vpop.eup %5736  ;;  %5746 = vpow2.f32 %v4942_v14  ;;  %v6923_v40 = vmul.f32 %v5735_v19, %v1207_v34  ;;  %v1137_v30 = vadd.f32 1e-05, %v1133_v47 }
 0x1b1   : > { %v5739_v16 = vpop.eup %5738  ;;  %5748 = vpow2.f32 %v4943_v7  ;;  %v6929_v49 = vmul.f32 %v5737_v51, %v1208_v6 }
 0x1b2   : > { %5750 = vpow2.f32 %v4944_v5  ;;  %5406 = vmatmul.mubr.msk.f32.gmra.mxu0 %vm634_vm1, %v6923_v40  ;;  %5438 = vmatmul.mubr.msk.f32.gmra.mxu1 %vm634_vm1, %v6923_v40  ;;  %v5741_v4 = vpop.eup %5740  ;;  %v6939_v27 = vmul.f32 %v5739_v16, %v1209_v61 }
 0x1b3   : > { %5408 = vmatprep.mubr.msk.f32.mxu0 %vm634_vm1, %v6929_v49  ;;  %5440 = vmatprep.mubr.msk.f32.mxu1 %vm634_vm1, %v6929_v49  ;;  %v1144_v52 = vmul.f32 %v5741_v4, %v6767_v26  ;;  %5752 = vrsqrt.f32 %v1137_v30 }
 0x1b5   : > { %v5743_v38 = vpop.eup %5742  ;;  %v1148_v32 = vmul.f32 %v1144_v52, %v6803_v28  ;;  %v1165_v7 = vrot.slane %v1144_v52, %v6696_v8 }
 0x1b6   : > { %5409 = vmatmul.mubr.msk.f32.gmra.mxu0 %vm634_vm1, %v6939_v27  ;;  %5441 = vmatmul.mubr.msk.f32.gmra.mxu1 %vm634_vm1, %v6939_v27  ;;  %v1365_v20 = vmul.f32 %v5743_v38, %v6744_v12 }
 0x1b7   : > { %v1178_v5 = vmul.f32 %v1165_v7, %v6689_v58  ;;  %v1179_v51 = vmul.f32 %v6679_v36, %v1165_v7  ;;  %v1180_v3 = vmul.f32 %v1165_v7, %v6716_v41  ;;  %v1181_v36 = vmul.f32 %v6698_v11, %v1165_v7 }
 0x1b8   : > { %v1369_v53 = vmul.f32 %v1365_v20, %v6870_v55  ;;  %v1389_v45 = vrot.slane %v1365_v20, %v6696_v8 }
 0x1ba   : > { %v1373_v35 = vsub.f32 %v6754_v43, %v1369_v53  ;;  %v1402_v46 = vmul.f32 %v1389_v45, %v6797_v22  ;;  %v1403_v59 = vmul.f32 %v6774_v50, %v1389_v45  ;;  %v1404_v12 = vmul.f32 %v1389_v45, %v6837_v33 }
 0x1bb   : > { %v1405_v2 = vmul.f32 %v6823_v63, %v1389_v45  ;;  %v1152_v63 = vsub.f32 %v6851_v9, %v1148_v32 }
 0x1bc   : > { %v5745_v42 = vpop.eup %5744  ;;  %v1421_v55 = vrot.slane %v1373_v35, %v6696_v8 }
 0x1bd   : > { %v5747_v29 = vpop.eup %5746  ;;  %v1494_v15 = vadd.f32 1.0, %v5745_v42  ;;  %v1197_v28 = vrot.slane %v1152_v63, %v6696_v8 }
 0x1be   : > { %v5749_v48 = vpop.eup %5748  ;;  %v1495_v60 = vadd.f32 1.0, %v5747_v29  ;;  %v1434_v43 = vadd.f32 %v1421_v55, %v1402_v46  ;;  %v1435_v24 = vadd.f32 %v1421_v55, %v1403_v59  ;;  %v1436_v44 = vadd.f32 %v1421_v55, %v1404_v12 }
 0x1bf   : > { %v5751_v10 = vpop.eup %5750  ;;  %v1496_v56 = vadd.f32 1.0, %v5749_v48  ;;  %5754 = vrcp.f32 %v1494_v15  ;;  %v1437_v22 = vadd.f32 %v1421_v55, %v1405_v2  ;;  %v1210_v19 = vadd.f32 %v1197_v28, %v1178_v5 }
 0x1c0   : > { %v1497_v50 = vadd.f32 1.0, %v5751_v10  ;;  %v4945_v18 = vmul.f32 -1.442695, %v1434_v43  ;;  %v4946_v62 = vmul.f32 -1.442695, %v1435_v24  ;;  %v5753_v34 = vpop.eup %5752  ;;  %v1211_v23 = vadd.f32 %v1197_v28, %v1179_v51 }
 0x1c1   : > { %5756 = vrcp.f32 %v1496_v56  ;;  %v4947_v14 = vmul.f32 -1.442695, %v1436_v44  ;;  %v4948_v33 = vmul.f32 -1.442695, %v1437_v22  ;;  %v1212_v4 = vadd.f32 %v1197_v28, %v1180_v3 }
 0x1c2   : > { %5758 = vrcp.f32 %v1495_v60  ;;  %v1145_v47 = vmul.f32 %v5753_v34, %v6767_v26  ;;  %v1213_v53 = vadd.f32 %v1197_v28, %v1181_v36 }
 0x1c3   : > { %5760 = vrcp.f32 %v1497_v50 }
 0x1c4   : > { %5762 = vpow2.f32 %v4945_v18  ;;  %v1149_v42 = vmul.f32 %v1145_v47, %v6911_v54  ;;  %v1169_v15 = vrot.slane %v1145_v47, %v6696_v8 }
 0x1c5   : > { %5764 = vpow2.f32 %v4946_v62 }
 0x1c6   : > { %5766 = vpow2.f32 %v4947_v14  ;;  %v1153_v59 = vsub.f32 %v6851_v9, %v1149_v42  ;;  %v1182_v48 = vmul.f32 %v1169_v15, %v6781_v57  ;;  %v1183_v12 = vmul.f32 %v6770_v37, %v1169_v15 }
 0x1c7   : > { %5768 = vpow2.f32 %v4948_v33  ;;  %v1184_v2 = vmul.f32 %v1169_v15, %v6832_v25  ;;  %v1185_v22 = vmul.f32 %v6815_v39, %v1169_v15 }
 0x1c8   : > { %v1201_v54 = vrot.slane %v1153_v59, %v6696_v8 }
 0x1ca   : > { %v1214_v55 = vadd.f32 %v1201_v54, %v1182_v48  ;;  %v1215_v10 = vadd.f32 %v1201_v54, %v1183_v12  ;;  %v1216_v56 = vadd.f32 %v1201_v54, %v1184_v2  ;;  %v1217_v37 = vadd.f32 %v1201_v54, %v1185_v22 }
 0x1cc   : > { %v5755_v6 = vpop.eup %5754 }
 0x1cd   : > { %v6962_v16 = vmul.f32 %v5755_v6, %v1210_v19 }
 0x1ce   : > { %v5757_v21 = vpop.eup %5756 }
 0x1cf   : > { %8640 = vst [vmem:[#allocation17_spill] sm:$0xff] %v6962_v16  ;;  %v5759_v61 = vpop.eup %5758  ;;  %5411 = vmatprep.mubr.msk.f32.mxu0 %vm634_vm1, %v6962_v16  ;;  %5443 = vmatprep.mubr.msk.f32.mxu1 %vm634_vm1, %v6962_v16  ;;  %v6972_v20 = vmul.f32 %v5757_v21, %v1212_v4 }
 0x1d0   : > { %v5761_v58 = vpop.eup %5760  ;;  %v6969_v38 = vmul.f32 %v5759_v61, %v1211_v23 }
 0x1d1   : > { %v5763_v41 = vpop.eup %5762  ;;  %8642 = vst [vmem:[#allocation19_spill] sm:$0xff] %v6972_v20  ;;  %v6983_v29 = vmul.f32 %v5761_v58, %v1213_v53 }
 0x1d2   : > { %8641 = vst [vmem:[#allocation18_spill] sm:$0xff] %v6969_v38  ;;  %v5765_v30 = vpop.eup %5764  ;;  %5412 = vmatmul.mubr.msk.f32.gmra.mxu0 %vm634_vm1, %v6969_v38  ;;  %5444 = vmatmul.mubr.msk.f32.gmra.mxu1 %vm634_vm1, %v6969_v38  ;;  %v1498_v45 = vadd.f32 1.0, %v5763_v41 }
 0x1d3   : > { %v5767_v52 = vpop.eup %5766  ;;  %5414 = vmatprep.mubr.msk.f32.mxu0 %vm634_vm1, %v6972_v20  ;;  %5446 = vmatprep.mubr.msk.f32.mxu1 %vm634_vm1, %v6972_v20  ;;  %v1499_v11 = vadd.f32 1.0, %v5765_v30  ;;  %8643 = vst [vmem:[#allocation20_spill] sm:$0xff] %v6983_v29 }
 0x1d4   : > { %v5769_v26 = vpop.eup %5768  ;;  %v1500_v35 = vadd.f32 1.0, %v5767_v52  ;;  %5770 = vrcp.f32 %v1498_v45 }
 0x1d5   : > { %5772 = vrcp.f32 %v1499_v11  ;;  %v1501_v46 = vadd.f32 1.0, %v5769_v26 }
 0x1d6   : > { %5774 = vrcp.f32 %v1500_v35  ;;  %5415 = vmatmul.mubr.msk.f32.gmra.mxu0 %vm634_vm1, %v6983_v29  ;;  %5447 = vmatmul.mubr.msk.f32.gmra.mxu1 %vm634_vm1, %v6983_v29 }
 0x1d7   : > { %5776 = vrcp.f32 %v1501_v46 }
 0x1e1   : > { %v5771_v60 = vpop.eup %5770 }
 0x1e2   : > { %v5773_v32 = vpop.eup %5772  ;;  %v6995_v43 = vmul.f32 %v5771_v60, %v1214_v55  ;;  %v621_v55 = vld [vmem:[%s6435_s11 + $0x18] sm:$0xff] }
 0x1e3   : > { %v5775_v24 = vpop.eup %5774  ;;  %v6997_v44 = vmul.f32 %v5773_v32, %v1215_v10  ;;  %v613_v60 = vld [vmem:[%s6430_s22 + $0x18] sm:$0xff]  ;;  %5487 = vmatprep.subr.msk.mxu1 %vm634_vm1, %v621_v55 }
 0x1e4   : > { %8644 = vst [vmem:[#allocation21_spill] sm:$0xff] %v6995_v43  ;;  %v5777_v50 = vpop.eup %5776  ;;  %5417 = vmatprep.mubr.msk.f32.mxu0 %vm634_vm1, %v6995_v43  ;;  %5449 = vmatprep.mubr.msk.f32.mxu1 %vm634_vm1, %v6995_v43  ;;  %v7004_v8 = vmul.f32 %v5775_v24, %v1216_v56 }
 0x1e5   : > { %8645 = vst [vmem:[#allocation22_spill] sm:$0xff] %v6997_v44  ;;  %5418 = vmatmul.mubr.msk.f32.gmra.mxu0 %vm634_vm1, %v6997_v44  ;;  %5450 = vmatmul.mubr.msk.f32.gmra.mxu1 %vm634_vm1, %v6997_v44  ;;  %v7014_v57 = vmul.f32 %v5777_v50, %v1217_v37 }
 0x1e6   : > { %8646 = vst [vmem:[#allocation23_spill] sm:$0xff] %v7004_v8  ;;  %5420 = vmatprep.mubr.msk.f32.mxu0 %vm634_vm1, %v7004_v8  ;;  %5452 = vmatprep.mubr.msk.f32.mxu1 %vm634_vm1, %v7004_v8 }
 0x1e7   : > { %8647 = vst [vmem:[#allocation24_spill] sm:$0xff] %v7014_v57  ;;  %5455 = vmatprep.subr.msk.mxu0 %vm634_vm1, %v613_v60  ;;  %5488 = vmatpush3.xpose.msk.msra.mxu1 %vm634_vm1, %v621_v55 }
 0x1e8   : > { %5456 = vmatpush3.xpose.msk.msra.mxu0 %vm634_vm1, %v613_v60  ;;  %v619_v60 = vld [vmem:[%s6435_s11 + $0x8] sm:$0xff] }
 0x1e9   : > { %5421 = vmatmul.mubr.msk.f32.gmra.mxu0 %vm634_vm1, %v7014_v57  ;;  %5453 = vmatmul.mubr.msk.f32.gmra.mxu1 %vm634_vm1, %v7014_v57 }
 0x267   : > { %v7020_v39 = vpop.f32.mrf.mxu0  ;;  %v7024_v18 = vpop.f32.mrf.mxu1 }
 0x268   : > { %v1979_v25 = vmul.f32 %v7020_v39, %v7020_v39  ;;  %v2199_v62 = vmul.f32 %v7024_v18, %v7024_v18  ;;  %v1923_v19 = vsel %vm634_vm1, %v7020_v39, 0.0  ;;  %v2143_v51 = vsel %vm634_vm1, %v7024_v18, 0.0 }
 0x269   : > { %v7028_v14 = vpop.f32.mrf.mxu0  ;;  %v7034_v7 = vpop.f32.mrf.mxu1 }
 0x26a   : > { %v1922_v63 = vsel %vm634_vm1, %v7028_v14, 0.0  ;;  %v1978_v33 = vmul.f32 %v7028_v14, %v7028_v14  ;;  %v2142_v28 = vsel %vm634_vm1, %v7034_v7, 0.0  ;;  %v2198_v5 = vmul.f32 %v7034_v7, %v7034_v7 }
 0x26b   : > { %v7040_v34 = vpop.f32.mrf.mxu0  ;;  %v1995_v6 = vsel %vm634_vm1, %v1979_v25, 0.0  ;;  %v2215_v23 = vsel %vm634_vm1, %v2199_v62, 0.0  ;;  %v1924_v61 = vadd.f32 %v1923_v19, %v1922_v63  ;;  %v2144_v4 = vadd.f32 %v2143_v51, %v2142_v28 }
 0x26c   : > { %v1994_v3 = vsel %vm634_vm1, %v1978_v33, 0.0  ;;  %v7048_v21 = vpop.f32.mrf.mxu1  ;;  %v2214_v58 = vsel %vm634_vm1, %v2198_v5, 0.0  ;;  %v1981_v41 = vmul.f32 %v7040_v34, %v7040_v34  ;;  %v1927_v46 = vsel %vm634_vm1, %v7040_v34, 0.0 }
 0x26d   : > { %v7052_v47 = vpop.f32.mrf.mxu0  ;;  %v1996_v36 = vadd.f32 %v1995_v6, %v1994_v3  ;;  %v2201_v52 = vmul.f32 %v7048_v21, %v7048_v21  ;;  %v2216_v35 = vadd.f32 %v2215_v23, %v2214_v58  ;;  %v2147_v54 = vsel %vm634_vm1, %v7048_v21, 0.0 }
 0x26e   : > { %v1925_v30 = vsel %vm634_vm1, %v7052_v47, 0.0  ;;  %v1980_v53 = vmul.f32 %v7052_v47, %v7052_v47  ;;  %v7060_v45 = vpop.f32.mrf.mxu1  ;;  %v1999_v10 = vsel %vm634_vm1, %v1981_v41, 0.0 }
 0x26f   : > { %v1926_v11 = vadd.f32 %v1925_v30, %v1924_v61  ;;  %v2145_v26 = vsel %vm634_vm1, %v7060_v45, 0.0  ;;  %v2200_v42 = vmul.f32 %v7060_v45, %v7060_v45  ;;  %v2219_v50 = vsel %vm634_vm1, %v2201_v52, 0.0  ;;  %v620_v61 = vld [vmem:[%s6435_s11 + $0x10] sm:$0xff] }
 0x270   : > { %v1997_v59 = vsel %vm634_vm1, %v1980_v53, 0.0  ;;  %v2146_v15 = vadd.f32 %v2145_v26, %v2144_v4  ;;  %v612_v4 = vld [vmem:[%s6430_s22 + $0x10] sm:$0xff]  ;;  %5489 = vmatprep.subr.msk.mxu1 %vm634_vm1, %v620_v61 }
 0x271   : > { %v1928_v48 = vadd.f32 %v1927_v46, %v1926_v11  ;;  %v1998_v12 = vadd.f32 %v1997_v59, %v1996_v36  ;;  %v2217_v2 = vsel %vm634_vm1, %v2200_v42, 0.0  ;;  %5457 = vmatprep.subr.msk.mxu0 %vm634_vm1, %v612_v4  ;;  %5490 = vmatpush3.xpose.msk.msra.mxu1 %vm634_vm1, %v620_v61 }
 0x272   : > { %v2148_v32 = vadd.f32 %v2147_v54, %v2146_v15  ;;  %v2218_v56 = vadd.f32 %v2217_v2, %v2216_v35  ;;  %v7077_v24 = vpop.f32.mrf.mxu0  ;;  %v7079_v22 = vpop.f32.mrf.mxu1  ;;  %5458 = vmatpush3.xpose.msk.msra.mxu0 %vm634_vm1, %v612_v4  ;;  %5491 = vmatprep.subr.msk.mxu1 %vm634_vm1, %v619_v60 }
 0x273   : > { %v1929_v37 = vrot.slane %v1928_v48, 4  ;;  %v2000_v25 = vadd.f32 %v1999_v10, %v1998_v12  ;;  %v1983_v62 = vmul.f32 %v7077_v24, %v7077_v24  ;;  %v2203_v28 = vmul.f32 %v7079_v22, %v7079_v22  ;;  %v611_v10 = vld [vmem:[%s6430_s22 + $0x8] sm:$0xff] }
 0x274   : > { %v2149_v63 = vrot.slane %v2148_v32, 4  ;;  %v2220_v33 = vadd.f32 %v2219_v50, %v2218_v56  ;;  %v7090_v5 = vpop.f32.mrf.mxu0  ;;  %v7092_v19 = vpop.f32.mrf.mxu1  ;;  %v1936_v3 = vsel %vm634_vm1, %v7077_v24, 0.0  ;;  %v2156_v23 = vsel %vm634_vm1, %v7079_v22, 0.0  ;;  %5459 = vmatprep.subr.msk.mxu0 %vm634_vm1, %v611_v10 }
 0x275   : > { %v1930_v6 = vadd.f32 %v1929_v37, %v1928_v48  ;;  %v2001_v51 = vrot.slane %v2000_v25, 4  ;;  %v2008_v41 = vsel %vm634_vm1, %v1983_v62, 0.0  ;;  %v1935_v30 = vsel %vm634_vm1, %v7090_v5, 0.0  ;;  %5492 = vmatpush3.xpose.msk.msra.mxu1 %vm634_vm1, %v619_v60 }
 0x276   : > { %v2150_v58 = vadd.f32 %v2149_v63, %v2148_v32  ;;  %v2221_v36 = vrot.slane %v2220_v33, 4  ;;  %v7103_v53 = vpop.f32.mrf.mxu0  ;;  %v1982_v26 = vmul.f32 %v7090_v5, %v7090_v5  ;;  %v2155_v42 = vsel %vm634_vm1, %v7092_v19, 0.0  ;;  %v7116_v54 = vpop.f32.mrf.mxu1  ;;  %5460 = vmatpush3.xpose.msk.msra.mxu0 %vm634_vm1, %v611_v10 }
 0x277   : > { %v1931_v52 = vrot.slane %v1930_v6, 2  ;;  %v2002_v11 = vadd.f32 %v2001_v51, %v2000_v25  ;;  %v2228_v59 = vsel %vm634_vm1, %v2203_v28, 0.0  ;;  %v2202_v15 = vmul.f32 %v7092_v19, %v7092_v19 }
 0x278   : > { %v2151_v35 = vrot.slane %v2150_v58, 2  ;;  %v2222_v46 = vadd.f32 %v2221_v36, %v2220_v33  ;;  %v1937_v2 = vadd.f32 %v1936_v3, %v1935_v30  ;;  %v2007_v55 = vsel %vm634_vm1, %v1982_v26, 0.0  ;;  %v7122_v25 = vpop.f32.mrf.mxu0  ;;  %v7132_v61 = vpop.f32.mrf.mxu1  ;;  %v618_v30 = vld [vmem:[%s6435_s11] sm:$0xff] }
 0x279   : > { %v1932_v48 = vadd.f32 %v1931_v52, %v1930_v6  ;;  %v2003_v12 = vrot.slane %v2002_v11, 2  ;;  %v2157_v50 = vadd.f32 %v2156_v23, %v2155_v42  ;;  %v2227_v37 = vsel %vm634_vm1, %v2202_v15, 0.0  ;;  %v610_v52 = vld [vmem:[%s6430_s22] sm:$0xff]  ;;  %5493 = vmatprep.subr.msk.mxu1 %vm634_vm1, %v618_v30 }
 0x27a   : > { %v2152_v32 = vadd.f32 %v2151_v35, %v2150_v58  ;;  %v2223_v56 = vrot.slane %v2222_v46, 2  ;;  %v2009_v33 = vadd.f32 %v2008_v41, %v2007_v55  ;;  %v1940_v28 = vsel %vm634_vm1, %v7103_v53, 0.0  ;;  %5461 = vmatprep.subr.msk.mxu0 %vm634_vm1, %v610_v52  ;;  %5494 = vmatpush3.xpose.msk.msra.mxu1 %vm634_vm1, %v618_v30 }
 0x27b   : > { %v1933_v62 = vrot.slane %v1932_v48, 1  ;;  %v2004_v63 = vadd.f32 %v2003_v12, %v2002_v11  ;;  %v2229_v3 = vadd.f32 %v2228_v59, %v2227_v37  ;;  %v1985_v23 = vmul.f32 %v7103_v53, %v7103_v53  ;;  %5462 = vmatpush3.xpose.msk.msra.mxu0 %vm634_vm1, %v610_v52 }
 0x27c   : > { %v2153_v6 = vrot.slane %v2152_v32, 1  ;;  %v2224_v51 = vadd.f32 %v2223_v56, %v2222_v46  ;;  %v2160_v36 = vsel %vm634_vm1, %v7116_v54, 0.0  ;;  %v1938_v41 = vsel %vm634_vm1, %v7122_v25, 0.0 }
 0x27d   : > { %v1934_v4 = vadd.f32 %v1933_v62, %v1932_v48  ;;  %v2005_v58 = vrot.slane %v2004_v63, 1  ;;  %v2205_v42 = vmul.f32 %v7116_v54, %v7116_v54  ;;  %v1939_v35 = vadd.f32 %v1938_v41, %v1937_v2 }
 0x27e   : > { %v2154_v11 = vadd.f32 %v2153_v6, %v2152_v32  ;;  %v2225_v26 = vrot.slane %v2224_v51, 1  ;;  %v1984_v15 = vmul.f32 %v7122_v25, %v7122_v25  ;;  %v2158_v48 = vsel %vm634_vm1, %v7132_v61, 0.0 }
 0x27f   : > { %v7144_v46 = vmul.f32 0.03125, %v1934_v4  ;;  %v2006_v59 = vadd.f32 %v2005_v58, %v2004_v63  ;;  %v1941_v55 = vadd.f32 %v1940_v28, %v1939_v35  ;;  %v2159_v60 = vadd.f32 %v2158_v48, %v2157_v50 }
 0x280   : > { %v7152_v12 = vmul.f32 0.03125, %v2154_v11  ;;  %v2226_v2 = vadd.f32 %v2225_v26, %v2224_v51  ;;  %v2010_v56 = vsel %vm634_vm1, %v1984_v15, 0.0  ;;  %v2204_v37 = vmul.f32 %v7132_v61, %v7132_v61 }
 0x281   : > { %v2046_v10 = vmul.f32 0.03125, %v2006_v59  ;;  %v2050_v32 = vmul.f32 %v7144_v46, %v7144_v46  ;;  %v1942_v6 = vrot.slane %v1941_v55, 4  ;;  %v2011_v4 = vadd.f32 %v2010_v56, %v2009_v33 }
 0x282   : > { %v2266_v62 = vmul.f32 0.03125, %v2226_v2  ;;  %v2270_v63 = vmul.f32 %v7152_v12, %v7152_v12  ;;  %v2012_v51 = vsel %vm634_vm1, %v1985_v23, 0.0  ;;  %v2161_v28 = vadd.f32 %v2160_v36, %v2159_v60 }
 0x283   : > { %v2054_v58 = vsub.f32 %v2046_v10, %v2050_v32  ;;  %v2230_v50 = vsel %vm634_vm1, %v2204_v37, 0.0  ;;  %v1943_v30 = vadd.f32 %v1942_v6, %v1941_v55  ;;  %v2013_v52 = vadd.f32 %v2012_v51, %v2011_v4 }
 0x284   : > { %v2274_v41 = vsub.f32 %v2266_v62, %v2270_v63  ;;  %v2231_v11 = vadd.f32 %v2230_v50, %v2229_v3  ;;  %v2232_v26 = vsel %vm634_vm1, %v2205_v42, 0.0  ;;  %v2162_v35 = vrot.slane %v2161_v28, 4 }
 0x285   : > { %v1944_v15 = vrot.slane %v1943_v30, 2  ;;  %v2014_v48 = vrot.slane %v2013_v52, 4  ;;  %v2058_v57 = vadd.f32 1e-05, %v2054_v58 }
 0x286   : > { %v2278_v59 = vadd.f32 1e-05, %v2274_v41  ;;  %v2233_v2 = vadd.f32 %v2232_v26, %v2231_v11  ;;  %v2163_v8 = vadd.f32 %v2162_v35, %v2161_v28  ;;  %v8649_v26 = vld [vmem:[#allocation16_spill] sm:$0xff] }
 0x287   : > { %v1945_v33 = vadd.f32 %v1944_v15, %v1943_v30  ;;  %v2015_v10 = vadd.f32 %v2014_v48, %v2013_v52  ;;  %v7177_v35 = vsub.s32 1, %v8649_v26 }
 0x288   : > { %5778 = vrsqrt.f32 %v2278_v59  ;;  %v2234_v23 = vrot.slane %v2233_v2, 4  ;;  %v2164_v36 = vrot.slane %v2163_v8, 2 }
 0x289   : > { %v1946_v60 = vrot.slane %v1945_v33, 1  ;;  %v2016_v32 = vrot.slane %v2015_v10, 2  ;;  %5780 = vrsqrt.f32 %v2058_v57 }
 0x28a   : > { %v2235_v56 = vadd.f32 %v2234_v23, %v2233_v2  ;;  %v2165_v55 = vadd.f32 %v2164_v36, %v2163_v8 }
 0x28b   : > { %v1947_v3 = vadd.f32 %v1946_v60, %v1945_v33  ;;  %v2017_v37 = vadd.f32 %v2016_v32, %v2015_v10  ;;  %v7182_v33 = vld [vmem:[%s6406_s21] sm:$0xf] }
 0x28c   : > { %v2236_v42 = vrot.slane %v2235_v56, 2  ;;  %v2166_v62 = vrot.slane %v2165_v55, 1 }
 0x28d   : > { %v7164_v63 = vmul.f32 0.03125, %v1947_v3  ;;  %v2018_v6 = vrot.slane %v2017_v37, 1 }
 0x28e   : > { %v2237_v4 = vadd.f32 %v2236_v42, %v2235_v56  ;;  %v2167_v58 = vadd.f32 %v2166_v62, %v2165_v55 }
 0x28f   : > { %v2019_v51 = vadd.f32 %v2018_v6, %v2017_v37  ;;  %v2051_v50 = vmul.f32 %v7164_v63, %v7164_v63 }
 0x290   : > { %v2238_v28 = vrot.slane %v2237_v4, 1  ;;  %v7168_v41 = vmul.f32 0.03125, %v2167_v58 }
 0x291   : > { %v2047_v30 = vmul.f32 0.03125, %v2019_v51 }
 0x292   : > { %v2239_v57 = vadd.f32 %v2238_v28, %v2237_v4  ;;  %v7170_v8 = vpop.f32.mrf.mxu0  ;;  %v2271_v52 = vmul.f32 %v7168_v41, %v7168_v41  ;;  %v7174_v11 = vpop.f32.mrf.mxu1  ;;  %v7198_v4 = vld [vmem:[%s6414_s20] sm:$0xf] }
 0x293   : > { %8648 = vst [vmem:[#allocation25_spill] sm:$0xff] %v7170_v8  ;;  %v2055_v2 = vsub.f32 %v2047_v30, %v2051_v50  ;;  %v1987_v62 = vmul.f32 %v7170_v8, %v7170_v8  ;;  %v2207_v6 = vmul.f32 %v7174_v11, %v7174_v11  ;;  %v1949_v51 = vsel %vm634_vm1, %v7170_v8, 0.0  ;;  %v7208_v50 = vld [vmem:[%s6440_s26] sm:$0xf] }
 0x294   : > { %v2267_v59 = vmul.f32 0.03125, %v2239_v57  ;;  %v7179_v15 = vpop.f32.mrf.mxu0  ;;  %v7187_v60 = vpop.f32.mrf.mxu1 }
 0x295   : > { %8650 = vst [vmem:[#allocation26_spill] sm:$0xff] %v7179_v15  ;;  %v5779_v48 = vpop.eup %5778  ;;  %v1986_v36 = vmul.f32 %v7179_v15, %v7179_v15  ;;  %v2059_v42 = vadd.f32 1e-05, %v2055_v2  ;;  %v1948_v28 = vsel %vm634_vm1, %v7179_v15, 0.0 }
 0x296   : > { %v2286_v10 = vmul.f32 %v7182_v33, %v5779_v48  ;;  %v2275_v23 = vsub.f32 %v2267_v59, %v2271_v52  ;;  %v5781_v32 = vpop.eup %5780  ;;  %v7191_v37 = vpop.f32.mrf.mxu0 }
 0x297   : > { %8651 = vst [vmem:[#allocation27_spill] sm:$0xff] %v7191_v37  ;;  %v7211_v30 = vmul.f32 %v7208_v50, %v5781_v32  ;;  %v2020_v52 = vsel %vm634_vm1, %v1986_v36, 0.0  ;;  %v7215_v59 = vpop.f32.mrf.mxu1  ;;  %v2241_v32 = vsel %vm634_vm1, %v2207_v6, 0.0  ;;  %v1950_v36 = vadd.f32 %v1949_v51, %v1948_v28 }
 0x298   : > { %v2290_v56 = vmul.f32 %v2286_v10, %v7152_v12  ;;  %v2301_v55 = vrot.slane %v2286_v10, %v7177_v35  ;;  %v2279_v3 = vadd.f32 1e-05, %v2275_v23  ;;  %v2169_v12 = vsel %vm634_vm1, %v7174_v11, 0.0 }
 0x299   : > { %v2168_v10 = vsel %vm634_vm1, %v7187_v60, 0.0  ;;  %v2206_v23 = vmul.f32 %v7187_v60, %v7187_v60  ;;  %v7232_v20 = vpop.f32.mrf.mxu1  ;;  %v1953_v6 = vsel %vm634_vm1, %v7191_v37, 0.0 }
 0x29a   : > { %v2294_v58 = vsub.f32 %v7198_v4, %v2290_v56  ;;  %v2315_v57 = vmul.f32 %v7024_v18, %v2301_v55  ;;  %5782 = vrsqrt.f32 %v2279_v3  ;;  %v2316_v48 = vmul.f32 %v2301_v55, %v7060_v45  ;;  %v7223_v56 = vpop.f32.mrf.mxu0 }
 0x29b   : > { %8652 = vst [vmem:[#allocation28_spill] sm:$0xff] %v7223_v56  ;;  %5784 = vrsqrt.f32 %v2059_v42  ;;  %v2021_v18 = vsel %vm634_vm1, %v1987_v62, 0.0  ;;  %v2314_v3 = vmul.f32 %v2301_v55, %v7034_v7  ;;  %v2170_v43 = vadd.f32 %v2169_v12, %v2168_v10 }
 0x29c   : > { %v2333_v2 = vrot.slane %v2294_v58, %v7177_v35  ;;  %v2022_v44 = vadd.f32 %v2021_v18, %v2020_v52  ;;  %v2317_v58 = vmul.f32 %v7048_v21, %v2301_v55  ;;  %v2240_v29 = vsel %vm634_vm1, %v2206_v23, 0.0 }
 0x29d   : > { %v1951_v38 = vsel %vm634_vm1, %v7223_v56, 0.0  ;;  %v1989_v7 = vmul.f32 %v7191_v37, %v7191_v37  ;;  %v2173_v21 = vsel %vm634_vm1, %v7215_v59, 0.0  ;;  %v1988_v12 = vmul.f32 %v7223_v56, %v7223_v56 }
 0x29e   : > { %v2347_v26 = vadd.f32 %v2333_v2, %v2315_v57  ;;  %v2348_v45 = vadd.f32 %v2333_v2, %v2316_v48  ;;  %v2346_v51 = vadd.f32 %v2333_v2, %v2314_v3  ;;  %v1952_v55 = vadd.f32 %v1951_v38, %v1950_v36 }
 0x29f   : > { %v2242_v28 = vadd.f32 %v2241_v32, %v2240_v29  ;;  %v2209_v57 = vmul.f32 %v7215_v59, %v7215_v59  ;;  %v2208_v52 = vmul.f32 %v7232_v20, %v7232_v20  ;;  %v2023_v10 = vsel %vm634_vm1, %v1988_v12, 0.0 }
 0x2a0   : > { %v4994_v42 = vmul.f32 -1.442695, %v2347_v26  ;;  %v4995_v62 = vmul.f32 -1.442695, %v2348_v45  ;;  %v2171_v26 = vsel %vm634_vm1, %v7232_v20, 0.0  ;;  %v1954_v48 = vadd.f32 %v1953_v6, %v1952_v55 }
 0x2a1   : > { %v2172_v23 = vadd.f32 %v2171_v26, %v2170_v43  ;;  %v2349_v18 = vadd.f32 %v2333_v2, %v2317_v58  ;;  %v2024_v38 = vadd.f32 %v2023_v10, %v2022_v44  ;;  %v2243_v36 = vsel %vm634_vm1, %v2208_v52, 0.0 }
 0x2a2   : > { %5786 = vpow2.f32 %v4994_v42  ;;  %v2025_v29 = vsel %vm634_vm1, %v1989_v7, 0.0  ;;  %v1955_v32 = vrot.slane %v1954_v48, 4  ;;  %v2244_v45 = vadd.f32 %v2243_v36, %v2242_v28 }
 0x2a3   : > { %5788 = vpow2.f32 %v4995_v62  ;;  %v2174_v3 = vadd.f32 %v2173_v21, %v2172_v23  ;;  %v2245_v16 = vsel %vm634_vm1, %v2209_v57, 0.0  ;;  %v2026_v37 = vadd.f32 %v2025_v29, %v2024_v38 }
 0x2a4   : > { %v7254_v42 = vmul.f32 %v7211_v30, %v7144_v46  ;;  %v1956_v6 = vadd.f32 %v1955_v32, %v1954_v48  ;;  %v2246_v43 = vadd.f32 %v2245_v16, %v2244_v45  ;;  %v4993_v58 = vmul.f32 -1.442695, %v2346_v51 }
 0x2a5   : > { %v2175_v55 = vrot.slane %v2174_v3, 4  ;;  %v2027_v44 = vrot.slane %v2026_v37, 4  ;;  %v4996_v62 = vmul.f32 -1.442695, %v2349_v18  ;;  %v7257_v57 = vpop.f32.mrf.mxu0  ;;  %v7263_v48 = vrot.slane %v7211_v30, %v7177_v35  ;;  %v7267_v10 = vpop.f32.mrf.mxu1 }
 0x2a6   : > { %v2247_v26 = vrot.slane %v2246_v43, 4  ;;  %v1957_v28 = vrot.slane %v1956_v6, 2  ;;  %8653 = vst [vmem:[#allocation29_spill] sm:$0xff] %v7257_v57  ;;  %5790 = vpow2.f32 %v4993_v58  ;;  %v1962_v30 = vsel %vm634_vm1, %v7257_v57, 0.0 }
 0x2a7   : > { %v5783_v2 = vpop.eup %5782  ;;  %v2176_v7 = vadd.f32 %v2175_v55, %v2174_v3  ;;  %v2028_v52 = vadd.f32 %v2027_v44, %v2026_v37  ;;  %5792 = vpow2.f32 %v4996_v62  ;;  %v2182_v32 = vsel %vm634_vm1, %v7267_v10, 0.0  ;;  %v7285_v58 = vpop.f32.mrf.mxu0 }
 0x2a8   : > { %v2287_v12 = vmul.f32 %v7182_v33, %v5783_v2  ;;  %v5785_v21 = vpop.eup %5784  ;;  %v2248_v38 = vadd.f32 %v2247_v26, %v2246_v43  ;;  %v1958_v29 = vadd.f32 %v1957_v28, %v1956_v6  ;;  %v2211_v3 = vmul.f32 %v7267_v10, %v7267_v10  ;;  %8654 = vst [vmem:[#allocation30_spill] sm:$0xff] %v7285_v58 }
 0x2a9   : > { %v2029_v23 = vrot.slane %v2028_v52, 2  ;;  %v2177_v18 = vrot.slane %v2176_v7, 2  ;;  %v7270_v37 = vmul.f32 %v7208_v50, %v5785_v21  ;;  %v1990_v8 = vmul.f32 %v7285_v58, %v7285_v58 }
 0x2aa   : > { %v2291_v16 = vmul.f32 %v2287_v12, %v7168_v41  ;;  %v2305_v51 = vrot.slane %v2287_v12, %v7177_v35  ;;  %v1991_v41 = vmul.f32 %v7257_v57, %v7257_v57  ;;  %v2249_v26 = vrot.slane %v2248_v38, 2 }
 0x2ab   : > { %v2030_v62 = vadd.f32 %v2029_v23, %v2028_v52  ;;  %v2178_v12 = vadd.f32 %v2177_v18, %v2176_v7  ;;  %v1959_v7 = vrot.slane %v1958_v29, 1  ;;  %v7297_v23 = vpop.f32.mrf.mxu0 }
 0x2ac   : > { %v2295_v36 = vsub.f32 %v7198_v4, %v2291_v16  ;;  %v2318_v45 = vmul.f32 %v2305_v51, %v7092_v19  ;;  %v2319_v55 = vmul.f32 %v7079_v22, %v2305_v51  ;;  %v2320_v43 = vmul.f32 %v2305_v51, %v7132_v61  ;;  %v7288_v19 = vpop.f32.mrf.mxu1  ;;  %8655 = vst [vmem:[#allocation31_spill] sm:$0xff] %v7297_v23 }
 0x2ad   : > { %v2321_v44 = vmul.f32 %v7116_v54, %v2305_v51  ;;  %v7292_v61 = vmul.f32 %v7270_v37, %v7164_v63  ;;  %v2034_v51 = vsel %vm634_vm1, %v1991_v41, 0.0  ;;  %v2250_v63 = vadd.f32 %v2249_v26, %v2248_v38 }
 0x2ae   : > { %v2337_v2 = vrot.slane %v2295_v36, %v7177_v35  ;;  %v2181_v41 = vsel %vm634_vm1, %v7288_v19, 0.0 }
 0x2af   : > { %v5787_v6 = vpop.eup %5786 }
 0x2b0   : > { %v5789_v21 = vpop.eup %5788  ;;  %v2411_v28 = vadd.f32 1.0, %v5787_v6  ;;  %v2350_v16 = vadd.f32 %v2337_v2, %v2318_v45  ;;  %v2351_v46 = vadd.f32 %v2337_v2, %v2319_v55  ;;  %v2352_v57 = vadd.f32 %v2337_v2, %v2320_v43  ;;  %v7302_v6 = vpop.f32.mrf.mxu1 }
 0x2b1   : > { %v2412_v22 = vadd.f32 1.0, %v5789_v21  ;;  %v2353_v36 = vadd.f32 %v2337_v2, %v2321_v44  ;;  %v2031_v45 = vrot.slane %v2030_v62, 1  ;;  %v2254_v55 = vsel %vm634_vm1, %v2211_v3, 0.0  ;;  %8656 = vst [vmem:[#allocation32_spill] sm:$0xff] %v7302_v6  ;;  %v7307_v3 = vpop.f32.mrf.mxu0 }
 0x2b2   : > { %v4997_v54 = vmul.f32 -1.442695, %v2350_v16  ;;  %v4999_v52 = vmul.f32 -1.442695, %v2352_v57  ;;  %5794 = vrcp.f32 %v2411_v28  ;;  %v4998_v18 = vmul.f32 -1.442695, %v2351_v46  ;;  %v7313_v56 = vpop.f32.mrf.mxu1 }
 0x2b3   : > { %v2179_v43 = vrot.slane %v2178_v12, 1  ;;  %v1961_v2 = vsel %vm634_vm1, %v7285_v58, 0.0  ;;  %v5000_v57 = vmul.f32 -1.442695, %v2353_v36  ;;  %v2033_v44 = vsel %vm634_vm1, %v1990_v8, 0.0  ;;  %8657 = vst [vmem:[#allocation33_spill] sm:$0xff] %v7307_v3 }
 0x2b4   : > { %5796 = vpow2.f32 %v4997_v54  ;;  %v1960_v46 = vadd.f32 %v1959_v7, %v1958_v29  ;;  %v2251_v28 = vrot.slane %v2250_v63, 1  ;;  %v2032_v38 = vadd.f32 %v2031_v45, %v2030_v62  ;;  %v5791_v54 = vpop.eup %5790 }
 0x2b5   : > { %5798 = vrcp.f32 %v2412_v22  ;;  %v2180_v21 = vadd.f32 %v2179_v43, %v2178_v12  ;;  %v1963_v26 = vadd.f32 %v1962_v30, %v1961_v2  ;;  %v2210_v16 = vmul.f32 %v7288_v19, %v7288_v19 }
 0x2b6   : > { %5800 = vpow2.f32 %v4999_v52  ;;  %v2252_v36 = vadd.f32 %v2251_v28, %v2250_v63  ;;  %v2035_v8 = vadd.f32 %v2034_v51, %v2033_v44  ;;  %v2183_v58 = vadd.f32 %v2182_v32, %v2181_v41  ;;  %v5793_v52 = vpop.eup %5792 }
 0x2b7   : > { %5802 = vpow2.f32 %v4998_v18  ;;  %v7311_v22 = vmul.f32 0.03125, %v2180_v21  ;;  %v1966_v29 = vsel %vm634_vm1, %v7297_v23, 0.0  ;;  %v1993_v62 = vmul.f32 %v7297_v23, %v7297_v23 }
 0x2b8   : > { %5804 = vpow2.f32 %v5000_v57  ;;  %v1964_v30 = vsel %vm634_vm1, %v7307_v3, 0.0  ;;  %v2268_v12 = vmul.f32 0.03125, %v2252_v36  ;;  %v2253_v51 = vsel %vm634_vm1, %v2210_v16, 0.0 }
 0x2b9   : > { %v2272_v7 = vmul.f32 %v7311_v22, %v7311_v22  ;;  %v2186_v32 = vsel %vm634_vm1, %v7302_v6, 0.0  ;;  %v2213_v18 = vmul.f32 %v7302_v6, %v7302_v6  ;;  %v1965_v45 = vadd.f32 %v1964_v30, %v1963_v26 }
 0x2ba   : > { %v1992_v43 = vmul.f32 %v7307_v3, %v7307_v3  ;;  %v2184_v63 = vsel %vm634_vm1, %v7313_v56, 0.0  ;;  %v2212_v44 = vmul.f32 %v7313_v56, %v7313_v56  ;;  %v2410_v41 = vadd.f32 1.0, %v5791_v54 }
 0x2bb   : > { %v2276_v2 = vsub.f32 %v2268_v12, %v2272_v7  ;;  %v2185_v57 = vadd.f32 %v2184_v63, %v2183_v58  ;;  %v2255_v21 = vadd.f32 %v2254_v55, %v2253_v51  ;;  %v1967_v28 = vadd.f32 %v1966_v29, %v1965_v45 }
 0x2bc   : > { %v2036_v16 = vsel %vm634_vm1, %v1992_v43, 0.0  ;;  %v2413_v36 = vadd.f32 1.0, %v5793_v52  ;;  %v2256_v30 = vsel %vm634_vm1, %v2212_v44, 0.0  ;;  %v7336_v3 = vmul.f32 0.03125, %v1960_v46  ;;  %v7347_v43 = vld [vmem:[%s6412_s30] sm:$0xf] }
 0x2bd   : > { %v2280_v23 = vadd.f32 1e-05, %v2276_v2  ;;  %v2037_v15 = vadd.f32 %v2036_v16, %v2035_v8  ;;  %v2187_v26 = vadd.f32 %v2186_v32, %v2185_v57  ;;  %v1968_v6 = vrot.slane %v1967_v28, 4 }
 0x2be   : > { %v2257_v12 = vadd.f32 %v2256_v30, %v2255_v21  ;;  %5806 = vrcp.f32 %v2410_v41  ;;  %v2038_v54 = vsel %vm634_vm1, %v1993_v62, 0.0  ;;  %v2258_v55 = vsel %vm634_vm1, %v2213_v18, 0.0 }
 0x2bf   : > { %v5795_v58 = vpop.eup %5794  ;;  %5808 = vrsqrt.f32 %v2280_v23  ;;  %v2188_v29 = vrot.slane %v2187_v26, 4  ;;  %v8658_v8 = vsub.f32 %v6851_v9, %v7254_v42  ;;  %v2039_v51 = vadd.f32 %v2038_v54, %v2037_v15 }
 0x2c0   : > { %v2259_v46 = vadd.f32 %v2258_v55, %v2257_v12  ;;  %5810 = vrcp.f32 %v2413_v36  ;;  %v2095_v45 = vmul.f32 %v7020_v39, %v7263_v48  ;;  %v2075_v23 = vsub.f32 %v7347_v43, %v7292_v61 }
 0x2c1   : > { %v5797_v7 = vpop.eup %5796  ;;  %v2113_v52 = vrot.slane %v8658_v8, %v7177_v35  ;;  %v2048_v62 = vmul.f32 0.03125, %v2032_v38  ;;  %v2189_v18 = vadd.f32 %v2188_v29, %v2187_v26  ;;  %v2052_v2 = vmul.f32 %v7336_v3, %v7336_v3 }
 0x2c2   : > { %v5799_v32 = vpop.eup %5798  ;;  %v1969_v9 = vadd.f32 %v1968_v6, %v1967_v28  ;;  %v2260_v42 = vrot.slane %v2259_v46, 4  ;;  %v2414_v15 = vadd.f32 1.0, %v5797_v7  ;;  %v2096_v44 = vmul.f32 %v7263_v48, %v7052_v47 }
 0x2c3   : > { %v5801_v63 = vpop.eup %5800  ;;  %v2190_v39 = vrot.slane %v2189_v18, 2  ;;  %v2127_v21 = vadd.f32 %v2113_v52, %v2095_v45  ;;  %v7357_v16 = vrot.slane %v7270_v37, %v7177_v35  ;;  %v2040_v61 = vrot.slane %v2039_v51, 4 }
 0x2c4   : > { %v5803_v57 = vpop.eup %5802  ;;  %v2416_v41 = vadd.f32 1.0, %v5801_v63  ;;  %v2261_v38 = vadd.f32 %v2260_v42, %v2259_v46  ;;  %v7360_v26 = vrot.slane %v2075_v23, %v7177_v35  ;;  %v2094_v28 = vmul.f32 %v7263_v48, %v7028_v14 }
 0x2c5   : > { %v5805_v36 = vpop.eup %5804  ;;  %v2191_v6 = vadd.f32 %v2190_v39, %v2189_v18  ;;  %v2056_v30 = vsub.f32 %v2048_v62, %v2052_v2  ;;  %v1970_v47 = vrot.slane %v1969_v9, 2  ;;  %v2128_v54 = vadd.f32 %v2113_v52, %v2096_v44 }
 0x2c6   : > { %5812 = vrcp.f32 %v2416_v41  ;;  %v2262_v12 = vrot.slane %v2261_v38, 2  ;;  %v2459_v29 = vmul.f32 %v5795_v58, %v2127_v21  ;;  %v2415_v37 = vadd.f32 1.0, %v5803_v57 }
 0x2c7   : > { %5814 = vrcp.f32 %v2414_v15  ;;  %v2192_v55 = vrot.slane %v2191_v6, 1  ;;  %v2100_v7 = vmul.f32 %v7357_v16, %v7122_v25  ;;  %v2041_v8 = vadd.f32 %v2040_v61, %v2039_v51 }
 0x2c8   : > { %v2263_v46 = vadd.f32 %v2262_v12, %v2261_v38  ;;  %v2126_v45 = vadd.f32 %v2113_v52, %v2094_v28  ;;  %v2460_v63 = vmul.f32 %v5799_v32, %v2128_v54  ;;  %v2097_v18 = vmul.f32 %v7040_v34, %v7263_v48 }
 0x2c9   : > { %v2193_v23 = vadd.f32 %v2192_v55, %v2191_v6  ;;  %5816 = vrcp.f32 %v2415_v37  ;;  %v2132_v14 = vadd.f32 %v7360_v26, %v2100_v7  ;;  %v2060_v62 = vadd.f32 1e-05, %v2056_v30 }
 0x2ca   : > { %v1971_v2 = vadd.f32 %v1970_v47, %v1969_v9  ;;  %v2264_v42 = vrot.slane %v2263_v46, 1  ;;  %v2475_v57 = vadd.f32 %v2459_v29, %v6872_v0  ;;  %v2129_v25 = vadd.f32 %v2113_v52, %v2097_v18 }
 0x2cb   : > { %v5807_v15 = vpop.eup %5806  ;;  %v7369_v58 = vmul.f32 0.03125, %v2193_v23  ;;  %v2417_v51 = vadd.f32 1.0, %v5805_v36  ;;  %v2042_v41 = vrot.slane %v2041_v8, 2  ;;  %v2098_v34 = vmul.f32 %v7357_v16, %v7090_v5 }
 0x2cc   : > { %v5809_v44 = vpop.eup %5808  ;;  %v2265_v39 = vadd.f32 %v2264_v42, %v2263_v46  ;;  %v2458_v32 = vmul.f32 %v5807_v15, %v2126_v45  ;;  %v2476_v61 = vadd.f32 %v2460_v63, %v6887_v31  ;;  %v1972_v38 = vrot.slane %v1971_v2, 1 }
 0x2cd   : > { %v5811_v48 = vpop.eup %5810  ;;  %v2288_v21 = vmul.f32 %v7182_v33, %v5809_v44  ;;  %v2273_v9 = vmul.f32 %v7369_v58, %v7369_v58  ;;  %5818 = vrcp.f32 %v2417_v51  ;;  %v7381_v30 = vmul.f32 0.70710677, %v2475_v57 }
 0x2ce   : > { %v2269_v0 = vmul.f32 0.03125, %v2265_v39  ;;  %v2474_v52 = vadd.f32 %v2458_v32, %v6877_v17  ;;  %v2461_v36 = vmul.f32 %v5811_v48, %v2129_v25  ;;  %v2099_v5 = vmul.f32 %v7077_v24, %v7357_v16 }
 0x2cf   : > { %v2292_v6 = vmul.f32 %v2288_v21, %v7311_v22  ;;  %v2309_v28 = vrot.slane %v2288_v21, %v7177_v35  ;;  %v2043_v47 = vadd.f32 %v2042_v41, %v2041_v8  ;;  %v7389_v29 = vmul.f32 0.70710677, %v2476_v61 }
 0x2d0   : > { %v2277_v12 = vsub.f32 %v2269_v0, %v2273_v9  ;;  %v7385_v54 = vmul.f32 0.70710677, %v2474_v52  ;;  %v2477_v31 = vadd.f32 %v2461_v36, %v6905_v13  ;;  %v2130_v17 = vadd.f32 %v7360_v26, %v2098_v34 }
 0x2d1   : > { %v2296_v55 = vsub.f32 %v7198_v4, %v2292_v6  ;;  %v2131_v22 = vadd.f32 %v7360_v26, %v2099_v5  ;;  %v2322_v7 = vmul.f32 %v2309_v28, %v7187_v60  ;;  %v2323_v46 = vmul.f32 %v7174_v11, %v2309_v28 }
 0x2d2   : > { %v1973_v24 = vadd.f32 %v1972_v38, %v1971_v2  ;;  %v2281_v8 = vadd.f32 1e-05, %v2277_v12  ;;  %5463 = vmatprep.mubr.msk.f32.mxu0 %vm634_vm1, %v7385_v54  ;;  %5495 = vmatprep.mubr.msk.f32.mxu1 %vm634_vm1, %v7385_v54  ;;  %5820 = vrsqrt.f32 %v2060_v62  ;;  %v2324_v45 = vmul.f32 %v2309_v28, %v7232_v20 }
 0x2d3   : > { %v5813_v37 = vpop.eup %5812  ;;  %v2325_v23 = vmul.f32 %v7215_v59, %v2309_v28  ;;  %v2341_v63 = vrot.slane %v2296_v55, %v7177_v35  ;;  %5464 = vmatmul.mubr.msk.f32.vlgmr.msra.gmra.mxu0 %vm634_vm1, %v7381_v30  ;;  %5496 = vmatmul.mubr.msk.f32.vlgmr.msra.gmra.mxu1 %vm634_vm1, %v7381_v30  ;;  %v2044_v11 = vrot.slane %v2043_v47, 1  ;;  %v7410_v60 = vmul.f32 0.70710677, %v2477_v31 }
 0x2d4   : > { %v5815_v13 = vpop.eup %5814  ;;  %5466 = vmatprep.mubr.msk.f32.mxu0 %vm634_vm1, %v7389_v29  ;;  %5498 = vmatprep.mubr.msk.f32.mxu1 %vm634_vm1, %v7389_v29  ;;  %v2464_v18 = vmul.f32 %v5813_v37, %v2132_v14  ;;  %v7412_v57 = vmul.f32 0.03125, %v1973_v24  ;;  %5822 = vrsqrt.f32 %v2281_v8  ;;  %v2101_v51 = vmul.f32 %v7103_v53, %v7357_v16 }
 0x2d5   : > { %v2462_v20 = vmul.f32 %v5815_v13, %v2130_v17  ;;  %v2354_v59 = vadd.f32 %v2341_v63, %v2322_v7  ;;  %v2355_v62 = vadd.f32 %v2341_v63, %v2323_v46  ;;  %v2356_v2 = vadd.f32 %v2341_v63, %v2324_v45 }
 0x2d6   : > { %v2357_v42 = vadd.f32 %v2341_v63, %v2325_v23  ;;  %v5817_v15 = vpop.eup %5816  ;;  %v2045_v34 = vadd.f32 %v2044_v11, %v2043_v47  ;;  %v2480_v21 = vadd.f32 %v2464_v18, %v6929_v49  ;;  %v2133_v53 = vadd.f32 %v7360_v26, %v2101_v51 }
 0x2d7   : > { %v2478_v25 = vadd.f32 %v2462_v20, %v6917_v1  ;;  %v5001_v44 = vmul.f32 -1.442695, %v2354_v59  ;;  %v5002_v41 = vmul.f32 -1.442695, %v2355_v62  ;;  %v5003_v39 = vmul.f32 -1.442695, %v2356_v2  ;;  %5467 = vmatmul.mubr.msk.f32.gmra.mxu0 %vm634_vm1, %v7410_v60  ;;  %5499 = vmatmul.mubr.msk.f32.gmra.mxu1 %vm634_vm1, %v7410_v60 }
 0x2d8   : > { %v2463_v14 = vmul.f32 %v5817_v15, %v2131_v22  ;;  %v5004_v32 = vmul.f32 -1.442695, %v2357_v42  ;;  %v2049_v38 = vmul.f32 0.03125, %v2045_v34  ;;  %v2053_v49 = vmul.f32 %v7412_v57, %v7412_v57  ;;  %v8660_v15 = vld [vmem:[#allocation26_spill] sm:$0xff] }
 0x2d9   : > { %v7421_v48 = vmul.f32 0.70710677, %v2478_v25  ;;  %5824 = vpow2.f32 %v5001_v44  ;;  %v8661_v44 = vld [vmem:[#allocation28_spill] sm:$0xff] }
 0x2da   : > { %v2479_v1 = vadd.f32 %v2463_v14, %v6923_v40  ;;  %v5819_v16 = vpop.eup %5818  ;;  %5826 = vpow2.f32 %v5002_v41  ;;  %v7434_v40 = vmul.f32 0.70710677, %v2480_v21  ;;  %v2057_v36 = vsub.f32 %v2049_v38, %v2053_v49  ;;  %v8662_v21 = vld [vmem:[#allocation25_spill] sm:$0xff] }
 0x2db   : > { %5469 = vmatprep.mubr.msk.f32.mxu0 %vm634_vm1, %v7421_v48  ;;  %5501 = vmatprep.mubr.msk.f32.mxu1 %vm634_vm1, %v7421_v48  ;;  %5828 = vpow2.f32 %v5003_v39  ;;  %v2465_v61 = vmul.f32 %v5819_v16, %v2133_v53  ;;  %v8663_v16 = vld [vmem:[#allocation27_spill] sm:$0xff]  ;;  %v8664_v38 = vld [vmem:[#allocation17_spill] sm:$0xff] }
 0x2dc   : > { %v7430_v9 = vmul.f32 0.70710677, %v2479_v1  ;;  %5830 = vpow2.f32 %v5004_v32 }
 0x2dd   : > { %v2481_v26 = vadd.f32 %v2465_v61, %v6939_v27  ;;  %v2061_v27 = vadd.f32 1e-05, %v2057_v36 }
 0x2de   : > { %5470 = vmatmul.mubr.msk.f32.gmra.mxu0 %vm634_vm1, %v7430_v9  ;;  %5502 = vmatmul.mubr.msk.f32.gmra.mxu1 %vm634_vm1, %v7430_v9 }
 0x2df   : > { %5472 = vmatprep.mubr.msk.f32.mxu0 %vm634_vm1, %v7434_v40  ;;  %5504 = vmatprep.mubr.msk.f32.mxu1 %vm634_vm1, %v7434_v40  ;;  %v7445_v0 = vmul.f32 0.70710677, %v2481_v26  ;;  %v5821_v52 = vpop.eup %5820  ;;  %5832 = vrsqrt.f32 %v2061_v27 }
 0x2e0   : > { %v2068_v28 = vmul.f32 %v7208_v50, %v5821_v52 }
 0x2e1   : > { %v5823_v6 = vpop.eup %5822 }
 0x2e2   : > { %5473 = vmatmul.mubr.msk.f32.gmra.mxu0 %vm634_vm1, %v7445_v0  ;;  %5505 = vmatmul.mubr.msk.f32.gmra.mxu1 %vm634_vm1, %v7445_v0  ;;  %v2289_v5 = vmul.f32 %v7182_v33, %v5823_v6  ;;  %v2072_v37 = vmul.f32 %v2068_v28, %v7336_v3 }
 0x2e4   : > { %v2293_v12 = vmul.f32 %v2289_v5, %v7369_v58  ;;  %v2313_v31 = vrot.slane %v2289_v5, %v7177_v35  ;;  %v8659_v58 = vld [vmem:[#allocation32_spill] sm:$0xff] }
 0x2e6   : > { %v5825_v47 = vpop.eup %5824  ;;  %v2297_v7 = vsub.f32 %v7198_v4, %v2293_v12  ;;  %v2326_v46 = vmul.f32 %v2313_v31, %v7288_v19  ;;  %v2327_v13 = vmul.f32 %v7267_v10, %v2313_v31  ;;  %v2328_v33 = vmul.f32 %v2313_v31, %v7313_v56  ;;  %v8666_v12 = vld [vmem:[#allocation19_spill] sm:$0xff] }
 0x2e7   : > { %v5827_v55 = vpop.eup %5826  ;;  %v2418_v17 = vadd.f32 1.0, %v5825_v47  ;;  %v2329_v45 = vmul.f32 %v8659_v58, %v2313_v31  ;;  %v2076_v19 = vsub.f32 %v7347_v43, %v2072_v37  ;;  %v2089_v56 = vrot.slane %v2068_v28, %v7177_v35 }
 0x2e8   : > { %v5829_v22 = vpop.eup %5828  ;;  %v2345_v23 = vrot.slane %v2297_v7, %v7177_v35  ;;  %v2419_v63 = vadd.f32 1.0, %v5827_v55 }
 0x2e9   : > { %v5831_v24 = vpop.eup %5830  ;;  %v2420_v8 = vadd.f32 1.0, %v5829_v22  ;;  %5834 = vrcp.f32 %v2418_v17  ;;  %v2121_v42 = vrot.slane %v2076_v19, %v7177_v35  ;;  %v2102_v25 = vmul.f32 %v2089_v56, %v8660_v15  ;;  %v8667_v22 = vld [vmem:[#allocation18_spill] sm:$0xff] }
 0x2ea   : > { %v2421_v11 = vadd.f32 1.0, %v5831_v24  ;;  %v2358_v3 = vadd.f32 %v2345_v23, %v2326_v46  ;;  %v2359_v20 = vadd.f32 %v2345_v23, %v2327_v13  ;;  %v2360_v18 = vadd.f32 %v2345_v23, %v2328_v33  ;;  %v8669_v13 = vld [vmem:[#allocation20_spill] sm:$0xff] }
 0x2eb   : > { %5836 = vrcp.f32 %v2420_v8  ;;  %v2361_v4 = vadd.f32 %v2345_v23, %v2329_v45  ;;  %v2104_v41 = vmul.f32 %v2089_v56, %v8661_v44  ;;  %v2134_v39 = vadd.f32 %v2121_v42, %v2102_v25 }
 0x2ec   : > { %5838 = vrcp.f32 %v2419_v63  ;;  %v5005_v59 = vmul.f32 -1.442695, %v2358_v3  ;;  %v5006_v62 = vmul.f32 -1.442695, %v2359_v20  ;;  %v5007_v10 = vmul.f32 -1.442695, %v2360_v18  ;;  %v5833_v51 = vpop.eup %5832 }
 0x2ed   : > { %5840 = vrcp.f32 %v2421_v11  ;;  %v5008_v2 = vmul.f32 -1.442695, %v2361_v4  ;;  %v2136_v32 = vadd.f32 %v2121_v42, %v2104_v41  ;;  %v2103_v1 = vmul.f32 %v8662_v21, %v2089_v56  ;;  %v8672_v4 = vld [vmem:[#allocation30_spill] sm:$0xff]  ;;  %v8676_v21 = vld [vmem:[#allocation21_spill] sm:$0xff] }
 0x2ee   : > { %5842 = vpow2.f32 %v5005_v59  ;;  %v2105_v61 = vmul.f32 %v8663_v16, %v2089_v56  ;;  %v2069_v47 = vmul.f32 %v7208_v50, %v5833_v51  ;;  %v8673_v59 = vld [vmem:[#allocation29_spill] sm:$0xff] }
 0x2ef   : > { %5844 = vpow2.f32 %v5006_v62  ;;  %v2135_v26 = vadd.f32 %v2121_v42, %v2103_v1 }
 0x2f0   : > { %5846 = vpow2.f32 %v5007_v10  ;;  %v2137_v6 = vadd.f32 %v2121_v42, %v2105_v61  ;;  %v2073_v45 = vmul.f32 %v2069_v47, %v7412_v57  ;;  %v2093_v20 = vrot.slane %v2069_v47, %v7177_v35  ;;  %v8674_v10 = vld [vmem:[#allocation33_spill] sm:$0xff] }
 0x2f1   : > { %5848 = vpow2.f32 %v5008_v2 }
 0x2f2   : > { %v2077_v3 = vsub.f32 %v7347_v43, %v2073_v45  ;;  %v2106_v19 = vmul.f32 %v2093_v20, %v8672_v4  ;;  %v2107_v62 = vmul.f32 %v8673_v59, %v2093_v20  ;;  %v2108_v56 = vmul.f32 %v2093_v20, %v8674_v10  ;;  %v8675_v43 = vld [vmem:[#allocation31_spill] sm:$0xff] }
 0x2f3   : > { %v2109_v25 = vmul.f32 %v8675_v43, %v2093_v20 }
 0x2f4   : > { %v2125_v18 = vrot.slane %v2077_v3, %v7177_v35 }
 0x2f6   : > { %v5835_v14 = vpop.eup %5834  ;;  %v2138_v2 = vadd.f32 %v2125_v18, %v2106_v19  ;;  %v2139_v15 = vadd.f32 %v2125_v18, %v2107_v62  ;;  %v2140_v44 = vadd.f32 %v2125_v18, %v2108_v56 }
 0x2f7   : > { %v2466_v34 = vmul.f32 %v5835_v14, %v2134_v39 }
 0x2f8   : > { %v5837_v53 = vpop.eup %5836 }
 0x2f9   : > { %v2482_v49 = vadd.f32 %v2466_v34, %v8664_v38  ;;  %v2468_v52 = vmul.f32 %v5837_v53, %v2136_v32  ;;  %v5839_v36 = vpop.eup %5838  ;;  %v2141_v32 = vadd.f32 %v2125_v18, %v2109_v25  ;;  %v8677_v53 = vld [vmem:[#allocation22_spill] sm:$0xff] }
 0x2fa   : > { %v5841_v28 = vpop.eup %5840  ;;  %v2467_v5 = vmul.f32 %v5839_v36, %v2135_v26  ;;  %v8681_v36 = vld [vmem:[#allocation24_spill] sm:$0xff] }
 0x2fb   : > { %v7470_v27 = vmul.f32 0.70710677, %v2482_v49  ;;  %v2484_v31 = vadd.f32 %v2468_v52, %v8666_v12  ;;  %v2469_v55 = vmul.f32 %v5841_v28, %v2137_v6  ;;  %v5843_v17 = vpop.eup %5842  ;;  %v8679_v49 = vld [vmem:[#allocation23_spill] sm:$0xff] }
 0x2fc   : > { %v2483_v37 = vadd.f32 %v2467_v5, %v8667_v22  ;;  %v5845_v7 = vpop.eup %5844  ;;  %v2422_v46 = vadd.f32 1.0, %v5843_v17 }
 0x2fd   : > { %8665 = vst [vmem:[#allocation32_spill] sm:$0xff] %v7470_v27  ;;  %5475 = vmatprep.mubr.msk.f32.mxu0 %vm634_vm1, %v7470_v27  ;;  %5507 = vmatprep.mubr.msk.f32.mxu1 %vm634_vm1, %v7470_v27  ;;  %v5847_v24 = vpop.eup %5846  ;;  %v2485_v33 = vadd.f32 %v2469_v55, %v8669_v13  ;;  %v2423_v50 = vadd.f32 1.0, %v5845_v7  ;;  %v7483_v63 = vmul.f32 0.70710677, %v2484_v31 }
 0x2fe   : > { %v7479_v8 = vmul.f32 0.70710677, %v2483_v37  ;;  %v5849_v58 = vpop.eup %5848  ;;  %v2424_v23 = vadd.f32 1.0, %v5847_v24  ;;  %5850 = vrcp.f32 %v2422_v46 }
 0x2ff   : > { %8670 = vst [vmem:[#allocation28_spill] sm:$0xff] %v7483_v63  ;;  %5852 = vrcp.f32 %v2423_v50  ;;  %v2425_v11 = vadd.f32 1.0, %v5849_v58  ;;  %v7493_v57 = vmul.f32 0.70710677, %v2485_v33 }
 0x300   : > { %8668 = vst [vmem:[#allocation26_spill] sm:$0xff] %v7479_v8  ;;  %5476 = vmatmul.mubr.msk.f32.gmra.mxu0 %vm634_vm1, %v7479_v8  ;;  %5508 = vmatmul.mubr.msk.f32.gmra.mxu1 %vm634_vm1, %v7479_v8  ;;  %5854 = vrcp.f32 %v2424_v23 }
 0x301   : > { %5478 = vmatprep.mubr.msk.f32.mxu0 %vm634_vm1, %v7483_v63  ;;  %5510 = vmatprep.mubr.msk.f32.mxu1 %vm634_vm1, %v7483_v63  ;;  %8671 = vst [vmem:[#allocation25_spill] sm:$0xff] %v7493_v57  ;;  %5856 = vrcp.f32 %v2425_v11 }
 0x304   : > { %5479 = vmatmul.mubr.msk.f32.gmra.mxu0 %vm634_vm1, %v7493_v57  ;;  %5511 = vmatmul.mubr.msk.f32.gmra.mxu1 %vm634_vm1, %v7493_v57 }
 0x30b   : > { %v5851_v42 = vpop.eup %5850 }
 0x30c   : > { %v5853_v51 = vpop.eup %5852  ;;  %v2470_v41 = vmul.f32 %v5851_v42, %v2138_v2 }
 0x30d   : > { %v5855_v39 = vpop.eup %5854  ;;  %v2471_v14 = vmul.f32 %v5853_v51, %v2139_v15 }
 0x30e   : > { %v5857_v34 = vpop.eup %5856  ;;  %v2486_v35 = vadd.f32 %v2470_v41, %v8676_v21  ;;  %v2472_v1 = vmul.f32 %v5855_v39, %v2140_v44 }
 0x30f   : > { %v2487_v16 = vadd.f32 %v2471_v14, %v8677_v53  ;;  %v2473_v61 = vmul.f32 %v5857_v34, %v2141_v32 }
 0x310   : > { %v7508_v38 = vmul.f32 0.70710677, %v2486_v35  ;;  %v2488_v26 = vadd.f32 %v2472_v1, %v8679_v49 }
 0x311   : > { %v7511_v52 = vmul.f32 0.70710677, %v2487_v16  ;;  %v2489_v6 = vadd.f32 %v2473_v61, %v8681_v36  ;;  %v617_v36 = vld [vmem:[%s6430_s22 + $0x38] sm:$0xff] }
 0x312   : > { %8678 = vst [vmem:[#allocation27_spill] sm:$0xff] %v7508_v38  ;;  %5481 = vmatprep.mubr.msk.f32.mxu0 %vm634_vm1, %v7508_v38  ;;  %5513 = vmatprep.mubr.msk.f32.mxu1 %vm634_vm1, %v7508_v38  ;;  %v7518_v28 = vmul.f32 0.70710677, %v2488_v26  ;;  %v625_v26 = vld [vmem:[%s6435_s11 + $0x38] sm:$0xff] }
 0x313   : > { %8680 = vst [vmem:[#allocation17_spill] sm:$0xff] %v7511_v52  ;;  %5482 = vmatmul.mubr.msk.f32.gmra.mxu0 %vm634_vm1, %v7511_v52  ;;  %5514 = vmatmul.mubr.msk.f32.gmra.mxu1 %vm634_vm1, %v7511_v52  ;;  %v7528_v5 = vmul.f32 0.70710677, %v2489_v6 }
 0x314   : > { %8682 = vst [vmem:[#allocation19_spill] sm:$0xff] %v7518_v28  ;;  %5484 = vmatprep.mubr.msk.f32.mxu0 %vm634_vm1, %v7518_v28  ;;  %5516 = vmatprep.mubr.msk.f32.mxu1 %vm634_vm1, %v7518_v28 }
 0x315   : > { %8683 = vst [vmem:[#allocation18_spill] sm:$0xff] %v7528_v5  ;;  %5551 = vmatprep.subr.msk.mxu1 %vm634_vm1, %v625_v26  ;;  %5519 = vmatprep.subr.msk.mxu0 %vm634_vm1, %v617_v36 }
 0x316   : > { %5552 = vmatpush3.xpose.msk.msra.mxu1 %vm634_vm1, %v625_v26  ;;  %5520 = vmatpush3.xpose.msk.msra.mxu0 %vm634_vm1, %v617_v36 }
 0x317   : > { %5485 = vmatmul.mubr.msk.f32.gmra.mxu0 %vm634_vm1, %v7528_v5  ;;  %5517 = vmatmul.mubr.msk.f32.gmra.mxu1 %vm634_vm1, %v7528_v5 }
 0x393   : > { %v7534_v47 = vpop.f32.mrf.mxu0  ;;  %v7536_v12 = vpop.f32.mrf.mxu1 }
 0x394   : > { %v2925_v31 = vmul.f32 %v7534_v47, %v7534_v47  ;;  %v3145_v55 = vmul.f32 %v7536_v12, %v7536_v12  ;;  %v2869_v46 = vsel %vm634_vm1, %v7534_v47, 0.0  ;;  %v3089_v45 = vsel %vm634_vm1, %v7536_v12, 0.0 }
 0x395   : > { %v7542_v17 = vpop.f32.mrf.mxu0  ;;  %v7544_v22 = vpop.f32.mrf.mxu1 }
 0x396   : > { %v2868_v37 = vsel %vm634_vm1, %v7542_v17, 0.0  ;;  %v2924_v7 = vmul.f32 %v7542_v17, %v7542_v17  ;;  %v3088_v24 = vsel %vm634_vm1, %v7544_v22, 0.0  ;;  %v3144_v13 = vmul.f32 %v7544_v22, %v7544_v22 }
 0x397   : > { %v7556_v33 = vpop.f32.mrf.mxu0  ;;  %v7558_v50 = vpop.f32.mrf.mxu1  ;;  %v2941_v58 = vsel %vm634_vm1, %v2925_v31, 0.0  ;;  %v3161_v23 = vsel %vm634_vm1, %v3145_v55, 0.0  ;;  %v2870_v3 = vadd.f32 %v2869_v46, %v2868_v37  ;;  %v3090_v20 = vadd.f32 %v3089_v45, %v3088_v24 }
 0x398   : > { %v2940_v11 = vsel %vm634_vm1, %v2924_v7, 0.0  ;;  %v3160_v18 = vsel %vm634_vm1, %v3144_v13, 0.0  ;;  %v2927_v4 = vmul.f32 %v7556_v33, %v7556_v33  ;;  %v2873_v62 = vsel %vm634_vm1, %v7556_v33, 0.0 }
 0x399   : > { %v7568_v19 = vpop.f32.mrf.mxu0  ;;  %v7570_v59 = vpop.f32.mrf.mxu1  ;;  %v3147_v10 = vmul.f32 %v7558_v50, %v7558_v50  ;;  %v2942_v42 = vadd.f32 %v2941_v58, %v2940_v11  ;;  %v3162_v51 = vadd.f32 %v3161_v23, %v3160_v18  ;;  %v3093_v44 = vsel %vm634_vm1, %v7558_v50, 0.0 }
 0x39a   : > { %v2871_v56 = vsel %vm634_vm1, %v7568_v19, 0.0  ;;  %v2926_v2 = vmul.f32 %v7568_v19, %v7568_v19  ;;  %v3091_v43 = vsel %vm634_vm1, %v7570_v59, 0.0  ;;  %v3146_v25 = vmul.f32 %v7570_v59, %v7570_v59 }
 0x39b   : > { %v2872_v15 = vadd.f32 %v2871_v56, %v2870_v3  ;;  %v3092_v39 = vadd.f32 %v3091_v43, %v3090_v20  ;;  %v2945_v14 = vsel %vm634_vm1, %v2927_v4, 0.0  ;;  %v3165_v53 = vsel %vm634_vm1, %v3147_v10, 0.0 }
 0x39c   : > { %v2943_v41 = vsel %vm634_vm1, %v2926_v2, 0.0  ;;  %v3163_v21 = vsel %vm634_vm1, %v3146_v25, 0.0  ;;  %v624_v2 = vld [vmem:[%s6435_s11 + $0x30] sm:$0xff] }
 0x39d   : > { %v2874_v32 = vadd.f32 %v2873_v62, %v2872_v15  ;;  %v2944_v34 = vadd.f32 %v2943_v41, %v2942_v42  ;;  %v3094_v16 = vadd.f32 %v3093_v44, %v3092_v39  ;;  %v3164_v61 = vadd.f32 %v3163_v21, %v3162_v51  ;;  %v616_v42 = vld [vmem:[%s6430_s22 + $0x30] sm:$0xff]  ;;  %5553 = vmatprep.subr.msk.mxu1 %vm634_vm1, %v624_v2 }
 0x39e   : > { %v7589_v35 = vpop.f32.mrf.mxu0  ;;  %v7591_v1 = vpop.f32.mrf.mxu1  ;;  %5521 = vmatprep.subr.msk.mxu0 %vm634_vm1, %v616_v42  ;;  %5554 = vmatpush3.xpose.msk.msra.mxu1 %vm634_vm1, %v624_v2 }
 0x39f   : > { %v2929_v49 = vmul.f32 %v7589_v35, %v7589_v35  ;;  %v2875_v6 = vrot.slane %v2874_v32, 4  ;;  %v2946_v31 = vadd.f32 %v2945_v14, %v2944_v34  ;;  %v2882_v55 = vsel %vm634_vm1, %v7589_v35, 0.0  ;;  %5522 = vmatpush3.xpose.msk.msra.mxu0 %vm634_vm1, %v616_v42 }
 0x3a0   : > { %v3149_v37 = vmul.f32 %v7591_v1, %v7591_v1  ;;  %v7602_v7 = vpop.f32.mrf.mxu0  ;;  %v7604_v46 = vpop.f32.mrf.mxu1  ;;  %v3095_v24 = vrot.slane %v3094_v16, 4  ;;  %v3166_v13 = vadd.f32 %v3165_v53, %v3164_v61  ;;  %v3102_v58 = vsel %vm634_vm1, %v7591_v1, 0.0 }
 0x3a1   : > { %v2881_v45 = vsel %vm634_vm1, %v7602_v7, 0.0  ;;  %v2876_v23 = vadd.f32 %v2875_v6, %v2874_v32  ;;  %v2947_v11 = vrot.slane %v2946_v31, 4  ;;  %v2954_v3 = vsel %vm634_vm1, %v2929_v49, 0.0 }
 0x3a2   : > { %v3174_v20 = vsel %vm634_vm1, %v3149_v37, 0.0  ;;  %v7616_v18 = vpop.f32.mrf.mxu0  ;;  %v3096_v4 = vadd.f32 %v3095_v24, %v3094_v16  ;;  %v3167_v62 = vrot.slane %v3166_v13, 4  ;;  %v2928_v10 = vmul.f32 %v7602_v7, %v7602_v7  ;;  %v7626_v44 = vpop.f32.mrf.mxu1 }
 0x3a3   : > { %v3101_v56 = vsel %vm634_vm1, %v7604_v46, 0.0  ;;  %v2877_v15 = vrot.slane %v2876_v23, 2  ;;  %v2948_v43 = vadd.f32 %v2947_v11, %v2946_v31  ;;  %v2883_v25 = vadd.f32 %v2882_v55, %v2881_v45  ;;  %v623_v31 = vld [vmem:[%s6435_s11 + $0x28] sm:$0xff] }
 0x3a4   : > { %v3148_v51 = vmul.f32 %v7604_v46, %v7604_v46  ;;  %v3097_v41 = vrot.slane %v3096_v4, 2  ;;  %v3168_v39 = vadd.f32 %v3167_v62, %v3166_v13  ;;  %v2953_v14 = vsel %vm634_vm1, %v2928_v10, 0.0  ;;  %v7636_v61 = vpop.f32.mrf.mxu0  ;;  %v615_v55 = vld [vmem:[%s6430_s22 + $0x28] sm:$0xff]  ;;  %v7644_v45 = vpop.f32.mrf.mxu1  ;;  %5555 = vmatprep.subr.msk.mxu1 %vm634_vm1, %v623_v31 }
 0x3a5   : > { %v3103_v32 = vadd.f32 %v3102_v58, %v3101_v56  ;;  %v2878_v34 = vadd.f32 %v2877_v15, %v2876_v23  ;;  %v2949_v21 = vrot.slane %v2948_v43, 2  ;;  %v2886_v16 = vsel %vm634_vm1, %v7616_v18, 0.0  ;;  %5523 = vmatprep.subr.msk.mxu0 %vm634_vm1, %v615_v55  ;;  %5556 = vmatpush3.xpose.msk.msra.mxu1 %vm634_vm1, %v623_v31 }
 0x3a6   : > { %v3173_v53 = vsel %vm634_vm1, %v3148_v51, 0.0  ;;  %v3098_v49 = vadd.f32 %v3097_v41, %v3096_v4  ;;  %v3169_v26 = vrot.slane %v3168_v39, 2  ;;  %v2955_v36 = vadd.f32 %v2954_v3, %v2953_v14  ;;  %5524 = vmatpush3.xpose.msk.msra.mxu0 %vm634_vm1, %v615_v55  ;;  %v622_v51 = vld [vmem:[%s6435_s11 + $0x20] sm:$0xff] }
 0x3a7   : > { %v2931_v6 = vmul.f32 %v7616_v18, %v7616_v18  ;;  %v2879_v37 = vrot.slane %v2878_v34, 1  ;;  %v2950_v24 = vadd.f32 %v2949_v21, %v2948_v43  ;;  %v3175_v13 = vadd.f32 %v3174_v20, %v3173_v53  ;;  %v614_v41 = vld [vmem:[%s6430_s22 + $0x20] sm:$0xff]  ;;  %5557 = vmatprep.subr.msk.mxu1 %vm634_vm1, %v622_v51 }
 0x3a8   : > { %v3106_v58 = vsel %vm634_vm1, %v7626_v44, 0.0  ;;  %v3099_v23 = vrot.slane %v3098_v49, 1  ;;  %v3170_v11 = vadd.f32 %v3169_v26, %v3168_v39  ;;  %v3151_v3 = vmul.f32 %v7626_v44, %v7626_v44  ;;  %5525 = vmatprep.subr.msk.mxu0 %vm634_vm1, %v614_v41 }
 0x3a9   : > { %v2884_v4 = vsel %vm634_vm1, %v7636_v61, 0.0  ;;  %v2880_v20 = vadd.f32 %v2879_v37, %v2878_v34  ;;  %v2951_v62 = vrot.slane %v2950_v24, 1  ;;  %v2958_v10 = vsel %vm634_vm1, %v2931_v6, 0.0  ;;  %5558 = vmatpush3.xpose.msk.msra.mxu1 %vm634_vm1, %v622_v51 }
 0x3aa   : > { %v2885_v56 = vadd.f32 %v2884_v4, %v2883_v25  ;;  %v3100_v2 = vadd.f32 %v3099_v23, %v3098_v49  ;;  %v3171_v42 = vrot.slane %v3170_v11, 1  ;;  %v2930_v15 = vmul.f32 %v7636_v61, %v7636_v61  ;;  %5526 = vmatpush3.xpose.msk.msra.mxu0 %vm634_vm1, %v614_v41 }
 0x3ab   : > { %v3104_v43 = vsel %vm634_vm1, %v7644_v45, 0.0  ;;  %v7661_v39 = vmul.f32 0.03125, %v2880_v20  ;;  %v2952_v14 = vadd.f32 %v2951_v62, %v2950_v24  ;;  %v3150_v26 = vmul.f32 %v7644_v45, %v7644_v45 }
 0x3ac   : > { %v2887_v21 = vadd.f32 %v2886_v16, %v2885_v56  ;;  %v3105_v53 = vadd.f32 %v3104_v43, %v3103_v32  ;;  %v7665_v25 = vmul.f32 0.03125, %v3100_v2  ;;  %v3172_v34 = vadd.f32 %v3171_v42, %v3170_v11 }
 0x3ad   : > { %v2956_v49 = vsel %vm634_vm1, %v2930_v15, 0.0  ;;  %v2992_v6 = vmul.f32 0.03125, %v2952_v14  ;;  %v2996_v32 = vmul.f32 %v7661_v39, %v7661_v39  ;;  %v3176_v23 = vsel %vm634_vm1, %v3150_v26, 0.0 }
 0x3ae   : > { %v2888_v16 = vrot.slane %v2887_v21, 4  ;;  %v2957_v31 = vadd.f32 %v2956_v49, %v2955_v36  ;;  %v3212_v55 = vmul.f32 0.03125, %v3172_v34  ;;  %v3216_v37 = vmul.f32 %v7665_v25, %v7665_v25 }
 0x3af   : > { %v3107_v24 = vadd.f32 %v3106_v58, %v3105_v53  ;;  %v3000_v11 = vsub.f32 %v2992_v6, %v2996_v32  ;;  %v3177_v62 = vadd.f32 %v3176_v23, %v3175_v13  ;;  %v3178_v2 = vsel %vm634_vm1, %v3151_v3, 0.0 }
 0x3b0   : > { %v2889_v4 = vadd.f32 %v2888_v16, %v2887_v21  ;;  %v2959_v20 = vadd.f32 %v2958_v10, %v2957_v31  ;;  %v3220_v56 = vsub.f32 %v3212_v55, %v3216_v37 }
 0x3b1   : > { %v3108_v42 = vrot.slane %v3107_v24, 4  ;;  %v3179_v51 = vadd.f32 %v3178_v2, %v3177_v62  ;;  %v3004_v14 = vadd.f32 1e-05, %v3000_v11  ;;  %v8684_v2 = vld [vmem:[#allocation16_spill] sm:$0xff] }
 0x3b2   : > { %v2890_v15 = vrot.slane %v2889_v4, 2  ;;  %v2960_v43 = vrot.slane %v2959_v20, 4  ;;  %v3224_v41 = vadd.f32 1e-05, %v3220_v56 }
 0x3b3   : > { %v3109_v36 = vadd.f32 %v3108_v42, %v3107_v24  ;;  %v3180_v5 = vrot.slane %v3179_v51, 4  ;;  %v7687_v42 = vsub.s32 2, %v8684_v2 }
 0x3b4   : > { %v2891_v34 = vadd.f32 %v2890_v15, %v2889_v4  ;;  %v2961_v49 = vadd.f32 %v2960_v43, %v2959_v20  ;;  %5858 = vrsqrt.f32 %v3224_v41 }
 0x3b5   : > { %v3110_v58 = vrot.slane %v3109_v36, 2  ;;  %v3181_v21 = vadd.f32 %v3180_v5, %v3179_v51  ;;  %5860 = vrsqrt.f32 %v3004_v14 }
 0x3b6   : > { %v2892_v53 = vrot.slane %v2891_v34, 1  ;;  %v2962_v26 = vrot.slane %v2961_v49, 2 }
 0x3b7   : > { %v3111_v10 = vadd.f32 %v3110_v58, %v3109_v36  ;;  %v3182_v3 = vrot.slane %v3181_v21, 2  ;;  %v7694_v36 = vld [vmem:[%s6406_s21] sm:$0xf] }
 0x3b8   : > { %v2893_v13 = vadd.f32 %v2892_v53, %v2891_v34  ;;  %v2963_v6 = vadd.f32 %v2962_v26, %v2961_v49 }
 0x3b9   : > { %v3112_v32 = vrot.slane %v3111_v10, 1  ;;  %v3183_v31 = vadd.f32 %v3182_v3, %v3181_v21 }
 0x3ba   : > { %v2964_v16 = vrot.slane %v2963_v6, 1  ;;  %v7678_v55 = vmul.f32 0.03125, %v2893_v13  ;;  %v7704_v13 = vld [vmem:[%s6414_s20] sm:$0xf] }
 0x3bb   : > { %v3113_v37 = vadd.f32 %v3112_v32, %v3111_v10  ;;  %v3184_v23 = vrot.slane %v3183_v31, 1  ;;  %v7708_v32 = vld [vmem:[%s6440_s26] sm:$0xf] }
 0x3bc   : > { %v2965_v24 = vadd.f32 %v2964_v16, %v2963_v6  ;;  %v2997_v5 = vmul.f32 %v7678_v55, %v7678_v55 }
 0x3bd   : > { %v7680_v11 = vmul.f32 0.03125, %v3113_v37  ;;  %v3185_v4 = vadd.f32 %v3184_v23, %v3183_v31 }
 0x3be   : > { %v2993_v20 = vmul.f32 0.03125, %v2965_v24 }
 0x3bf   : > { %v3217_v62 = vmul.f32 %v7680_v11, %v7680_v11  ;;  %v3213_v56 = vmul.f32 0.03125, %v3185_v4 }
 0x3c0   : > { %v7689_v51 = vpop.f32.mrf.mxu0  ;;  %v7691_v41 = vpop.f32.mrf.mxu1  ;;  %v3001_v34 = vsub.f32 %v2993_v20, %v2997_v5 }
 0x3c1   : > { %v5859_v15 = vpop.eup %5858  ;;  %v3221_v43 = vsub.f32 %v3213_v56, %v3217_v62  ;;  %8685 = vst [vmem:[#allocation20_spill] sm:$0xff] %v7689_v51  ;;  %v2933_v31 = vmul.f32 %v7689_v51, %v7689_v51  ;;  %v2895_v62 = vsel %vm634_vm1, %v7689_v51, 0.0  ;;  %v3115_v56 = vsel %vm634_vm1, %v7691_v41, 0.0 }
 0x3c2   : > { %v3232_v14 = vmul.f32 %v7694_v36, %v5859_v15  ;;  %v7697_v58 = vpop.f32.mrf.mxu0  ;;  %v5861_v53 = vpop.eup %5860  ;;  %v3005_v3 = vadd.f32 1e-05, %v3001_v34 }
 0x3c3   : > { %v3225_v49 = vadd.f32 1e-05, %v3221_v43  ;;  %8686 = vst [vmem:[#allocation30_spill] sm:$0xff] %v7697_v58  ;;  %v7701_v10 = vpop.f32.mrf.mxu1  ;;  %v7711_v16 = vmul.f32 %v7708_v32, %v5861_v53  ;;  %v2932_v20 = vmul.f32 %v7697_v58, %v7697_v58  ;;  %v2894_v15 = vsel %vm634_vm1, %v7697_v58, 0.0 }
 0x3c4   : > { %v3236_v26 = vmul.f32 %v3232_v14, %v7665_v25  ;;  %v3247_v21 = vrot.slane %v3232_v14, %v7687_v42  ;;  %v3153_v25 = vmul.f32 %v7691_v41, %v7691_v41  ;;  %v7717_v37 = vpop.f32.mrf.mxu0  ;;  %v3114_v14 = vsel %vm634_vm1, %v7701_v10, 0.0 }
 0x3c5   : > { %5862 = vrsqrt.f32 %v3225_v49  ;;  %8687 = vst [vmem:[#allocation29_spill] sm:$0xff] %v7717_v37  ;;  %v7724_v5 = vpop.f32.mrf.mxu1  ;;  %v2967_v53 = vsel %vm634_vm1, %v2933_v31, 0.0  ;;  %v3116_v57 = vadd.f32 %v3115_v56, %v3114_v14 }
 0x3c6   : > { %v3240_v6 = vsub.f32 %v7704_v13, %v3236_v26  ;;  %v3261_v24 = vmul.f32 %v7536_v12, %v3247_v21  ;;  %v3262_v23 = vmul.f32 %v3247_v21, %v7570_v59  ;;  %v3152_v12 = vmul.f32 %v7701_v10, %v7701_v10 }
 0x3c7   : > { %5864 = vrsqrt.f32 %v3005_v3  ;;  %v3260_v34 = vmul.f32 %v3247_v21, %v7544_v22  ;;  %v3263_v49 = vmul.f32 %v7558_v50, %v3247_v21  ;;  %v2966_v26 = vsel %vm634_vm1, %v2932_v20, 0.0 }
 0x3c8   : > { %v3279_v4 = vrot.slane %v3240_v6, %v7687_v42  ;;  %v7740_v6 = vpop.f32.mrf.mxu0  ;;  %v3187_v52 = vsel %vm634_vm1, %v3153_v25, 0.0  ;;  %v3186_v22 = vsel %vm634_vm1, %v3152_v12, 0.0  ;;  %v2968_v8 = vadd.f32 %v2967_v53, %v2966_v26 }
 0x3c9   : > { %8688 = vst [vmem:[#allocation33_spill] sm:$0xff] %v7740_v6  ;;  %v2935_v50 = vmul.f32 %v7717_v37, %v7717_v37  ;;  %v2897_v21 = vsel %vm634_vm1, %v7740_v6, 0.0  ;;  %v2934_v31 = vmul.f32 %v7740_v6, %v7740_v6  ;;  %v3119_v12 = vsel %vm634_vm1, %v7724_v5, 0.0 }
 0x3ca   : > { %v3293_v59 = vadd.f32 %v3279_v4, %v3261_v24  ;;  %v3294_v43 = vadd.f32 %v3279_v4, %v3262_v23  ;;  %v2896_v24 = vadd.f32 %v2895_v62, %v2894_v15  ;;  %v7743_v23 = vpop.f32.mrf.mxu1  ;;  %v3292_v3 = vadd.f32 %v3279_v4, %v3260_v34 }
 0x3cb   : > { %v3295_v38 = vadd.f32 %v3279_v4, %v3263_v49  ;;  %v3117_v20 = vsel %vm634_vm1, %v7743_v23, 0.0  ;;  %v3154_v4 = vmul.f32 %v7743_v23, %v7743_v23  ;;  %v2899_v62 = vsel %vm634_vm1, %v7717_v37, 0.0 }
 0x3cc   : > { %v5050_v2 = vmul.f32 -1.442695, %v3293_v59  ;;  %v5051_v28 = vmul.f32 -1.442695, %v3294_v43  ;;  %v2898_v25 = vadd.f32 %v2897_v21, %v2896_v24  ;;  %v2969_v56 = vsel %vm634_vm1, %v2934_v31, 0.0 }
 0x3cd   : > { %v3118_v15 = vadd.f32 %v3117_v20, %v3116_v57  ;;  %v2970_v43 = vadd.f32 %v2969_v56, %v2968_v8  ;;  %v3016_v34 = vmul.f32 %v7711_v16, %v7661_v39  ;;  %v3188_v49 = vadd.f32 %v3187_v52, %v3186_v22 }
 0x3ce   : > { %5866 = vpow2.f32 %v5050_v2  ;;  %v3155_v2 = vmul.f32 %v7724_v5, %v7724_v5  ;;  %v2900_v59 = vadd.f32 %v2899_v62, %v2898_v25  ;;  %v3189_v53 = vsel %vm634_vm1, %v3154_v4, 0.0 }
 0x3cf   : > { %5868 = vpow2.f32 %v5051_v28  ;;  %v3120_v28 = vadd.f32 %v3119_v12, %v3118_v15  ;;  %v5049_v26 = vmul.f32 -1.442695, %v3292_v3  ;;  %v2971_v24 = vsel %vm634_vm1, %v2935_v50, 0.0  ;;  %v7772_v15 = vld [vmem:[%s6412_s30] sm:$0xf] }
 0x3d0   : > { %v2901_v21 = vrot.slane %v2900_v59, 4  ;;  %v2972_v31 = vadd.f32 %v2971_v24, %v2970_v43  ;;  %v3190_v63 = vadd.f32 %v3189_v53, %v3188_v49  ;;  %v5052_v25 = vmul.f32 -1.442695, %v3295_v38 }
 0x3d1   : > { %v3121_v20 = vrot.slane %v3120_v28, 4  ;;  %v3191_v52 = vsel %vm634_vm1, %v3155_v2, 0.0  ;;  %v3020_v50 = vsub.f32 %v7772_v15, %v3016_v34  ;;  %v7777_v12 = vrot.slane %v7711_v16, %v7687_v42 }
 0x3d2   : > { %v5863_v14 = vpop.eup %5862  ;;  %v2902_v39 = vadd.f32 %v2901_v21, %v2900_v59  ;;  %v2973_v22 = vrot.slane %v2972_v31, 4  ;;  %v3192_v3 = vadd.f32 %v3191_v52, %v3190_v63  ;;  %5870 = vpow2.f32 %v5049_v26 }
 0x3d3   : > { %v3233_v57 = vmul.f32 %v7694_v36, %v5863_v14  ;;  %v3122_v4 = vadd.f32 %v3121_v20, %v3120_v28  ;;  %v7784_v34 = vpop.f32.mrf.mxu0  ;;  %5872 = vpow2.f32 %v5052_v25  ;;  %v7787_v21 = vpop.f32.mrf.mxu1  ;;  %v7794_v25 = vrot.slane %v3020_v50, %v7687_v42 }
 0x3d4   : > { %v5865_v56 = vpop.eup %5864  ;;  %v2903_v59 = vrot.slane %v2902_v39, 2  ;;  %v2974_v43 = vadd.f32 %v2973_v22, %v2972_v31  ;;  %v3193_v28 = vrot.slane %v3192_v3, 4  ;;  %8689 = vst [vmem:[#allocation31_spill] sm:$0xff] %v7784_v34  ;;  %8690 = vst [vmem:[#allocation21_spill] sm:$0xff] %v7787_v21  ;;  %v7791_v22 = vmul.f32 %v7534_v47, %v7777_v12 }
 0x3d5   : > { %v3237_v8 = vmul.f32 %v3233_v57, %v7680_v11  ;;  %v3251_v62 = vrot.slane %v3233_v57, %v7687_v42  ;;  %v3123_v49 = vrot.slane %v3122_v4, 2  ;;  %v7803_v47 = vmul.f32 %v7708_v32, %v5865_v56 }
 0x3d6   : > { %v2904_v16 = vadd.f32 %v2903_v59, %v2902_v39  ;;  %v2975_v53 = vrot.slane %v2974_v43, 2 }
 0x3d7   : > { %v3241_v38 = vsub.f32 %v7704_v13, %v3237_v8  ;;  %v3264_v11 = vmul.f32 %v3251_v62, %v7604_v46  ;;  %v3265_v2 = vmul.f32 %v7591_v1, %v3251_v62  ;;  %v3266_v63 = vmul.f32 %v3251_v62, %v7644_v45 }
 0x3d8   : > { %v3267_v26 = vmul.f32 %v7626_v44, %v3251_v62  ;;  %v2905_v31 = vrot.slane %v2904_v16, 1  ;;  %v2976_v20 = vadd.f32 %v2975_v53, %v2974_v43  ;;  %v3124_v45 = vadd.f32 %v3123_v49, %v3122_v4  ;;  %v7798_v62 = vpop.f32.mrf.mxu0  ;;  %v7800_v49 = vpop.f32.mrf.mxu1 }
 0x3d9   : > { %v3283_v14 = vrot.slane %v3241_v38, %v7687_v42  ;;  %v3194_v8 = vadd.f32 %v3193_v28, %v3192_v3  ;;  %v2937_v44 = vmul.f32 %v7784_v34, %v7784_v34  ;;  %8691 = vst [vmem:[#allocation22_spill] sm:$0xff] %v7798_v62  ;;  %v2908_v28 = vsel %vm634_vm1, %v7784_v34, 0.0 }
 0x3da   : > { %v2906_v59 = vadd.f32 %v2905_v31, %v2904_v16  ;;  %v2977_v3 = vrot.slane %v2976_v20, 1  ;;  %v3125_v43 = vrot.slane %v3124_v45, 1  ;;  %v7809_v16 = vpop.f32.mrf.mxu0 }
 0x3db   : > { %v3296_v57 = vadd.f32 %v3283_v14, %v3264_v11  ;;  %v3297_v24 = vadd.f32 %v3283_v14, %v3265_v2  ;;  %v3298_v46 = vadd.f32 %v3283_v14, %v3266_v63  ;;  %v5867_v1 = vpop.eup %5866  ;;  %v3299_v11 = vadd.f32 %v3283_v14, %v3267_v26  ;;  %8692 = vst [vmem:[#allocation23_spill] sm:$0xff] %v7809_v16 }
 0x3dc   : > { %v5869_v52 = vpop.eup %5868  ;;  %v3357_v39 = vadd.f32 1.0, %v5867_v1  ;;  %v3195_v63 = vrot.slane %v3194_v8, 2  ;;  %v7807_v53 = vmul.f32 0.03125, %v2906_v59  ;;  %v3126_v14 = vadd.f32 %v3125_v43, %v3124_v45  ;;  %v7832_v59 = vpop.f32.mrf.mxu0 }
 0x3dd   : > { %v3358_v38 = vadd.f32 1.0, %v5869_v52  ;;  %v5053_v2 = vmul.f32 -1.442695, %v3296_v57  ;;  %v5055_v4 = vmul.f32 -1.442695, %v3298_v46  ;;  %v2980_v46 = vsel %vm634_vm1, %v2937_v44, 0.0  ;;  %v7816_v52 = vpop.f32.mrf.mxu1 }
 0x3de   : > { %5874 = vrcp.f32 %v3357_v39  ;;  %v5054_v50 = vmul.f32 -1.442695, %v3297_v24  ;;  %v3196_v26 = vadd.f32 %v3195_v63, %v3194_v8  ;;  %v5056_v57 = vmul.f32 -1.442695, %v3299_v11  ;;  %8693 = vst [vmem:[#allocation24_spill] sm:$0xff] %v7816_v52  ;;  %8694 = vst [vmem:[#allocation34_spill] sm:$0xff] %v7832_v59 }
 0x3df   : > { %5876 = vrcp.f32 %v3358_v38  ;;  %v3157_v1 = vmul.f32 %v7787_v21, %v7787_v21  ;;  %v2978_v56 = vadd.f32 %v2977_v3, %v2976_v20  ;;  %v7814_v24 = vmul.f32 0.03125, %v3126_v14  ;;  %v5871_v39 = vpop.eup %5870  ;;  %v7838_v34 = vpop.f32.mrf.mxu1 }
 0x3e0   : > { %5878 = vpow2.f32 %v5053_v2  ;;  %v3197_v31 = vrot.slane %v3196_v26, 1  ;;  %v2907_v45 = vsel %vm634_vm1, %v7798_v62, 0.0  ;;  %v2936_v8 = vmul.f32 %v7798_v62, %v7798_v62  ;;  %v5873_v63 = vpop.eup %5872 }
 0x3e1   : > { %5880 = vpow2.f32 %v5055_v4  ;;  %v3127_v44 = vsel %vm634_vm1, %v7800_v49, 0.0  ;;  %v7826_v38 = vmul.f32 %v7807_v53, %v7807_v53  ;;  %v3218_v11 = vmul.f32 %v7814_v24, %v7814_v24 }
 0x3e2   : > { %5882 = vpow2.f32 %v5054_v50  ;;  %v3198_v20 = vadd.f32 %v3197_v31, %v3196_v26  ;;  %v3128_v2 = vsel %vm634_vm1, %v7787_v21, 0.0  ;;  %v3200_v4 = vsel %vm634_vm1, %v3157_v1, 0.0 }
 0x3e3   : > { %5884 = vpow2.f32 %v5056_v57  ;;  %v2979_v3 = vsel %vm634_vm1, %v2936_v8, 0.0  ;;  %v3156_v43 = vmul.f32 %v7800_v49, %v7800_v49  ;;  %v2994_v50 = vmul.f32 0.03125, %v2978_v56 }
 0x3e4   : > { %v3214_v14 = vmul.f32 0.03125, %v3198_v20  ;;  %v2909_v26 = vadd.f32 %v2908_v28, %v2907_v45  ;;  %v3129_v31 = vadd.f32 %v3128_v2, %v3127_v44  ;;  %v2981_v62 = vadd.f32 %v2980_v46, %v2979_v3 }
 0x3e5   : > { %v2912_v27 = vsel %vm634_vm1, %v7809_v16, 0.0  ;;  %v2939_v57 = vmul.f32 %v7809_v16, %v7809_v16  ;;  %v2910_v1 = vsel %vm634_vm1, %v7832_v59, 0.0  ;;  %v3199_v37 = vsel %vm634_vm1, %v3156_v43, 0.0 }
 0x3e6   : > { %v3222_v8 = vsub.f32 %v3214_v14, %v3218_v11  ;;  %v3132_v56 = vsel %vm634_vm1, %v7816_v52, 0.0  ;;  %v2911_v28 = vadd.f32 %v2910_v1, %v2909_v26  ;;  %v3159_v45 = vmul.f32 %v7816_v52, %v7816_v52 }
 0x3e7   : > { %v2938_v46 = vmul.f32 %v7832_v59, %v7832_v59  ;;  %v3130_v44 = vsel %vm634_vm1, %v7838_v34, 0.0  ;;  %v3158_v20 = vmul.f32 %v7838_v34, %v7838_v34  ;;  %v3356_v43 = vadd.f32 1.0, %v5871_v39 }
 0x3e8   : > { %v3226_v2 = vadd.f32 1e-05, %v3222_v8  ;;  %v2913_v11 = vadd.f32 %v2912_v27, %v2911_v28  ;;  %v3131_v3 = vadd.f32 %v3130_v44, %v3129_v31  ;;  %v3201_v14 = vadd.f32 %v3200_v4, %v3199_v37 }
 0x3e9   : > { %v2982_v16 = vsel %vm634_vm1, %v2938_v46, 0.0  ;;  %v3202_v26 = vsel %vm634_vm1, %v3158_v20, 0.0  ;;  %v3359_v1 = vadd.f32 1.0, %v5873_v63  ;;  %v3017_v21 = vmul.f32 %v7803_v47, %v7678_v55 }
 0x3ea   : > { %5886 = vrsqrt.f32 %v3226_v2  ;;  %v2914_v6 = vrot.slane %v2913_v11, 4  ;;  %v2983_v59 = vadd.f32 %v2982_v16, %v2981_v62  ;;  %v3133_v58 = vadd.f32 %v3132_v56, %v3131_v3 }
 0x3eb   : > { %v5875_v51 = vpop.eup %5874  ;;  %v2984_v8 = vsel %vm634_vm1, %v2939_v57, 0.0  ;;  %v3203_v27 = vadd.f32 %v3202_v26, %v3201_v14  ;;  %5888 = vrcp.f32 %v3356_v43  ;;  %v3204_v37 = vsel %vm634_vm1, %v3159_v45, 0.0 }
 0x3ec   : > { %v5877_v52 = vpop.eup %5876  ;;  %v2985_v4 = vadd.f32 %v2984_v8, %v2983_v59  ;;  %v3134_v31 = vrot.slane %v3133_v58, 4  ;;  %5890 = vrcp.f32 %v3359_v1  ;;  %v3042_v28 = vmul.f32 %v7777_v12, %v7568_v19 }
 0x3ed   : > { %v5879_v39 = vpop.eup %5878  ;;  %v3073_v62 = vadd.f32 %v7794_v25, %v7791_v22  ;;  %v2915_v16 = vadd.f32 %v2914_v6, %v2913_v11  ;;  %v3205_v56 = vadd.f32 %v3204_v37, %v3203_v27  ;;  %v3002_v57 = vsub.f32 %v2994_v50, %v7826_v38 }
 0x3ee   : > { %v5881_v63 = vpop.eup %5880  ;;  %v2986_v44 = vrot.slane %v2985_v4, 4  ;;  %v3135_v20 = vadd.f32 %v3134_v31, %v3133_v58  ;;  %v3074_v45 = vadd.f32 %v7794_v25, %v3042_v28  ;;  %v3021_v59 = vsub.f32 %v7772_v15, %v3017_v21 }
 0x3ef   : > { %v5883_v55 = vpop.eup %5882  ;;  %v3362_v46 = vadd.f32 1.0, %v5881_v63  ;;  %v3206_v2 = vrot.slane %v3205_v56, 4  ;;  %v3031_v19 = vrot.slane %v7803_v47, %v7687_v42  ;;  %v3405_v22 = vmul.f32 %v5875_v51, %v3073_v62 }
 0x3f0   : > { %v5885_v3 = vpop.eup %5884  ;;  %v3136_v43 = vrot.slane %v3135_v20, 2  ;;  %v2916_v6 = vrot.slane %v2915_v16, 2  ;;  %v3360_v14 = vadd.f32 1.0, %v5879_v39  ;;  %v3361_v26 = vadd.f32 1.0, %v5883_v55 }
 0x3f1   : > { %5892 = vrcp.f32 %v3362_v46  ;;  %v3207_v11 = vadd.f32 %v3206_v2, %v3205_v56  ;;  %v3006_v1 = vadd.f32 1e-05, %v3002_v57  ;;  %v2987_v38 = vadd.f32 %v2986_v44, %v2985_v4 }
 0x3f2   : > { %v3137_v50 = vadd.f32 %v3136_v43, %v3135_v20  ;;  %v3406_v58 = vmul.f32 %v5877_v52, %v3074_v45  ;;  %v7873_v8 = vrot.slane %v3021_v59, %v7687_v42  ;;  %5894 = vrcp.f32 %v3360_v14 }
 0x3f3   : > { %v3208_v21 = vrot.slane %v3207_v11, 2  ;;  %v3363_v27 = vadd.f32 1.0, %v5885_v3  ;;  %v3040_v47 = vmul.f32 %v7777_v12, %v7542_v17  ;;  %v3421_v51 = vadd.f32 %v3405_v22, %v7381_v30 }
 0x3f4   : > { %v3138_v37 = vrot.slane %v3137_v50, 1  ;;  %v3043_v39 = vmul.f32 %v7556_v33, %v7777_v12  ;;  %v3046_v31 = vmul.f32 %v3031_v19, %v7636_v61  ;;  %v2917_v4 = vadd.f32 %v2916_v6, %v2915_v16 }
 0x3f5   : > { %v3209_v63 = vadd.f32 %v3208_v21, %v3207_v11  ;;  %5896 = vrcp.f32 %v3361_v26  ;;  %v2988_v52 = vrot.slane %v2987_v38, 2  ;;  %v3072_v28 = vadd.f32 %v7794_v25, %v3040_v47 }
 0x3f6   : > { %5898 = vrsqrt.f32 %v3006_v1  ;;  %v3422_v62 = vadd.f32 %v3406_v58, %v7389_v29  ;;  %v3078_v55 = vadd.f32 %v7873_v8, %v3046_v31  ;;  %v3139_v17 = vadd.f32 %v3138_v37, %v3137_v50 }
 0x3f7   : > { %v5887_v56 = vpop.eup %5886  ;;  %v3210_v46 = vrot.slane %v3209_v63, 1  ;;  %5900 = vrcp.f32 %v3363_v27  ;;  %v7885_v12 = vmul.f32 0.70710677, %v3421_v51  ;;  %v3075_v61 = vadd.f32 %v7794_v25, %v3043_v39 }
 0x3f8   : > { %v5889_v30 = vpop.eup %5888  ;;  %v3234_v33 = vmul.f32 %v7694_v36, %v5887_v56  ;;  %v3044_v16 = vmul.f32 %v3031_v19, %v7602_v7  ;;  %v2918_v44 = vrot.slane %v2917_v4, 1  ;;  %v7889_v20 = vmul.f32 0.03125, %v3139_v17 }
 0x3f9   : > { %v5891_v57 = vpop.eup %5890  ;;  %v3211_v29 = vadd.f32 %v3210_v46, %v3209_v63  ;;  %v3404_v45 = vmul.f32 %v5889_v30, %v3072_v28  ;;  %v2989_v3 = vadd.f32 %v2988_v52, %v2987_v38  ;;  %v7893_v43 = vmul.f32 0.70710677, %v3422_v62 }
 0x3fa   : > { %v3238_v59 = vmul.f32 %v3234_v33, %v7814_v24  ;;  %v3255_v2 = vrot.slane %v3234_v33, %v7687_v42  ;;  %v3219_v6 = vmul.f32 %v7889_v20, %v7889_v20  ;;  %v3407_v7 = vmul.f32 %v5891_v57, %v3075_v61 }
 0x3fb   : > { %v3215_v22 = vmul.f32 0.03125, %v3211_v29  ;;  %v3420_v25 = vadd.f32 %v3404_v45, %v7385_v54  ;;  %v3076_v14 = vadd.f32 %v7873_v8, %v3044_v16  ;;  %v3045_v26 = vmul.f32 %v7589_v35, %v3031_v19 }
 0x3fc   : > { %v3242_v11 = vsub.f32 %v7704_v13, %v3238_v59  ;;  %v3047_v24 = vmul.f32 %v7616_v18, %v3031_v19  ;;  %v3268_v38 = vmul.f32 %v3255_v2, %v7701_v10  ;;  %v3269_v50 = vmul.f32 %v7691_v41, %v3255_v2 }
 0x3fd   : > { %v2919_v58 = vadd.f32 %v2918_v44, %v2917_v4  ;;  %v3223_v21 = vsub.f32 %v3215_v22, %v3219_v6  ;;  %v3270_v27 = vmul.f32 %v3255_v2, %v7743_v23  ;;  %v3271_v54 = vmul.f32 %v7724_v5, %v3255_v2 }
 0x3fe   : > { %v5893_v1 = vpop.eup %5892  ;;  %v3287_v37 = vrot.slane %v3242_v11, %v7687_v42  ;;  %v7907_v47 = vmul.f32 0.70710677, %v3420_v25  ;;  %v2990_v51 = vrot.slane %v2989_v3, 1  ;;  %v3423_v35 = vadd.f32 %v3407_v7, %v7410_v60 }
 0x3ff   : > { %v3227_v39 = vadd.f32 1e-05, %v3223_v21  ;;  %v3410_v18 = vmul.f32 %v5893_v1, %v3078_v55  ;;  %v5895_v19 = vpop.eup %5894  ;;  %v3077_v23 = vadd.f32 %v7873_v8, %v3045_v26  ;;  %v3079_v60 = vadd.f32 %v7873_v8, %v3047_v24 }
 0x400   : > { %v3300_v31 = vadd.f32 %v3287_v37, %v3268_v38  ;;  %v3301_v10 = vadd.f32 %v3287_v37, %v3269_v50  ;;  %v3302_v63 = vadd.f32 %v3287_v37, %v3270_v27  ;;  %v3303_v41 = vadd.f32 %v3287_v37, %v3271_v54  ;;  %5527 = vmatprep.mubr.msk.f32.mxu0 %vm634_vm1, %v7907_v47  ;;  %v8695_v37 = vld [vmem:[#allocation21_spill] sm:$0xff] }
 0x401   : > { %5559 = vmatprep.mubr.msk.f32.mxu1 %vm634_vm1, %v7907_v47  ;;  %5528 = vmatmul.mubr.msk.f32.vlgmr.msra.gmra.mxu0 %vm634_vm1, %v7885_v12  ;;  %v3408_v5 = vmul.f32 %v5895_v19, %v3076_v14  ;;  %5902 = vrsqrt.f32 %v3227_v39  ;;  %v7924_v17 = vmul.f32 0.70710677, %v3423_v35  ;;  %v7927_v33 = vmul.f32 0.03125, %v2919_v58 }
 0x402   : > { %v5897_v4 = vpop.eup %5896  ;;  %v5057_v52 = vmul.f32 -1.442695, %v3300_v31  ;;  %v5058_v28 = vmul.f32 -1.442695, %v3301_v10  ;;  %v5059_v62 = vmul.f32 -1.442695, %v3302_v63  ;;  %5560 = vmatmul.mubr.msk.f32.vlgmr.msra.gmra.mxu1 %vm634_vm1, %v7885_v12  ;;  %5530 = vmatprep.mubr.msk.f32.mxu0 %vm634_vm1, %v7893_v43  ;;  %v2991_v61 = vadd.f32 %v2990_v51, %v2989_v3 }
 0x403   : > { %v5899_v56 = vpop.eup %5898  ;;  %v5060_v55 = vmul.f32 -1.442695, %v3303_v41  ;;  %5562 = vmatprep.mubr.msk.f32.mxu1 %vm634_vm1, %v7893_v43  ;;  %v3424_v8 = vadd.f32 %v3408_v5, %v7421_v48  ;;  %v3409_v46 = vmul.f32 %v5897_v4, %v3077_v23  ;;  %v3426_v16 = vadd.f32 %v3410_v18, %v7434_v40 }
 0x404   : > { %v5901_v30 = vpop.eup %5900  ;;  %5904 = vpow2.f32 %v5057_v52  ;;  %v2995_v45 = vmul.f32 0.03125, %v2991_v61  ;;  %v3014_v22 = vmul.f32 %v7708_v32, %v5899_v56  ;;  %v8698_v52 = vld [vmem:[#allocation33_spill] sm:$0xff] }
 0x405   : > { %5906 = vpow2.f32 %v5058_v28  ;;  %5531 = vmatmul.mubr.msk.f32.gmra.mxu0 %vm634_vm1, %v7924_v17  ;;  %v7932_v57 = vmul.f32 0.70710677, %v3424_v8  ;;  %v3425_v44 = vadd.f32 %v3409_v46, %v7430_v9  ;;  %v3411_v29 = vmul.f32 %v5901_v30, %v3079_v60  ;;  %v8697_v60 = vld [vmem:[#allocation30_spill] sm:$0xff] }
 0x406   : > { %5908 = vpow2.f32 %v5059_v62  ;;  %5563 = vmatmul.mubr.msk.f32.gmra.mxu1 %vm634_vm1, %v7924_v17  ;;  %v2999_v9 = vmul.f32 %v7927_v33, %v7927_v33  ;;  %v7946_v59 = vmul.f32 0.70710677, %v3426_v16  ;;  %v3018_v58 = vmul.f32 %v3014_v22, %v7807_v53 }
 0x407   : > { %5910 = vpow2.f32 %v5060_v55  ;;  %5533 = vmatprep.mubr.msk.f32.mxu0 %vm634_vm1, %v7932_v57  ;;  %5565 = vmatprep.mubr.msk.f32.mxu1 %vm634_vm1, %v7932_v57  ;;  %v7941_v48 = vmul.f32 0.70710677, %v3425_v44  ;;  %v3427_v40 = vadd.f32 %v3411_v29, %v7445_v0  ;;  %v8699_v55 = vld [vmem:[#allocation20_spill] sm:$0xff]  ;;  %v8700_v29 = vld [vmem:[#allocation29_spill] sm:$0xff] }
 0x408   : > { %v3003_v0 = vsub.f32 %v2995_v45, %v2999_v9 }
 0x409   : > { %5534 = vmatmul.mubr.msk.f32.gmra.mxu0 %vm634_vm1, %v7941_v48  ;;  %v7956_v2 = vmul.f32 0.70710677, %v3427_v40 }
 0x40a   : > { %5566 = vmatmul.mubr.msk.f32.gmra.mxu1 %vm634_vm1, %v7941_v48  ;;  %5536 = vmatprep.mubr.msk.f32.mxu0 %vm634_vm1, %v7946_v59  ;;  %v3007_v6 = vadd.f32 1e-05, %v3003_v0  ;;  %v8701_v0 = vld [vmem:[#allocation32_spill] sm:$0xff] }
 0x40b   : > { %5568 = vmatprep.mubr.msk.f32.mxu1 %vm634_vm1, %v7946_v59 }
 0x40c   : > { %5912 = vrsqrt.f32 %v3007_v6 }
 0x40d   : > { %5537 = vmatmul.mubr.msk.f32.gmra.mxu0 %vm634_vm1, %v7956_v2 }
 0x40e   : > { %5569 = vmatmul.mubr.msk.f32.gmra.mxu1 %vm634_vm1, %v7956_v2  ;;  %v5903_v3 = vpop.eup %5902 }
 0x40f   : > { %v3235_v25 = vmul.f32 %v7694_v36, %v5903_v3 }
 0x411   : > { %v5905_v7 = vpop.eup %5904  ;;  %v3239_v14 = vmul.f32 %v3235_v25, %v7889_v20  ;;  %v3259_v26 = vrot.slane %v3235_v25, %v7687_v42  ;;  %v8696_v20 = vld [vmem:[#allocation24_spill] sm:$0xff] }
 0x412   : > { %v5907_v11 = vpop.eup %5906  ;;  %v3364_v24 = vadd.f32 1.0, %v5905_v7  ;;  %v8702_v7 = vld [vmem:[#allocation28_spill] sm:$0xff] }
 0x413   : > { %v5909_v1 = vpop.eup %5908  ;;  %v3365_v38 = vadd.f32 1.0, %v5907_v11  ;;  %v3243_v27 = vsub.f32 %v7704_v13, %v3239_v14  ;;  %v3272_v54 = vmul.f32 %v3259_v26, %v7800_v49  ;;  %v3273_v36 = vmul.f32 %v8695_v37, %v3259_v26 }
 0x414   : > { %v5911_v50 = vpop.eup %5910  ;;  %v3366_v21 = vadd.f32 1.0, %v5909_v1  ;;  %v3274_v51 = vmul.f32 %v3259_v26, %v7838_v34  ;;  %5914 = vrcp.f32 %v3364_v24  ;;  %v3275_v39 = vmul.f32 %v8696_v20, %v3259_v26  ;;  %v8704_v26 = vld [vmem:[#allocation26_spill] sm:$0xff] }
 0x415   : > { %v3291_v35 = vrot.slane %v3243_v27, %v7687_v42  ;;  %v3367_v18 = vadd.f32 1.0, %v5911_v50  ;;  %v3022_v13 = vsub.f32 %v7772_v15, %v3018_v58  ;;  %v3035_v34 = vrot.slane %v3014_v22, %v7687_v42 }
 0x416   : > { %5916 = vrcp.f32 %v3366_v21  ;;  %v8706_v21 = vld [vmem:[#allocation25_spill] sm:$0xff] }
 0x417   : > { %5918 = vrcp.f32 %v3365_v38  ;;  %v3304_v19 = vadd.f32 %v3291_v35, %v3272_v54  ;;  %v3305_v53 = vadd.f32 %v3291_v35, %v3273_v36  ;;  %v3306_v31 = vadd.f32 %v3291_v35, %v3274_v51 }
 0x418   : > { %v3307_v10 = vadd.f32 %v3291_v35, %v3275_v39  ;;  %5920 = vrcp.f32 %v3367_v18  ;;  %v3067_v23 = vrot.slane %v3022_v13, %v7687_v42  ;;  %v3048_v4 = vmul.f32 %v3035_v34, %v8697_v60 }
 0x419   : > { %v5061_v49 = vmul.f32 -1.442695, %v3304_v19  ;;  %v5062_v63 = vmul.f32 -1.442695, %v3305_v53  ;;  %v5063_v41 = vmul.f32 -1.442695, %v3306_v31  ;;  %v3050_v28 = vmul.f32 %v3035_v34, %v8698_v52  ;;  %v5913_v62 = vpop.eup %5912 }
 0x41a   : > { %v5064_v5 = vmul.f32 -1.442695, %v3307_v10  ;;  %v3080_v56 = vadd.f32 %v3067_v23, %v3048_v4  ;;  %v3049_v8 = vmul.f32 %v8699_v55, %v3035_v34  ;;  %v3051_v40 = vmul.f32 %v8700_v29, %v3035_v34  ;;  %v8709_v10 = vld [vmem:[#allocation22_spill] sm:$0xff]  ;;  %v8712_v4 = vld [vmem:[#allocation23_spill] sm:$0xff] }
 0x41b   : > { %5922 = vpow2.f32 %v5061_v49  ;;  %v3082_v30 = vadd.f32 %v3067_v23, %v3050_v28  ;;  %v3015_v38 = vmul.f32 %v7708_v32, %v5913_v62  ;;  %v8710_v49 = vld [vmem:[#allocation31_spill] sm:$0xff] }
 0x41c   : > { %5924 = vpow2.f32 %v5062_v63  ;;  %v3081_v44 = vadd.f32 %v3067_v23, %v3049_v8  ;;  %v3083_v6 = vadd.f32 %v3067_v23, %v3051_v40 }
 0x41d   : > { %5926 = vpow2.f32 %v5063_v41  ;;  %v3019_v39 = vmul.f32 %v3015_v38, %v7927_v33  ;;  %v3039_v53 = vrot.slane %v3015_v38, %v7687_v42  ;;  %v8711_v41 = vld [vmem:[#allocation34_spill] sm:$0xff] }
 0x41e   : > { %5928 = vpow2.f32 %v5064_v5 }
 0x41f   : > { %v3023_v33 = vsub.f32 %v7772_v15, %v3019_v39  ;;  %v3052_v13 = vmul.f32 %v3039_v53, %v8709_v10  ;;  %v3053_v63 = vmul.f32 %v8710_v49, %v3039_v53  ;;  %v3054_v34 = vmul.f32 %v3039_v53, %v8711_v41 }
 0x420   : > { %v3055_v52 = vmul.f32 %v8712_v4, %v3039_v53 }
 0x421   : > { %v5915_v46 = vpop.eup %5914  ;;  %v3071_v31 = vrot.slane %v3023_v33, %v7687_v42 }
 0x422   : > { %v3412_v16 = vmul.f32 %v5915_v46, %v3080_v56 }
 0x423   : > { %v5917_v61 = vpop.eup %5916  ;;  %v3084_v5 = vadd.f32 %v3071_v31, %v3052_v13  ;;  %v3085_v60 = vadd.f32 %v3071_v31, %v3053_v63  ;;  %v3086_v62 = vadd.f32 %v3071_v31, %v3054_v34  ;;  %v3087_v8 = vadd.f32 %v3071_v31, %v3055_v52 }
 0x424   : > { %v5919_v45 = vpop.eup %5918  ;;  %v3414_v9 = vmul.f32 %v5917_v61, %v3082_v30  ;;  %v3428_v3 = vadd.f32 %v3412_v16, %v8701_v0  ;;  %v8713_v30 = vld [vmem:[#allocation27_spill] sm:$0xff]  ;;  %v8714_v16 = vld [vmem:[#allocation17_spill] sm:$0xff] }
 0x425   : > { %v3413_v22 = vmul.f32 %v5919_v45, %v3081_v44  ;;  %v5921_v25 = vpop.eup %5920  ;;  %v8716_v45 = vld [vmem:[#allocation19_spill] sm:$0xff] }
 0x426   : > { %v3430_v11 = vadd.f32 %v3414_v9, %v8702_v7  ;;  %v7982_v14 = vmul.f32 0.70710677, %v3428_v3  ;;  %v3415_v1 = vmul.f32 %v5921_v25, %v3083_v6  ;;  %v8718_v3 = vld [vmem:[#allocation18_spill] sm:$0xff] }
 0x427   : > { %v3429_v24 = vadd.f32 %v3413_v22, %v8704_v26 }
 0x428   : > { %8703 = vst [vmem:[#allocation21_spill] sm:$0xff] %v7982_v14  ;;  %v5923_v50 = vpop.eup %5922  ;;  %5539 = vmatprep.mubr.msk.f32.mxu0 %vm634_vm1, %v7982_v14  ;;  %5571 = vmatprep.mubr.msk.f32.mxu1 %vm634_vm1, %v7982_v14  ;;  %v3431_v27 = vadd.f32 %v3415_v1, %v8706_v21  ;;  %v7993_v37 = vmul.f32 0.70710677, %v3430_v11 }
 0x429   : > { %v7990_v58 = vmul.f32 0.70710677, %v3429_v24  ;;  %v5925_v54 = vpop.eup %5924  ;;  %v3368_v36 = vadd.f32 1.0, %v5923_v50 }
 0x42a   : > { %8707 = vst [vmem:[#allocation30_spill] sm:$0xff] %v7993_v37  ;;  %v5927_v51 = vpop.eup %5926  ;;  %v3369_v32 = vadd.f32 1.0, %v5925_v54  ;;  %v8004_v18 = vmul.f32 0.70710677, %v3431_v27 }
 0x42b   : > { %8705 = vst [vmem:[#allocation24_spill] sm:$0xff] %v7990_v58  ;;  %5540 = vmatmul.mubr.msk.f32.gmra.mxu0 %vm634_vm1, %v7990_v58  ;;  %5572 = vmatmul.mubr.msk.f32.gmra.mxu1 %vm634_vm1, %v7990_v58  ;;  %v5929_v20 = vpop.eup %5928  ;;  %v3370_v35 = vadd.f32 1.0, %v5927_v51  ;;  %5930 = vrcp.f32 %v3368_v36 }
 0x42c   : > { %5542 = vmatprep.mubr.msk.f32.mxu0 %vm634_vm1, %v7993_v37  ;;  %5574 = vmatprep.mubr.msk.f32.mxu1 %vm634_vm1, %v7993_v37  ;;  %8708 = vst [vmem:[#allocation33_spill] sm:$0xff] %v8004_v18  ;;  %5932 = vrcp.f32 %v3369_v32  ;;  %v3371_v19 = vadd.f32 1.0, %v5929_v20 }
 0x42d   : > { %5934 = vrcp.f32 %v3370_v35 }
 0x42e   : > { %5936 = vrcp.f32 %v3371_v19 }
 0x42f   : > { %5543 = vmatmul.mubr.msk.f32.gmra.mxu0 %vm634_vm1, %v8004_v18  ;;  %5575 = vmatmul.mubr.msk.f32.gmra.mxu1 %vm634_vm1, %v8004_v18 }
 0x438   : > { %v5931_v23 = vpop.eup %5930 }
 0x439   : > { %v5933_v28 = vpop.eup %5932  ;;  %v3416_v56 = vmul.f32 %v5931_v23, %v3084_v5 }
 0x43a   : > { %v5935_v55 = vpop.eup %5934  ;;  %v3417_v15 = vmul.f32 %v5933_v28, %v3085_v60 }
 0x43b   : > { %v5937_v46 = vpop.eup %5936  ;;  %v3432_v42 = vadd.f32 %v3416_v56, %v8713_v30  ;;  %v3418_v61 = vmul.f32 %v5935_v55, %v3086_v62 }
 0x43c   : > { %v3433_v44 = vadd.f32 %v3417_v15, %v8714_v16  ;;  %v3419_v29 = vmul.f32 %v5937_v46, %v3087_v8 }
 0x43d   : > { %v8019_v40 = vmul.f32 0.70710677, %v3432_v42  ;;  %v3434_v9 = vadd.f32 %v3418_v61, %v8716_v45 }
 0x43e   : > { %v8022_v0 = vmul.f32 0.70710677, %v3433_v44  ;;  %v3435_v22 = vadd.f32 %v3419_v29, %v8718_v3 }
 0x43f   : > { %8715 = vst [vmem:[#allocation20_spill] sm:$0xff] %v8019_v40  ;;  %5545 = vmatprep.mubr.msk.f32.mxu0 %vm634_vm1, %v8019_v40  ;;  %5577 = vmatprep.mubr.msk.f32.mxu1 %vm634_vm1, %v8019_v40  ;;  %v8029_v6 = vmul.f32 0.70710677, %v3434_v9 }
 0x440   : > { %8717 = vst [vmem:[#allocation29_spill] sm:$0xff] %v8022_v0  ;;  %5546 = vmatmul.mubr.msk.f32.gmra.mxu0 %vm634_vm1, %v8022_v0  ;;  %5578 = vmatmul.mubr.msk.f32.gmra.mxu1 %vm634_vm1, %v8022_v0  ;;  %v8039_v25 = vmul.f32 0.70710677, %v3435_v22 }
 0x441   : > { %8719 = vst [vmem:[#allocation32_spill] sm:$0xff] %v8029_v6  ;;  %5548 = vmatprep.mubr.msk.f32.mxu0 %vm634_vm1, %v8029_v6  ;;  %5580 = vmatprep.mubr.msk.f32.mxu1 %vm634_vm1, %v8029_v6 }
 0x442   : > { %8720 = vst [vmem:[#allocation28_spill] sm:$0xff] %v8039_v25 }
 0x444   : > { %5549 = vmatmul.mubr.msk.f32.gmra.mxu0 %vm634_vm1, %v8039_v25  ;;  %5581 = vmatmul.mubr.msk.f32.gmra.mxu1 %vm634_vm1, %v8039_v25 }
 0x4c1   : > { %v8045_v7 = vpop.f32.mrf.mxu0 }
 0x4c2   : > { %v3871_v11 = vmul.f32 %v8045_v7, %v8045_v7  ;;  %v8049_v26 = vpop.f32.mrf.mxu1  ;;  %v3815_v38 = vsel %vm634_vm1, %v8045_v7, 0.0 }
 0x4c3   : > { %v4091_v24 = vmul.f32 %v8049_v26, %v8049_v26  ;;  %v8053_v1 = vpop.f32.mrf.mxu0  ;;  %v4035_v50 = vsel %vm634_vm1, %v8049_v26, 0.0 }
 0x4c4   : > { %v3814_v21 = vsel %vm634_vm1, %v8053_v1, 0.0  ;;  %v3870_v27 = vmul.f32 %v8053_v1, %v8053_v1  ;;  %v8063_v54 = vpop.f32.mrf.mxu1  ;;  %v3887_v36 = vsel %vm634_vm1, %v3871_v11, 0.0 }
 0x4c5   : > { %v4107_v51 = vsel %vm634_vm1, %v4091_v24, 0.0  ;;  %v4034_v32 = vsel %vm634_vm1, %v8063_v54, 0.0  ;;  %v4090_v20 = vmul.f32 %v8063_v54, %v8063_v54  ;;  %v8071_v39 = vpop.f32.mrf.mxu0  ;;  %v3816_v35 = vadd.f32 %v3815_v38, %v3814_v21 }
 0x4c6   : > { %v3886_v19 = vsel %vm634_vm1, %v3870_v27, 0.0  ;;  %v4036_v33 = vadd.f32 %v4035_v50, %v4034_v32  ;;  %v3873_v53 = vmul.f32 %v8071_v39, %v8071_v39  ;;  %v8076_v31 = vpop.f32.mrf.mxu1  ;;  %v3819_v49 = vsel %vm634_vm1, %v8071_v39, 0.0 }
 0x4c7   : > { %v3888_v10 = vadd.f32 %v3887_v36, %v3886_v19  ;;  %v4106_v13 = vsel %vm634_vm1, %v4090_v20, 0.0  ;;  %v4093_v63 = vmul.f32 %v8076_v31, %v8076_v31  ;;  %v8083_v41 = vpop.f32.mrf.mxu0  ;;  %v4039_v5 = vsel %vm634_vm1, %v8076_v31, 0.0 }
 0x4c8   : > { %v4108_v34 = vadd.f32 %v4107_v51, %v4106_v13  ;;  %v3817_v23 = vsel %vm634_vm1, %v8083_v41, 0.0  ;;  %v3872_v60 = vmul.f32 %v8083_v41, %v8083_v41  ;;  %v8091_v4 = vpop.f32.mrf.mxu1  ;;  %v3891_v52 = vsel %vm634_vm1, %v3873_v53, 0.0 }
 0x4c9   : > { %v3818_v28 = vadd.f32 %v3817_v23, %v3816_v35  ;;  %v4037_v62 = vsel %vm634_vm1, %v8091_v4, 0.0  ;;  %v4092_v56 = vmul.f32 %v8091_v4, %v8091_v4  ;;  %v8098_v55 = vpop.f32.mrf.mxu0  ;;  %v4111_v15 = vsel %vm634_vm1, %v4093_v63, 0.0 }
 0x4ca   : > { %v3889_v8 = vsel %vm634_vm1, %v3872_v60, 0.0  ;;  %v4038_v46 = vadd.f32 %v4037_v62, %v4036_v33  ;;  %v3875_v30 = vmul.f32 %v8098_v55, %v8098_v55  ;;  %v8104_v42 = vpop.f32.mrf.mxu1  ;;  %v3828_v29 = vsel %vm634_vm1, %v8098_v55, 0.0 }
 0x4cb   : > { %v3820_v61 = vadd.f32 %v3819_v49, %v3818_v28  ;;  %v3890_v16 = vadd.f32 %v3889_v8, %v3888_v10  ;;  %v4109_v44 = vsel %vm634_vm1, %v4092_v56, 0.0  ;;  %v8109_v45 = vpop.f32.mrf.mxu0  ;;  %v4048_v22 = vsel %vm634_vm1, %v8104_v42, 0.0 }
 0x4cc   : > { %v4040_v9 = vadd.f32 %v4039_v5, %v4038_v46  ;;  %v4110_v3 = vadd.f32 %v4109_v44, %v4108_v34  ;;  %v4095_v11 = vmul.f32 %v8104_v42, %v8104_v42  ;;  %v8115_v24 = vpop.f32.mrf.mxu1  ;;  %v3827_v21 = vsel %vm634_vm1, %v8109_v45, 0.0 }
 0x4cd   : > { %v3821_v38 = vrot.slane %v3820_v61, 4  ;;  %v3892_v50 = vadd.f32 %v3891_v52, %v3890_v16  ;;  %v3874_v27 = vmul.f32 %v8109_v45, %v8109_v45  ;;  %v3900_v32 = vsel %vm634_vm1, %v3875_v30, 0.0  ;;  %v8123_v35 = vpop.f32.mrf.mxu0 }
 0x4ce   : > { %v4041_v36 = vrot.slane %v4040_v9, 4  ;;  %v4112_v51 = vadd.f32 %v4111_v15, %v4110_v3  ;;  %v4120_v20 = vsel %vm634_vm1, %v4095_v11, 0.0  ;;  %v4047_v10 = vsel %vm634_vm1, %v8115_v24, 0.0  ;;  %v8128_v5 = vpop.f32.mrf.mxu1 }
 0x4cf   : > { %v3822_v19 = vadd.f32 %v3821_v38, %v3820_v61  ;;  %v3893_v33 = vrot.slane %v3892_v50, 4  ;;  %v3899_v53 = vsel %vm634_vm1, %v3874_v27, 0.0  ;;  %v3829_v63 = vadd.f32 %v3828_v29, %v3827_v21  ;;  %v8136_v46 = vpop.f32.mrf.mxu0 }
 0x4d0   : > { %v4042_v13 = vadd.f32 %v4041_v36, %v4040_v9  ;;  %v4113_v49 = vrot.slane %v4112_v51, 4  ;;  %v3901_v34 = vadd.f32 %v3900_v32, %v3899_v53  ;;  %v4049_v52 = vadd.f32 %v4048_v22, %v4047_v10  ;;  %v8143_v11 = vpop.f32.mrf.mxu1 }
 0x4d1   : > { %v3823_v23 = vrot.slane %v3822_v19, 2  ;;  %v3894_v60 = vadd.f32 %v3893_v33, %v3892_v50  ;;  %v4094_v28 = vmul.f32 %v8115_v24, %v8115_v24  ;;  %v3832_v15 = vsel %vm634_vm1, %v8123_v35, 0.0 }
 0x4d2   : > { %v4043_v62 = vrot.slane %v4042_v13, 2  ;;  %v4114_v56 = vadd.f32 %v4113_v49, %v4112_v51  ;;  %v3877_v8 = vmul.f32 %v8123_v35, %v8123_v35  ;;  %v4052_v44 = vsel %vm634_vm1, %v8128_v5, 0.0 }
 0x4d3   : > { %v3824_v30 = vadd.f32 %v3823_v23, %v3822_v19  ;;  %v3895_v61 = vrot.slane %v3894_v60, 2  ;;  %v4119_v16 = vsel %vm634_vm1, %v4094_v28, 0.0  ;;  %v4097_v22 = vmul.f32 %v8128_v5, %v8128_v5 }
 0x4d4   : > { %v4044_v29 = vadd.f32 %v4043_v62, %v4042_v13  ;;  %v4115_v9 = vrot.slane %v4114_v56, 2  ;;  %v4121_v3 = vadd.f32 %v4120_v20, %v4119_v16  ;;  %v3904_v21 = vsel %vm634_vm1, %v3877_v8, 0.0 }
 0x4d5   : > { %v3825_v38 = vrot.slane %v3824_v30, 1  ;;  %v3896_v50 = vadd.f32 %v3895_v61, %v3894_v60  ;;  %v3830_v27 = vsel %vm634_vm1, %v8136_v46, 0.0  ;;  %v3876_v19 = vmul.f32 %v8136_v46, %v8136_v46 }
 0x4d6   : > { %v4045_v36 = vrot.slane %v4044_v29, 1  ;;  %v4116_v51 = vadd.f32 %v4115_v9, %v4114_v56  ;;  %v3831_v32 = vadd.f32 %v3830_v27, %v3829_v63  ;;  %v4050_v53 = vsel %vm634_vm1, %v8143_v11, 0.0 }
 0x4d7   : > { %v3826_v33 = vadd.f32 %v3825_v38, %v3824_v30  ;;  %v3897_v20 = vrot.slane %v3896_v50, 1  ;;  %v4096_v10 = vmul.f32 %v8143_v11, %v8143_v11  ;;  %v3902_v60 = vsel %vm634_vm1, %v3876_v19, 0.0 }
 0x4d8   : > { %v4046_v13 = vadd.f32 %v4045_v36, %v4044_v29  ;;  %v4117_v49 = vrot.slane %v4116_v51, 1  ;;  %v3833_v23 = vadd.f32 %v3832_v15, %v3831_v32  ;;  %v3903_v63 = vadd.f32 %v3902_v60, %v3901_v34 }
 0x4d9   : > { %v8155_v28 = vmul.f32 0.03125, %v3826_v33  ;;  %v3898_v62 = vadd.f32 %v3897_v20, %v3896_v50  ;;  %v4051_v56 = vadd.f32 %v4050_v53, %v4049_v52  ;;  %v4122_v16 = vsel %vm634_vm1, %v4096_v10, 0.0 }
 0x4da   : > { %v4086_v8 = vmul.f32 0.03125, %v4046_v13  ;;  %v4118_v61 = vadd.f32 %v4117_v49, %v4116_v51  ;;  %v3834_v30 = vrot.slane %v3833_v23, 4  ;;  %v3905_v27 = vadd.f32 %v3904_v21, %v3903_v63 }
 0x4db   : > { %v3938_v9 = vmul.f32 0.03125, %v3898_v62  ;;  %v3942_v38 = vmul.f32 %v8155_v28, %v8155_v28  ;;  %v4053_v29 = vadd.f32 %v4052_v44, %v4051_v56  ;;  %v4123_v19 = vadd.f32 %v4122_v16, %v4121_v3 }
 0x4dc   : > { %v4158_v36 = vmul.f32 0.03125, %v4118_v61  ;;  %v4162_v15 = vmul.f32 %v4086_v8, %v4086_v8  ;;  %v3835_v32 = vadd.f32 %v3834_v30, %v3833_v23  ;;  %v4124_v33 = vsel %vm634_vm1, %v4097_v22, 0.0 }
 0x4dd   : > { %v3906_v50 = vrot.slane %v3905_v27, 4  ;;  %v4054_v34 = vrot.slane %v4053_v29, 4  ;;  %v4125_v51 = vadd.f32 %v4124_v33, %v4123_v19  ;;  %v3946_v53 = vsub.f32 %v3938_v9, %v3942_v38 }
 0x4de   : > { %v4166_v52 = vsub.f32 %v4158_v36, %v4162_v15  ;;  %v3836_v20 = vrot.slane %v3835_v32, 2 }
 0x4df   : > { %v3907_v13 = vadd.f32 %v3906_v50, %v3905_v27  ;;  %v4055_v10 = vadd.f32 %v4054_v34, %v4053_v29  ;;  %v4126_v62 = vrot.slane %v4125_v51, 4  ;;  %v3950_v23 = vadd.f32 1e-05, %v3946_v53 }
 0x4e0   : > { %v4170_v49 = vadd.f32 1e-05, %v4166_v52  ;;  %v3837_v60 = vadd.f32 %v3836_v20, %v3835_v32 }
 0x4e1   : > { %v3908_v25 = vrot.slane %v3907_v13, 2  ;;  %v4056_v21 = vrot.slane %v4055_v10, 2  ;;  %v4127_v63 = vadd.f32 %v4126_v62, %v4125_v51  ;;  %v8721_v51 = vld [vmem:[#allocation16_spill] sm:$0xff] }
 0x4e2   : > { %5938 = vrsqrt.f32 %v4170_v49  ;;  %v3838_v44 = vrot.slane %v3837_v60, 1  ;;  %v8176_v53 = vsub.s32 3, %v8721_v51  ;;  %v8179_v49 = vld [vmem:[%s6406_s21] sm:$0xf] }
 0x4e3   : > { %v3909_v3 = vadd.f32 %v3908_v25, %v3907_v13  ;;  %v4057_v56 = vadd.f32 %v4056_v21, %v4055_v10  ;;  %v4128_v22 = vrot.slane %v4127_v63, 2  ;;  %5940 = vrsqrt.f32 %v3950_v23 }
 0x4e4   : > { %v3839_v61 = vadd.f32 %v3838_v44, %v3837_v60 }
 0x4e5   : > { %v3910_v30 = vrot.slane %v3909_v3, 1  ;;  %v4058_v16 = vrot.slane %v4057_v56, 1  ;;  %v4129_v36 = vadd.f32 %v4128_v22, %v4127_v63 }
 0x4e6   : > { %v8161_v27 = vmul.f32 0.03125, %v3839_v61 }
 0x4e7   : > { %v4059_v9 = vadd.f32 %v4058_v16, %v4057_v56  ;;  %v4130_v38 = vrot.slane %v4129_v36, 1  ;;  %v3911_v29 = vadd.f32 %v3910_v30, %v3909_v3  ;;  %v8194_v16 = vld [vmem:[%s6414_s20] sm:$0xf] }
 0x4e8   : > { %v3943_v52 = vmul.f32 %v8161_v27, %v8161_v27 }
 0x4e9   : > { %v8163_v15 = vmul.f32 0.03125, %v4059_v9  ;;  %v4131_v32 = vadd.f32 %v4130_v38, %v4129_v36  ;;  %v3939_v34 = vmul.f32 0.03125, %v3911_v29 }
 0x4eb   : > { %v4163_v19 = vmul.f32 %v8163_v15, %v8163_v15  ;;  %v8167_v25 = vpop.f32.mrf.mxu0  ;;  %v4159_v33 = vmul.f32 0.03125, %v4131_v32  ;;  %v8169_v50 = vpop.f32.mrf.mxu1  ;;  %v3947_v63 = vsub.f32 %v3939_v34, %v3943_v52 }
 0x4ec   : > { %v3879_v23 = vmul.f32 %v8167_v25, %v8167_v25  ;;  %v3841_v61 = vsel %vm634_vm1, %v8167_v25, 0.0  ;;  %v4061_v9 = vsel %vm634_vm1, %v8169_v50, 0.0 }
 0x4ed   : > { %v8173_v20 = vpop.f32.mrf.mxu0  ;;  %v4167_v13 = vsub.f32 %v4159_v33, %v4163_v19  ;;  %v8184_v44 = vpop.f32.mrf.mxu1  ;;  %v3951_v19 = vadd.f32 1e-05, %v3947_v63 }
 0x4ee   : > { %v3878_v21 = vmul.f32 %v8173_v20, %v8173_v20  ;;  %v3913_v33 = vsel %vm634_vm1, %v3879_v23, 0.0  ;;  %v4060_v34 = vsel %vm634_vm1, %v8184_v44, 0.0 }
 0x4ef   : > { %v5939_v10 = vpop.eup %5938  ;;  %v4171_v62 = vadd.f32 1e-05, %v4167_v13  ;;  %v8189_v22 = vpop.f32.mrf.mxu0 }
 0x4f0   : > { %v4178_v60 = vmul.f32 %v8179_v49, %v5939_v10  ;;  %v5941_v30 = vpop.eup %5940  ;;  %v3912_v38 = vsel %vm634_vm1, %v3878_v21, 0.0  ;;  %v8202_v29 = vpop.f32.mrf.mxu1  ;;  %v4099_v21 = vmul.f32 %v8169_v50, %v8169_v50 }
 0x4f1   : > { %5942 = vrsqrt.f32 %v4171_v62  ;;  %v8215_v62 = vld [vmem:[%s6440_s26] sm:$0xf]  ;;  %v3914_v23 = vadd.f32 %v3913_v33, %v3912_v38 }
 0x4f2   : > { %v4182_v3 = vmul.f32 %v4178_v60, %v4086_v8  ;;  %v4193_v56 = vrot.slane %v4178_v60, %v8176_v53  ;;  %v3840_v8 = vsel %vm634_vm1, %v8173_v20, 0.0  ;;  %v8212_v60 = vpop.f32.mrf.mxu0 }
 0x4f3   : > { %v3842_v63 = vadd.f32 %v3841_v61, %v3840_v8 }
 0x4f4   : > { %v4186_v36 = vsub.f32 %v8194_v16, %v4182_v3  ;;  %v4206_v32 = vmul.f32 %v4193_v56, %v8063_v54  ;;  %v4207_v52 = vmul.f32 %v8049_v26, %v4193_v56  ;;  %v4208_v51 = vmul.f32 %v4193_v56, %v8091_v4  ;;  %v8220_v4 = vpop.f32.mrf.mxu1 }
 0x4f5   : > { %v4209_v13 = vmul.f32 %v8076_v31, %v4193_v56  ;;  %v3958_v54 = vmul.f32 %v8215_v62, %v5941_v30  ;;  %v4062_v31 = vadd.f32 %v4061_v9, %v4060_v34  ;;  %v4098_v56 = vmul.f32 %v8184_v44, %v8184_v44 }
 0x4f6   : > { %v4225_v10 = vrot.slane %v4186_v36, %v8176_v53  ;;  %v3845_v36 = vsel %vm634_vm1, %v8189_v22, 0.0  ;;  %v3843_v30 = vsel %vm634_vm1, %v8212_v60, 0.0  ;;  %v3880_v9 = vmul.f32 %v8212_v60, %v8212_v60 }
 0x4f7   : > { %v3844_v8 = vadd.f32 %v3843_v30, %v3842_v63  ;;  %v4063_v33 = vsel %vm634_vm1, %v8220_v4, 0.0 }
 0x4f8   : > { %v4238_v3 = vadd.f32 %v4225_v10, %v4206_v32  ;;  %v4239_v6 = vadd.f32 %v4225_v10, %v4207_v52  ;;  %v4240_v26 = vadd.f32 %v4225_v10, %v4208_v51  ;;  %v4241_v0 = vadd.f32 %v4225_v10, %v4209_v13 }
 0x4f9   : > { %v3881_v32 = vmul.f32 %v8189_v22, %v8189_v22  ;;  %v3846_v34 = vadd.f32 %v3845_v36, %v3844_v8  ;;  %v4064_v52 = vadd.f32 %v4063_v33, %v4062_v31  ;;  %v4100_v51 = vmul.f32 %v8220_v4, %v8220_v4 }
 0x4fa   : > { %v5105_v40 = vmul.f32 -1.442695, %v4238_v3  ;;  %v5106_v18 = vmul.f32 -1.442695, %v4239_v6  ;;  %v5107_v61 = vmul.f32 -1.442695, %v4240_v26 }
 0x4fb   : > { %v5108_v38 = vmul.f32 -1.442695, %v4241_v0  ;;  %v4132_v6 = vsel %vm634_vm1, %v4098_v56, 0.0  ;;  %v4065_v0 = vsel %vm634_vm1, %v8202_v29, 0.0  ;;  %v3915_v13 = vsel %vm634_vm1, %v3880_v9, 0.0 }
 0x4fc   : > { %5944 = vpow2.f32 %v5105_v40  ;;  %v3847_v10 = vrot.slane %v3846_v34, 4  ;;  %v3916_v63 = vadd.f32 %v3915_v13, %v3914_v23  ;;  %v4066_v3 = vadd.f32 %v4065_v0, %v4064_v52  ;;  %v8252_v13 = vld [vmem:[%s6412_s30] sm:$0xf] }
 0x4fd   : > { %5946 = vpow2.f32 %v5106_v18  ;;  %v4133_v40 = vsel %vm634_vm1, %v4099_v21, 0.0  ;;  %v3917_v31 = vsel %vm634_vm1, %v3881_v32, 0.0  ;;  %v4135_v36 = vsel %vm634_vm1, %v4100_v51, 0.0 }
 0x4fe   : > { %5948 = vpow2.f32 %v5107_v61  ;;  %v5943_v26 = vpop.eup %5942  ;;  %v3848_v56 = vadd.f32 %v3847_v10, %v3846_v34  ;;  %v3918_v30 = vadd.f32 %v3917_v31, %v3916_v63  ;;  %v4067_v8 = vrot.slane %v4066_v3, 4 }
 0x4ff   : > { %5950 = vpow2.f32 %v5108_v38  ;;  %v4179_v18 = vmul.f32 %v8179_v49, %v5943_v26  ;;  %v3962_v9 = vmul.f32 %v3958_v54, %v8155_v28  ;;  %v4134_v61 = vadd.f32 %v4133_v40, %v4132_v6 }
 0x500   : > { %5952 = vrsqrt.f32 %v3951_v19  ;;  %v4101_v21 = vmul.f32 %v8202_v29, %v8202_v29  ;;  %v3849_v32 = vrot.slane %v3848_v56, 2  ;;  %v3919_v33 = vrot.slane %v3918_v30, 4 }
 0x501   : > { %v4183_v23 = vmul.f32 %v4179_v18, %v8163_v15  ;;  %v4197_v38 = vrot.slane %v4179_v18, %v8176_v53  ;;  %v4068_v52 = vadd.f32 %v4067_v8, %v4066_v3  ;;  %v4136_v51 = vadd.f32 %v4135_v36, %v4134_v61 }
 0x502   : > { %v3973_v0 = vrot.slane %v3958_v54, %v8176_v53  ;;  %v3966_v28 = vsub.f32 %v8252_v13, %v3962_v9  ;;  %v4137_v6 = vsel %vm634_vm1, %v4101_v21, 0.0  ;;  %v3920_v10 = vadd.f32 %v3919_v33, %v3918_v30 }
 0x503   : > { %v4187_v34 = vsub.f32 %v8194_v16, %v4183_v23  ;;  %v4210_v19 = vmul.f32 %v4197_v38, %v8115_v24  ;;  %v4211_v63 = vmul.f32 %v8104_v42, %v4197_v38  ;;  %v3850_v26 = vadd.f32 %v3849_v32, %v3848_v56 }
 0x504   : > { %v4069_v3 = vrot.slane %v4068_v52, 2  ;;  %v4138_v40 = vadd.f32 %v4137_v6, %v4136_v51  ;;  %v3986_v54 = vmul.f32 %v3973_v0, %v8053_v1  ;;  %v4212_v31 = vmul.f32 %v4197_v38, %v8143_v11 }
 0x505   : > { %v4229_v15 = vrot.slane %v4187_v34, %v8176_v53  ;;  %v4213_v36 = vmul.f32 %v8128_v5, %v4197_v38  ;;  %v3921_v24 = vrot.slane %v3920_v10, 2  ;;  %v8262_v34 = vpop.f32.mrf.mxu1  ;;  %v3987_v42 = vmul.f32 %v8045_v7, %v3973_v0  ;;  %v8266_v38 = vpop.f32.mrf.mxu0 }
 0x506   : > { %v4070_v61 = vadd.f32 %v4069_v3, %v4068_v52  ;;  %v4139_v23 = vrot.slane %v4138_v40, 4  ;;  %8722 = vst [vmem:[#allocation26_spill] sm:$0xff] %v8262_v34  ;;  %v4005_v56 = vrot.slane %v3966_v28, %v8176_v53  ;;  %v3851_v5 = vrot.slane %v3850_v26, 1  ;;  %8723 = vst [vmem:[#allocation25_spill] sm:$0xff] %v8266_v38 }
 0x507   : > { %v4242_v18 = vadd.f32 %v4229_v15, %v4210_v19  ;;  %v4243_v9 = vadd.f32 %v4229_v15, %v4211_v63  ;;  %v4244_v32 = vadd.f32 %v4229_v15, %v4212_v31  ;;  %v4245_v11 = vadd.f32 %v4229_v15, %v4213_v36  ;;  %v8268_v58 = vpop.f32.mrf.mxu1 }
 0x508   : > { %v3922_v52 = vadd.f32 %v3921_v24, %v3920_v10  ;;  %v4071_v63 = vrot.slane %v4070_v61, 1  ;;  %v4140_v7 = vadd.f32 %v4139_v23, %v4138_v40  ;;  %8724 = vst [vmem:[#allocation22_spill] sm:$0xff] %v8268_v58  ;;  %v3988_v28 = vmul.f32 %v3973_v0, %v8083_v41 }
 0x509   : > { %v5945_v8 = vpop.eup %5944  ;;  %v5109_v51 = vmul.f32 -1.442695, %v4242_v18  ;;  %v5110_v37 = vmul.f32 -1.442695, %v4243_v9  ;;  %v5111_v31 = vmul.f32 -1.442695, %v4244_v32  ;;  %v3989_v10 = vmul.f32 %v8071_v39, %v3973_v0 }
 0x50a   : > { %v5947_v30 = vpop.eup %5946  ;;  %v4302_v21 = vadd.f32 1.0, %v5945_v8  ;;  %v4072_v15 = vadd.f32 %v4071_v63, %v4070_v61  ;;  %v5112_v18 = vmul.f32 -1.442695, %v4245_v11  ;;  %v3852_v8 = vadd.f32 %v3851_v5, %v3850_v26 }
 0x50b   : > { %v5949_v1 = vpop.eup %5948  ;;  %v4303_v33 = vadd.f32 1.0, %v5947_v30  ;;  %v4141_v30 = vrot.slane %v4140_v7, 2  ;;  %v4018_v24 = vadd.f32 %v4005_v56, %v3986_v54  ;;  %v3923_v9 = vrot.slane %v3922_v52, 1 }
 0x50c   : > { %v5951_v19 = vpop.eup %5950  ;;  %v4304_v6 = vadd.f32 1.0, %v5949_v1  ;;  %5954 = vrcp.f32 %v4302_v21  ;;  %v8271_v1 = vpop.f32.mrf.mxu0  ;;  %v4019_v40 = vadd.f32 %v4005_v56, %v3987_v42  ;;  %v8274_v23 = vmul.f32 0.03125, %v4072_v15 }
 0x50d   : > { %v4305_v3 = vadd.f32 1.0, %v5951_v19  ;;  %5956 = vrcp.f32 %v4303_v33  ;;  %v5953_v36 = vpop.eup %5952  ;;  %8725 = vst [vmem:[#allocation31_spill] sm:$0xff] %v8271_v1  ;;  %v4142_v41 = vadd.f32 %v4141_v30, %v4140_v7  ;;  %v8276_v21 = vpop.f32.mrf.mxu1  ;;  %v4020_v61 = vadd.f32 %v4005_v56, %v3988_v28 }
 0x50e   : > { %5958 = vrcp.f32 %v4304_v6  ;;  %v8279_v32 = vmul.f32 %v8215_v62, %v5953_v36  ;;  %v3883_v26 = vmul.f32 %v8266_v38, %v8266_v38  ;;  %v8283_v39 = vmul.f32 0.03125, %v3852_v8  ;;  %v8287_v54 = vpop.f32.mrf.mxu0 }
 0x50f   : > { %5960 = vrcp.f32 %v4305_v3  ;;  %v4143_v0 = vrot.slane %v4142_v41, 1  ;;  %v4021_v42 = vadd.f32 %v4005_v56, %v3989_v10  ;;  %v3924_v33 = vadd.f32 %v3923_v9, %v3922_v52  ;;  %v8299_v3 = vpop.f32.mrf.mxu1 }
 0x510   : > { %5962 = vpow2.f32 %v5109_v51  ;;  %v4073_v11 = vsel %vm634_vm1, %v8268_v58, 0.0  ;;  %v4102_v51 = vmul.f32 %v8268_v58, %v8268_v58  ;;  %v4164_v19 = vmul.f32 %v8274_v23, %v8274_v23  ;;  %8726 = vst [vmem:[#allocation34_spill] sm:$0xff] %v8299_v3  ;;  %v8317_v8 = vpop.f32.mrf.mxu0 }
 0x511   : > { %5964 = vpow2.f32 %v5110_v37  ;;  %v4103_v37 = vmul.f32 %v8262_v34, %v8262_v34  ;;  %v4144_v5 = vadd.f32 %v4143_v0, %v4142_v41  ;;  %v3853_v6 = vsel %vm634_vm1, %v8271_v1, 0.0  ;;  %8727 = vst [vmem:[#allocation23_spill] sm:$0xff] %v8317_v8 }
 0x512   : > { %5966 = vpow2.f32 %v5111_v31  ;;  %v3882_v63 = vmul.f32 %v8271_v1, %v8271_v1  ;;  %v8303_v56 = vmul.f32 %v8279_v32, %v8161_v27  ;;  %v3854_v52 = vsel %vm634_vm1, %v8266_v38, 0.0 }
 0x513   : > { %5968 = vpow2.f32 %v5112_v18  ;;  %v8308_v7 = vsel %vm634_vm1, %v3883_v26, 0.0  ;;  %v4074_v28 = vsel %vm634_vm1, %v8262_v34, 0.0  ;;  %v8314_v31 = vmul.f32 %v8283_v39, %v8283_v39 }
 0x514   : > { %v4160_v15 = vmul.f32 0.03125, %v4144_v5  ;;  %v4146_v36 = vsel %vm634_vm1, %v4103_v37, 0.0  ;;  %v4075_v18 = vadd.f32 %v4074_v28, %v4073_v11  ;;  %v8319_v27 = vmul.f32 0.03125, %v3924_v33 }
 0x515   : > { %v3855_v30 = vadd.f32 %v3854_v52, %v3853_v6  ;;  %v4145_v10 = vsel %vm634_vm1, %v4102_v51, 0.0  ;;  %v4076_v9 = vsel %vm634_vm1, %v8299_v3, 0.0  ;;  %v3925_v0 = vsel %vm634_vm1, %v3882_v63, 0.0 }
 0x516   : > { %v4168_v26 = vsub.f32 %v4160_v15, %v4164_v19  ;;  %v3858_v5 = vsel %vm634_vm1, %v8287_v54, 0.0  ;;  %v4077_v38 = vadd.f32 %v4076_v9, %v4075_v18  ;;  %v4078_v33 = vsel %vm634_vm1, %v8276_v21, 0.0 }
 0x517   : > { %v3856_v6 = vsel %vm634_vm1, %v8317_v8, 0.0  ;;  %v4104_v51 = vmul.f32 %v8299_v3, %v8299_v3  ;;  %v4147_v15 = vadd.f32 %v4146_v36, %v4145_v10  ;;  %v3884_v9 = vmul.f32 %v8317_v8, %v8317_v8  ;;  %v4398_v3 = vld [vmem:[#allocation2] sm:$0xff] }
 0x518   : > { %v4172_v19 = vadd.f32 1e-05, %v4168_v26  ;;  %v4079_v63 = vadd.f32 %v4078_v33, %v4077_v38 }
 0x519   : > { %v5955_v41 = vpop.eup %5954 }
 0x51a   : > { %v5957_v37 = vpop.eup %5956  ;;  %v4350_v11 = vmul.f32 %v5955_v41, %v4018_v24  ;;  %v4105_v24 = vmul.f32 %v8276_v21, %v8276_v21  ;;  %5970 = vrsqrt.f32 %v4172_v19 }
 0x51b   : > { %v5959_v52 = vpop.eup %5958  ;;  %v4351_v28 = vmul.f32 %v5957_v37, %v4019_v40  ;;  %v3857_v40 = vadd.f32 %v3856_v6, %v3855_v30 }
 0x51c   : > { %v5961_v1 = vpop.eup %5960  ;;  %v4352_v34 = vmul.f32 %v5959_v52, %v4020_v61  ;;  %v4366_v18 = vadd.f32 %v4350_v11, %v7907_v47  ;;  %v4399_v61 = vld [vmem:[#allocation2 + $0x8] sm:$0xff]  ;;  %v4148_v47 = vsel %vm634_vm1, %v4104_v51, 0.0  ;;  %v4400_v52 = vld [vmem:[#allocation2 + $0x10] sm:$0xff] }
 0x51d   : > { %v5963_v41 = vpop.eup %5962  ;;  %v4353_v58 = vmul.f32 %v5961_v1, %v4021_v42  ;;  %v4367_v14 = vadd.f32 %v4351_v28, %v7885_v12  ;;  %v4080_v1 = vrot.slane %v4079_v63, 4  ;;  %v4401_v28 = vld [vmem:[#allocation2 + $0x18] sm:$0xff]  ;;  %v3859_v51 = vadd.f32 %v3858_v5, %v3857_v40 }
 0x51e   : > { %v5965_v26 = vpop.eup %5964  ;;  %v4368_v38 = vadd.f32 %v4352_v34, %v7893_v43  ;;  %v4382_v36 = vmul.f32 0.70710677, %v4366_v18  ;;  %v4306_v10 = vadd.f32 1.0, %v5963_v41  ;;  %v4149_v41 = vadd.f32 %v4148_v47, %v4147_v15 }
 0x51f   : > { %v5967_v37 = vpop.eup %5966  ;;  %v4369_v11 = vadd.f32 %v4353_v58, %v7924_v17  ;;  %v4383_v33 = vmul.f32 0.70710677, %v4367_v14  ;;  %v4307_v8 = vadd.f32 1.0, %v5965_v26  ;;  %v3928_v17 = vsel %vm634_vm1, %v3884_v9, 0.0 }
 0x520   : > { %v5969_v42 = vpop.eup %5968  ;;  %v4384_v12 = vmul.f32 0.70710677, %v4368_v38  ;;  %v4414_v19 = vadd.f32 %v4398_v3, %v4382_v36  ;;  %v4308_v30 = vadd.f32 1.0, %v5967_v37  ;;  %5972 = vrcp.f32 %v4306_v10 }
 0x521   : > { %v4385_v6 = vmul.f32 0.70710677, %v4369_v11  ;;  %v4415_v43 = vadd.f32 %v4399_v61, %v4383_v33  ;;  %v4309_v34 = vadd.f32 1.0, %v5969_v42  ;;  %5974 = vrcp.f32 %v4307_v8 }
 0x522   : > { %v4416_v18 = vadd.f32 %v4400_v52, %v4384_v12  ;;  %4430 = vst.msk [vmem:[#allocation2] sm:$0xff] %vm634_vm1, %v4414_v19  ;;  %5976 = vrcp.f32 %v4308_v30  ;;  %v4081_v58 = vadd.f32 %v4080_v1, %v4079_v63  ;;  %v3967_v3 = vsub.f32 %v8252_v13, %v8303_v56 }
 0x523   : > { %v4417_v14 = vadd.f32 %v4401_v28, %v4385_v6  ;;  %4431 = vst.msk [vmem:[#allocation2 + $0x8] sm:$0xff] %vm634_vm1, %v4415_v43  ;;  %5978 = vrcp.f32 %v4309_v34  ;;  %v3927_v8 = vadd.f32 %v8308_v7, %v3925_v0  ;;  %v4150_v26 = vsel %vm634_vm1, %v4105_v24, 0.0 }
 0x524   : > { %4432 = vst.msk [vmem:[#allocation2 + $0x10] sm:$0xff] %vm634_vm1, %v4416_v18  ;;  %v3885_v5 = vmul.f32 %v8287_v54, %v8287_v54  ;;  %v4082_v9 = vrot.slane %v4081_v58, 2  ;;  %v4151_v40 = vadd.f32 %v4150_v26, %v4149_v41  ;;  %v3977_v63 = vrot.slane %v8279_v32, %v8176_v53 }
 0x525   : > { %4433 = vst.msk [vmem:[#allocation2 + $0x18] sm:$0xff] %vm634_vm1, %v4417_v14  ;;  %v3948_v15 = vsub.f32 %v8319_v27, %v8314_v31  ;;  %v3929_v38 = vadd.f32 %v3928_v17, %v3927_v8  ;;  %v3860_v36 = vrot.slane %v3859_v51, 4  ;;  %v4009_v7 = vrot.slane %v3967_v3, %v8176_v53 }
 0x526   : > { %v4083_v56 = vadd.f32 %v4082_v9, %v4081_v58  ;;  %v4152_v0 = vrot.slane %v4151_v40, 4  ;;  %v3930_v24 = vsel %vm634_vm1, %v3885_v5, 0.0  ;;  %v3990_v10 = vmul.f32 %v3977_v63, %v8109_v45  ;;  %v4402_v5 = vld [vmem:[#allocation2 + $0x20] sm:$0xff] }
 0x527   : > { %v5971_v61 = vpop.eup %5970  ;;  %v3991_v47 = vmul.f32 %v8098_v55, %v3977_v63  ;;  %v3952_v37 = vadd.f32 1e-05, %v3948_v15  ;;  %v3931_v11 = vadd.f32 %v3930_v24, %v3929_v38  ;;  %v3992_v32 = vmul.f32 %v3977_v63, %v8136_v46  ;;  %v4403_v38 = vld [vmem:[#allocation2 + $0x28] sm:$0xff] }
 0x528   : > { %v4180_v33 = vmul.f32 %v8179_v49, %v5971_v61  ;;  %v8363_v31 = vadd.f32 %v3860_v36, %v3859_v51  ;;  %v4084_v27 = vrot.slane %v4083_v56, 1  ;;  %v3993_v52 = vmul.f32 %v8123_v35, %v3977_v63  ;;  %v4405_v61 = vld [vmem:[#allocation2 + $0x38] sm:$0xff] }
 0x529   : > { %v4022_v1 = vadd.f32 %v4009_v7, %v3990_v10  ;;  %v4153_v42 = vadd.f32 %v4152_v0, %v4151_v40  ;;  %v4023_v28 = vadd.f32 %v4009_v7, %v3991_v47  ;;  %v4024_v19 = vadd.f32 %v4009_v7, %v3992_v32 }
 0x52a   : > { %v4184_v45 = vmul.f32 %v4180_v33, %v8274_v23  ;;  %v4201_v55 = vrot.slane %v4180_v33, %v8176_v53  ;;  %v4025_v6 = vadd.f32 %v4009_v7, %v3993_v52  ;;  %5980 = vrsqrt.f32 %v3952_v37  ;;  %v4404_v7 = vld [vmem:[#allocation2 + $0x30] sm:$0xff] }
 0x52b   : > { %v3932_v46 = vrot.slane %v3931_v11, 4  ;;  %v3862_v35 = vrot.slane %v8363_v31, 2  ;;  %v4085_v17 = vadd.f32 %v4084_v27, %v4083_v56  ;;  %v4154_v3 = vrot.slane %v4153_v42, 2 }
 0x52c   : > { %v4188_v51 = vsub.f32 %v8194_v16, %v4184_v45  ;;  %v4214_v23 = vmul.f32 %v4201_v55, %v8184_v44  ;;  %v4215_v9 = vmul.f32 %v8169_v50, %v4201_v55  ;;  %v4216_v36 = vmul.f32 %v4201_v55, %v8220_v4 }
 0x52d   : > { %v5973_v12 = vpop.eup %5972  ;;  %v4217_v56 = vmul.f32 %v8202_v29, %v4201_v55  ;;  %v3933_v52 = vadd.f32 %v3932_v46, %v3931_v11  ;;  %v3863_v45 = vadd.f32 %v3862_v35, %v8363_v31 }
 0x52e   : > { %v5975_v30 = vpop.eup %5974  ;;  %v4354_v43 = vmul.f32 %v5973_v12, %v4022_v1  ;;  %v4233_v40 = vrot.slane %v4188_v51, %v8176_v53  ;;  %v4089_v1 = vmul.f32 0.03125, %v4085_v17  ;;  %v4155_v12 = vadd.f32 %v4154_v3, %v4153_v42 }
 0x52f   : > { %v5977_v34 = vpop.eup %5976  ;;  %v4355_v18 = vmul.f32 %v5975_v30, %v4023_v28  ;;  %v3934_v55 = vrot.slane %v3933_v52, 2 }
 0x530   : > { %v5979_v14 = vpop.eup %5978  ;;  %v4356_v58 = vmul.f32 %v5977_v34, %v4024_v19  ;;  %v4370_v41 = vadd.f32 %v4354_v43, %v7932_v57  ;;  %v4246_v0 = vadd.f32 %v4233_v40, %v4214_v23  ;;  %v4247_v24 = vadd.f32 %v4233_v40, %v4215_v9 }
 0x531   : > { %v4357_v8 = vmul.f32 %v5979_v14, %v4025_v6  ;;  %v4371_v26 = vadd.f32 %v4355_v18, %v7941_v48  ;;  %v4248_v50 = vadd.f32 %v4233_v40, %v4216_v36  ;;  %v4249_v47 = vadd.f32 %v4233_v40, %v4217_v56 }
 0x532   : > { %v4372_v63 = vadd.f32 %v4356_v58, %v7946_v59  ;;  %v4386_v15 = vmul.f32 0.70710677, %v4370_v41  ;;  %v5113_v59 = vmul.f32 -1.442695, %v4246_v0  ;;  %v5114_v33 = vmul.f32 -1.442695, %v4247_v24 }
 0x533   : > { %v4373_v57 = vadd.f32 %v4357_v8, %v7956_v2  ;;  %v4387_v44 = vmul.f32 0.70710677, %v4371_v26  ;;  %v5115_v4 = vmul.f32 -1.442695, %v4248_v50  ;;  %v5116_v29 = vmul.f32 -1.442695, %v4249_v47 }
 0x534   : > { %v4388_v48 = vmul.f32 0.70710677, %v4372_v63  ;;  %v4418_v10 = vadd.f32 %v4402_v5, %v4386_v15  ;;  %5982 = vpow2.f32 %v5113_v59  ;;  %v4156_v28 = vrot.slane %v4155_v12, 1 }
 0x535   : > { %v4389_v37 = vmul.f32 0.70710677, %v4373_v57  ;;  %v4419_v32 = vadd.f32 %v4403_v38, %v4387_v44  ;;  %5984 = vpow2.f32 %v5114_v33  ;;  %v4165_v11 = vmul.f32 %v4089_v1, %v4089_v1 }
 0x536   : > { %v4420_v27 = vadd.f32 %v4404_v7, %v4388_v48  ;;  %4434 = vst.msk [vmem:[#allocation2 + $0x20] sm:$0xff] %vm634_vm1, %v4418_v10  ;;  %5986 = vpow2.f32 %v5115_v4  ;;  %v4157_v30 = vadd.f32 %v4156_v28, %v4155_v12  ;;  %v3864_v43 = vrot.slane %v3863_v45, 1  ;;  %v8730_v28 = vld [vmem:[#allocation24_spill] sm:$0xff] }
 0x537   : > { %v4421_v2 = vadd.f32 %v4405_v61, %v4389_v37  ;;  %4435 = vst.msk [vmem:[#allocation2 + $0x28] sm:$0xff] %vm634_vm1, %v4419_v32  ;;  %5988 = vpow2.f32 %v5116_v29  ;;  %v5981_v19 = vpop.eup %5980  ;;  %v3935_v46 = vadd.f32 %v3934_v55, %v3933_v52 }
 0x538   : > { %4436 = vst.msk [vmem:[#allocation2 + $0x30] sm:$0xff] %vm634_vm1, %v4420_v27  ;;  %v4161_v6 = vmul.f32 0.03125, %v4157_v30  ;;  %v3960_v42 = vmul.f32 %v8215_v62, %v5981_v19  ;;  %v3865_v51 = vadd.f32 %v3864_v43, %v3863_v45  ;;  %v4406_v19 = vld [vmem:[#allocation2 + $0x40] sm:$0xff]  ;;  %v8731_v45 = vld [vmem:[#allocation26_spill] sm:$0xff] }
 0x539   : > { %4437 = vst.msk [vmem:[#allocation2 + $0x38] sm:$0xff] %vm634_vm1, %v4421_v2  ;;  %v3936_v17 = vrot.slane %v3935_v46, 1  ;;  %v8729_v2 = vld [vmem:[#allocation22_spill] sm:$0xff] }
 0x53a   : > { %v4169_v34 = vsub.f32 %v4161_v6, %v4165_v11  ;;  %v3964_v3 = vmul.f32 %v3960_v42, %v8283_v39  ;;  %v8386_v26 = vmul.f32 0.03125, %v3865_v51  ;;  %v3981_v38 = vrot.slane %v3960_v42, %v8176_v53  ;;  %v8732_v11 = vld [vmem:[#allocation30_spill] sm:$0xff]  ;;  %v8734_v42 = vld [vmem:[#allocation33_spill] sm:$0xff] }
 0x53b   : > { %v3937_v5 = vadd.f32 %v3936_v17, %v3935_v46  ;;  %v4407_v46 = vld [vmem:[#allocation2 + $0x48] sm:$0xff] }
 0x53c   : > { %v4173_v18 = vadd.f32 1e-05, %v4169_v34  ;;  %v3968_v40 = vsub.f32 %v8252_v13, %v3964_v3  ;;  %v3945_v15 = vmul.f32 %v8386_v26, %v8386_v26  ;;  %v3994_v57 = vmul.f32 %v3981_v38, %v8173_v20  ;;  %v4409_v3 = vld [vmem:[#allocation2 + $0x58] sm:$0xff] }
 0x53d   : > { %v3941_v63 = vmul.f32 0.03125, %v3937_v5  ;;  %v3995_v44 = vmul.f32 %v8167_v25, %v3981_v38  ;;  %v3996_v0 = vmul.f32 %v3981_v38, %v8212_v60  ;;  %v3997_v10 = vmul.f32 %v8189_v22, %v3981_v38  ;;  %v8728_v60 = vld [vmem:[#allocation21_spill] sm:$0xff] }
 0x53e   : > { %5990 = vrsqrt.f32 %v4173_v18  ;;  %v4013_v39 = vrot.slane %v3968_v40, %v8176_v53 }
 0x53f   : > { %v3949_v36 = vsub.f32 %v3941_v63, %v3945_v15 }
 0x540   : > { %v4026_v24 = vadd.f32 %v4013_v39, %v3994_v57  ;;  %v4027_v50 = vadd.f32 %v4013_v39, %v3995_v44  ;;  %v4028_v59 = vadd.f32 %v4013_v39, %v3996_v0  ;;  %v4029_v20 = vadd.f32 %v4013_v39, %v3997_v10 }
 0x541   : > { %v5983_v14 = vpop.eup %5982  ;;  %v3953_v48 = vadd.f32 1e-05, %v3949_v36 }
 0x542   : > { %v5985_v58 = vpop.eup %5984  ;;  %v4310_v41 = vadd.f32 1.0, %v5983_v14  ;;  %v4408_v14 = vld [vmem:[#allocation2 + $0x50] sm:$0xff] }
 0x543   : > { %v5987_v23 = vpop.eup %5986  ;;  %v4311_v31 = vadd.f32 1.0, %v5985_v58 }
 0x544   : > { %v5989_v35 = vpop.eup %5988  ;;  %v4312_v8 = vadd.f32 1.0, %v5987_v23  ;;  %5992 = vrcp.f32 %v4310_v41 }
 0x545   : > { %v4313_v9 = vadd.f32 1.0, %v5989_v35  ;;  %5994 = vrcp.f32 %v4311_v31 }
 0x546   : > { %5996 = vrcp.f32 %v4312_v8 }
 0x547   : > { %5998 = vrcp.f32 %v4313_v9 }
 0x548   : > { %6000 = vrsqrt.f32 %v3953_v48 }
 0x54b   : > { %v5991_v56 = vpop.eup %5990 }
 0x54c   : > { %v4181_v7 = vmul.f32 %v8179_v49, %v5991_v56 }
 0x54e   : > { %v4185_v47 = vmul.f32 %v4181_v7, %v4089_v1  ;;  %v4205_v37 = vrot.slane %v4181_v7, %v8176_v53 }
 0x550   : > { %v4189_v25 = vsub.f32 %v8194_v16, %v4185_v47  ;;  %v4218_v12 = vmul.f32 %v4205_v37, %v8729_v2  ;;  %v4219_v55 = vmul.f32 %v8731_v45, %v4205_v37  ;;  %v8733_v16 = vld [vmem:[#allocation34_spill] sm:$0xff]  ;;  %v4221_v18 = vmul.f32 %v8276_v21, %v4205_v37 }
 0x551   : > { %v5993_v61 = vpop.eup %5992  ;;  %v4220_v34 = vmul.f32 %v4205_v37, %v8733_v16  ;;  %v4411_v16 = vld [vmem:[#allocation2 + $0x68] sm:$0xff] }
 0x552   : > { %v5995_v32 = vpop.eup %5994  ;;  %v4358_v33 = vmul.f32 %v5993_v61, %v4026_v24  ;;  %v4237_v30 = vrot.slane %v4189_v25, %v8176_v53 }
 0x553   : > { %v5997_v27 = vpop.eup %5996  ;;  %v4359_v4 = vmul.f32 %v5995_v32, %v4027_v50  ;;  %v8735_v32 = vld [vmem:[#allocation31_spill] sm:$0xff] }
 0x554   : > { %v5999_v49 = vpop.eup %5998  ;;  %v4360_v29 = vmul.f32 %v5997_v27, %v4028_v59  ;;  %v4374_v52 = vadd.f32 %v4358_v33, %v8728_v60  ;;  %v4250_v58 = vadd.f32 %v4237_v30, %v4218_v12  ;;  %v4251_v41 = vadd.f32 %v4237_v30, %v4219_v55  ;;  %v8736_v33 = vld [vmem:[#allocation25_spill] sm:$0xff] }
 0x555   : > { %v4361_v22 = vmul.f32 %v5999_v49, %v4029_v20  ;;  %v4375_v1 = vadd.f32 %v4359_v4, %v8730_v28  ;;  %v4252_v35 = vadd.f32 %v4237_v30, %v4220_v34  ;;  %v4253_v8 = vadd.f32 %v4237_v30, %v4221_v18  ;;  %v6001_v36 = vpop.eup %6000  ;;  %v8737_v20 = vld [vmem:[#allocation23_spill] sm:$0xff]  ;;  %v8739_v55 = vld [vmem:[#allocation29_spill] sm:$0xff] }
 0x556   : > { %v4376_v6 = vadd.f32 %v4360_v29, %v8732_v11  ;;  %v4390_v43 = vmul.f32 0.70710677, %v4374_v52  ;;  %v5117_v40 = vmul.f32 -1.442695, %v4250_v58  ;;  %v5118_v63 = vmul.f32 -1.442695, %v4251_v41 }
 0x557   : > { %v4377_v51 = vadd.f32 %v4361_v22, %v8734_v42  ;;  %v4391_v17 = vmul.f32 0.70710677, %v4375_v1  ;;  %v5119_v38 = vmul.f32 -1.442695, %v4252_v35  ;;  %v5120_v21 = vmul.f32 -1.442695, %v4253_v8 }
 0x558   : > { %v4392_v23 = vmul.f32 0.70710677, %v4376_v6  ;;  %v4422_v31 = vadd.f32 %v4406_v19, %v4390_v43  ;;  %6002 = vpow2.f32 %v5117_v40  ;;  %v3961_v56 = vmul.f32 %v8215_v62, %v6001_v36  ;;  %v4410_v11 = vld [vmem:[#allocation2 + $0x60] sm:$0xff]  ;;  %v8740_v6 = vld [vmem:[#allocation32_spill] sm:$0xff]  ;;  %v4412_v42 = vld [vmem:[#allocation2 + $0x70] sm:$0xff] }
 0x559   : > { %v4393_v5 = vmul.f32 0.70710677, %v4377_v51  ;;  %v4423_v9 = vadd.f32 %v4407_v46, %v4391_v17  ;;  %6004 = vpow2.f32 %v5118_v63  ;;  %v4413_v17 = vld [vmem:[#allocation2 + $0x78] sm:$0xff] }
 0x55a   : > { %v4424_v15 = vadd.f32 %v4408_v14, %v4392_v23  ;;  %4438 = vst.msk [vmem:[#allocation2 + $0x40] sm:$0xff] %vm634_vm1, %v4422_v31  ;;  %6006 = vpow2.f32 %v5119_v38  ;;  %v3965_v61 = vmul.f32 %v3961_v56, %v8386_v26  ;;  %v3985_v37 = vrot.slane %v3961_v56, %v8176_v53 }
 0x55b   : > { %v4425_v39 = vadd.f32 %v4409_v3, %v4393_v5  ;;  %4439 = vst.msk [vmem:[#allocation2 + $0x48] sm:$0xff] %vm634_vm1, %v4423_v9  ;;  %6008 = vpow2.f32 %v5120_v21 }
 0x55c   : > { %4440 = vst.msk [vmem:[#allocation2 + $0x50] sm:$0xff] %vm634_vm1, %v4424_v15  ;;  %v3969_v47 = vsub.f32 %v8252_v13, %v3965_v61  ;;  %v3998_v59 = vmul.f32 %v3985_v37, %v8735_v32  ;;  %v3999_v27 = vmul.f32 %v8736_v33, %v3985_v37  ;;  %v4000_v4 = vmul.f32 %v3985_v37, %v8737_v20 }
 0x55d   : > { %4441 = vst.msk [vmem:[#allocation2 + $0x58] sm:$0xff] %vm634_vm1, %v4425_v39  ;;  %v4001_v49 = vmul.f32 %v8287_v54, %v3985_v37  ;;  %v8741_v54 = vld [vmem:[#allocation28_spill] sm:$0xff] }
 0x55e   : > { %v4017_v62 = vrot.slane %v3969_v47, %v8176_v53  ;;  %v8738_v53 = vld [vmem:[#allocation20_spill] sm:$0xff] }
 0x560   : > { %v4030_v25 = vadd.f32 %v4017_v62, %v3998_v59  ;;  %v4031_v29 = vadd.f32 %v4017_v62, %v3999_v27  ;;  %v4032_v52 = vadd.f32 %v4017_v62, %v4000_v4  ;;  %v4033_v13 = vadd.f32 %v4017_v62, %v4001_v49 }
 0x565   : > { %v6003_v57 = vpop.eup %6002 }
 0x566   : > { %v6005_v44 = vpop.eup %6004  ;;  %v4314_v7 = vadd.f32 1.0, %v6003_v57 }
 0x567   : > { %v6007_v0 = vpop.eup %6006  ;;  %v4315_v24 = vadd.f32 1.0, %v6005_v44 }
 0x568   : > { %v6009_v48 = vpop.eup %6008  ;;  %v4316_v10 = vadd.f32 1.0, %v6007_v0  ;;  %6010 = vrcp.f32 %v4314_v7 }
 0x569   : > { %v4317_v50 = vadd.f32 1.0, %v6009_v48  ;;  %6012 = vrcp.f32 %v4315_v24 }
 0x56a   : > { %6014 = vrcp.f32 %v4316_v10 }
 0x56b   : > { %6016 = vrcp.f32 %v4317_v50 }
 0x575   : > { %v6011_v26 = vpop.eup %6010 }
 0x576   : > { %v6013_v60 = vpop.eup %6012  ;;  %v4362_v2 = vmul.f32 %v6011_v26, %v4030_v25 }
 0x577   : > { %v6015_v12 = vpop.eup %6014  ;;  %v4363_v22 = vmul.f32 %v6013_v60, %v4031_v29 }
 0x578   : > { %v6017_v28 = vpop.eup %6016  ;;  %v4364_v1 = vmul.f32 %v6015_v12, %v4032_v52  ;;  %v4378_v19 = vadd.f32 %v4362_v2, %v8738_v53 }
 0x579   : > { %v4365_v45 = vmul.f32 %v6017_v28, %v4033_v13  ;;  %v4379_v30 = vadd.f32 %v4363_v22, %v8739_v55 }
 0x57a   : > { %v4380_v43 = vadd.f32 %v4364_v1, %v8740_v6  ;;  %v4394_v46 = vmul.f32 0.70710677, %v4378_v19 }
 0x57b   : > { %v4381_v34 = vadd.f32 %v4365_v45, %v8741_v54  ;;  %v4395_v18 = vmul.f32 0.70710677, %v4379_v30 }
 0x57c   : > { %v4396_v51 = vmul.f32 0.70710677, %v4380_v43  ;;  %v4426_v14 = vadd.f32 %v4410_v11, %v4394_v46 }
 0x57d   : > { %v4397_v58 = vmul.f32 0.70710677, %v4381_v34  ;;  %v4427_v41 = vadd.f32 %v4411_v16, %v4395_v18  ;;  %4449 = sbr.rel (%p5121_p0) target bundleno = 1631 (0x65f), region = 84 }
 0x57e   : > { %v4428_v23 = vadd.f32 %v4412_v42, %v4396_v51  ;;  %4442 = vst.msk [vmem:[#allocation2 + $0x60] sm:$0xff] %vm634_vm1, %v4426_v14 }
 0x57f   : > { %v4429_v3 = vadd.f32 %v4413_v17, %v4397_v58  ;;  %4443 = vst.msk [vmem:[#allocation2 + $0x68] sm:$0xff] %vm634_vm1, %v4427_v41 }
 0x580   : > { %4444 = vst.msk [vmem:[#allocation2 + $0x70] sm:$0xff] %vm634_vm1, %v4428_v23 }
 0x581   : > { %4445 = vst.msk [vmem:[#allocation2 + $0x78] sm:$0xff] %vm634_vm1, %v4429_v3 }
 0x582   : > { %v4468_v31 = vld [vmem:[%s8559_s9 + $0x10] sm:$0xff]  ;;  %v4467_v35 = vld [vmem:[%s8559_s9 + $0x8] sm:$0xff]  ;;  %v4450_v8 = vld [vmem:[#allocation2] sm:$0xff]  ;;  %vm4671_vm2 = vcmask 195584  }
 0x583   : > { %5583 = vmatprep.subr.msk.mxu0 %vm634_vm1, %v4468_v31  ;;  %5613 = vmatprep.subr.msk.mxu1 %vm634_vm1, %v4468_v31  ;;  %v4458_v5 = vld [vmem:[#allocation2 + $0x40] sm:$0xff]  ;;  %v4451_v40 = vld [vmem:[#allocation2 + $0x8] sm:$0xff]  ;;  %v4452_v15 = vld [vmem:[#allocation2 + $0x10] sm:$0xff] }
 0x584   : > { %5584 = vmatpush3.xpose.msk.msra.mxu0 %vm634_vm1, %v4468_v31  ;;  %5616 = vmatpush3.xpose.msk.msra.mxu1 %vm634_vm1, %v4468_v31  ;;  %v4466_v9 = vld [vmem:[%s8559_s9] sm:$0xff]  ;;  %v4459_v63 = vld [vmem:[#allocation2 + $0x48] sm:$0xff]  ;;  %v4460_v38 = vld [vmem:[#allocation2 + $0x50] sm:$0xff] }
 0x585   : > { %5585 = vmatprep.subr.msk.mxu0 %vm634_vm1, %v4467_v35  ;;  %5614 = vmatprep.subr.msk.mxu1 %vm634_vm1, %v4467_v35  ;;  %v4453_v21 = vld [vmem:[#allocation2 + $0x18] sm:$0xff]  ;;  %v4454_v36 = vld [vmem:[#allocation2 + $0x20] sm:$0xff]  ;;  %v4455_v57 = vld [vmem:[#allocation2 + $0x28] sm:$0xff] }
 0x586   : > { %5589 = vmatprep.mubr.msk.f32.mxu0 %vm634_vm1, %v4450_v8  ;;  %5601 = vmatprep.mubr.msk.f32.mxu1 %vm634_vm1, %v4458_v5  ;;  %v4461_v39 = vld [vmem:[#allocation2 + $0x58] sm:$0xff]  ;;  %v4462_v56 = vld [vmem:[#allocation2 + $0x60] sm:$0xff]  ;;  %v4463_v44 = vld [vmem:[#allocation2 + $0x68] sm:$0xff] }
 0x587   : > { %v4456_v7 = vld [vmem:[#allocation2 + $0x30] sm:$0xff]  ;;  %v4457_v24 = vld [vmem:[#allocation2 + $0x38] sm:$0xff] }
 0x588   : > { %5586 = vmatpush3.xpose.msk.msra.mxu0 %vm634_vm1, %v4467_v35  ;;  %5617 = vmatpush3.xpose.msk.msra.mxu1 %vm634_vm1, %v4467_v35  ;;  %v4464_v0 = vld [vmem:[#allocation2 + $0x70] sm:$0xff]  ;;  %v4465_v48 = vld [vmem:[#allocation2 + $0x78] sm:$0xff] }
 0x589   : > { %5587 = vmatprep.subr.msk.mxu0 %vm634_vm1, %v4466_v9  ;;  %5615 = vmatprep.subr.msk.mxu1 %vm634_vm1, %v4466_v9 }
 0x58c   : > { %5588 = vmatpush3.xpose.msk.msra.mxu0 %vm634_vm1, %v4466_v9  ;;  %5618 = vmatpush3.xpose.msk.msra.mxu1 %vm634_vm1, %v4466_v9 }
 0x58f   : > { %5590 = vmatmul.mubr.msk.f32.vlgmr.msra.gmra.mxu0 %vm634_vm1, %v4451_v40  ;;  %5602 = vmatmul.mubr.msk.f32.vlgmr.msra.gmra.mxu1 %vm634_vm1, %v4459_v63 }
 0x590   : > { %5592 = vmatprep.mubr.msk.f32.mxu0 %vm634_vm1, %v4452_v15  ;;  %5604 = vmatprep.mubr.msk.f32.mxu1 %vm634_vm1, %v4460_v38 }
 0x593   : > { %5593 = vmatmul.mubr.msk.f32.gmra.mxu0 %vm634_vm1, %v4453_v21  ;;  %5605 = vmatmul.mubr.msk.f32.gmra.mxu1 %vm634_vm1, %v4461_v39 }
 0x594   : > { %5595 = vmatprep.mubr.msk.f32.mxu0 %vm634_vm1, %v4454_v36  ;;  %5607 = vmatprep.mubr.msk.f32.mxu1 %vm634_vm1, %v4462_v56 }
 0x597   : > { %5596 = vmatmul.mubr.msk.f32.gmra.mxu0 %vm634_vm1, %v4455_v57  ;;  %5608 = vmatmul.mubr.msk.f32.gmra.mxu1 %vm634_vm1, %v4463_v44 }
 0x598   : > { %5598 = vmatprep.mubr.msk.f32.mxu0 %vm634_vm1, %v4456_v7  ;;  %5610 = vmatprep.mubr.msk.f32.mxu1 %vm634_vm1, %v4464_v0 }
 0x59b   : > { %5599 = vmatmul.mubr.msk.f32.gmra.mxu0 %vm634_vm1, %v4457_v24  ;;  %5611 = vmatmul.mubr.msk.f32.gmra.mxu1 %vm634_vm1, %v4465_v48 }
 0x64f   : > { %v5591_v61 = vpop.f32.mrf.mxu0  ;;  %v5603_v10 = vpop.f32.mrf.mxu1 }
 0x650   : > { %4673 = vst.msk [vmem:[%s8742_s13 + $0x8] sm:$0xff] %vm4671_vm2, %v5591_v61 }
 0x651   : > { %4681 = vst.msk [vmem:[%s8743_s10 + $0x48] sm:$0xff] %vm4671_vm2, %v5603_v10  ;;  %v4592_v50 = vpop.f32.mrf.mxu0  ;;  %v4632_v47 = vpop.f32.mrf.mxu1 }
 0x652   : > { %4672 = vst.msk [vmem:[%s8743_s10] sm:$0xff] %vm4671_vm2, %v4592_v50  ;;  %4680 = vst.msk [vmem:[%s8743_s10 + $0x40] sm:$0xff] %vm4671_vm2, %v4632_v47 }
 0x653   : > { %v5594_v37 = vpop.f32.mrf.mxu0  ;;  %v5606_v62 = vpop.f32.mrf.mxu1 }
 0x654   : > { %4675 = vst.msk [vmem:[%s8743_s10 + $0x18] sm:$0xff] %vm4671_vm2, %v5594_v37  ;;  %4683 = vst.msk [vmem:[%s8743_s10 + $0x58] sm:$0xff] %vm4671_vm2, %v5606_v62 }
 0x655   : > { %v4602_v32 = vpop.f32.mrf.mxu0  ;;  %v4642_v59 = vpop.f32.mrf.mxu1 }
 0x656   : > { %4674 = vst.msk [vmem:[%s8743_s10 + $0x10] sm:$0xff] %vm4671_vm2, %v4602_v32  ;;  %4682 = vst.msk [vmem:[%s8743_s10 + $0x50] sm:$0xff] %vm4671_vm2, %v4642_v59 }
 0x657   : > { %v5597_v33 = vpop.f32.mrf.mxu0  ;;  %v5609_v27 = vpop.f32.mrf.mxu1 }
 0x658   : > { %4677 = vst.msk [vmem:[%s8743_s10 + $0x28] sm:$0xff] %vm4671_vm2, %v5597_v33  ;;  %4685 = vst.msk [vmem:[%s8743_s10 + $0x68] sm:$0xff] %vm4671_vm2, %v5609_v27 }
 0x659   : > { %v4612_v20 = vpop.f32.mrf.mxu0  ;;  %v4652_v4 = vpop.f32.mrf.mxu1 }
 0x65a   : > { %4676 = vst.msk [vmem:[%s8743_s10 + $0x20] sm:$0xff] %vm4671_vm2, %v4612_v20  ;;  %4684 = vst.msk [vmem:[%s8743_s10 + $0x60] sm:$0xff] %vm4671_vm2, %v4652_v4 }
 0x65b   : > { %v5600_v25 = vpop.f32.mrf.mxu0  ;;  %v5612_v26 = vpop.f32.mrf.mxu1 }
 0x65c   : > { %4679 = vst.msk [vmem:[%s8743_s10 + $0x38] sm:$0xff] %vm4671_vm2, %v5600_v25  ;;  %4687 = vst.msk [vmem:[%s8743_s10 + $0x78] sm:$0xff] %vm4671_vm2, %v5612_v26 }
 0x65d   : > { %v4622_v49 = vpop.f32.mrf.mxu0  ;;  %v4662_v29 = vpop.f32.mrf.mxu1 }
 0x65e   : > { %4678 = vst.msk [vmem:[%s8743_s10 + $0x30] sm:$0xff] %vm4671_vm2, %v4622_v49  ;;  %4686 = vst.msk [vmem:[%s8743_s10 + $0x70] sm:$0xff] %vm4671_vm2, %v4662_v29 }
 0x65f PF: > { %s27_s18 = sadd.s32 1, %s6198_s18   ;;  %s8744_s12 = sld [smem:[#allocation15_spill]] }
 0x660   : > { %p24_p1 = scmp.ge.s32.totalorder %s27_s18, 5   ;;  %s8745_s16 = sld [smem:[#allocation13_spill]] }
 0x661   : > { %s8746_s17 = sld [smem:[#allocation14_spill]]  ;;  %s8747_s13 = smov %s6182_s14 }
 0x662   : > { %s8748_s14 = smov %s6186_s15  ;;  %26 = sbr.rel (!%p24_p1) target bundleno = 12 (0xc), region = 151 }
 0x665   : > { %s8749_s15 = smov %s8744_s12 }
 0x667   :  { %4710 = vsyncpa [#allocation4], 1 }
 0x668   :  { %4712 = vsyncpa [#allocation4 + $0x1], 1 }
 0x669   :  { %4713 = vsyncpa [#allocation6], 1 }
 0x66a   :  { %4715 = vsyncpa [#allocation6 + $0x1], 1 }
 0x66b   :  { %4716 = vsyncpa [#allocation9], 1 }
 0x66c   :  { %4718 = vsyncpa [#allocation9 + $0x1], 1 }

</bundles_post_ra>
